<compile_context>
chip_gen: v5e
topology: v5e:2x2
jax: 0.10.0
libtpu: 0.0.40
codegen_flags: <defaults>
</compile_context>

<pallas_src>
import functools
import numpy as np
import jax
import jax.numpy as jnp
from jax import lax
from jax.experimental import pallas as pl
from jax.experimental.pallas import tpu as pltpu

INF = 100000.0
DIM_HEAD = 8  # ViT_ESM constructs both Transformers with dim_head=8 (hard-coded)


def _round_up(x, m):
    return (x + m - 1) // m * m


# ----------------------------- in-kernel math helpers ------------------------------

def _leaky(x):
    return jnp.where(x >= 0.0, x, 0.2 * x)          # nn.LeakyReLU(negative_slope=0.2)


def _gelu(x):
    # exact (erf) GELU; erf via Abramowitz-Stegun 7.1.26, |abs err| < 1.5e-7.
    z = x * np.float32(1.0 / np.sqrt(2.0))
    az = jnp.abs(z)
    t = 1.0 / (1.0 + 0.3275911 * az)
    poly = t * (0.254829592 + t * (-0.284496736 + t * (1.421413741
               + t * (-1.453152027 + t * 1.061405429))))
    erf_abs = 1.0 - poly * jnp.exp(-az * az)
    erf = jnp.where(z >= 0.0, erf_abs, -erf_abs)
    return x * 0.5 * (1.0 + erf)


def _layernorm(x, g, b, eps=1e-5):
    mu = jnp.mean(x, axis=-1, keepdims=True)
    d = x - mu
    var = jnp.mean(d * d, axis=-1, keepdims=True)    # biased var, torch eps=1e-5
    return d * lax.rsqrt(var + eps) * g + b


def _pos_embed(c, w1, b1, w2, b2):
    h = jnp.dot(c, w1, preferred_element_type=jnp.float32) + b1
    h = _gelu(h)
    return jnp.dot(h, w2, preferred_element_type=jnp.float32) + b2


# --------------------- host-side weight packing (one packed buffer/kernel) ----------

class _Packer:
    """Packs many small weights into one 2-D f32 buffer.

    Each entry starts at an 8-aligned row offset; column width = max entry width.
    In-kernel retrieval is a static ref slice (free)."""

    def __init__(self):
        self._items = []

    def add(self, name, arr):
        a = np.asarray(arr, np.float32)
        if a.ndim == 1:
            a = a.reshape(1, -1)
        self._items.append((name, a))

    def finalize(self):
        width = max(a.shape[1] for _, a in self._items)
        offs, rows = {}, 0
        for name, a in self._items:
            offs[name] = (rows, a.shape[0], a.shape[1])
            rows += _round_up(a.shape[0], 8)
        rows = _round_up(max(rows, 8), 8)
        buf = np.zeros((rows, width), np.float32)
        for name, a in self._items:
            o, r, c = offs[name]
            buf[o:o + r, :c] = a
        return jnp.asarray(buf), offs


def _make_getter(pk_ref, offs):
    def get(name):
        o, r, c = offs[name]
        return pk_ref[o:o + r, 0:c]                  # static slice of a resident ref
    return get


def _pack_transformer(pk, prefix, tp, heads, dim_head=DIM_HEAD):
    """Pack one Transformer's weights; attention weights are pre-combined per head:
       A_h = Wq_h @ Wk_h^T * scale ;  B_h = Wv_h @ Wo_h   (mathematically identical)."""
    inner = heads * dim_head
    scale = dim_head ** -0.5
    for li, layer in enumerate(tp["layers"]):
        a, f = layer["attn"], layer["ff"]
        p = f"{prefix}{li}."
        pk.add(p + "aln_g", a["ln_g"])
        pk.add(p + "aln_b", a["ln_b"])
        qkv = np.asarray(a["qkv_w"], np.float32)          # (d, 3*inner), bias=False
        ow = np.asarray(a["out_w"], np.float32)           # (inner, d)
        for hh in range(heads):
            wq = qkv[:, hh * dim_head:(hh + 1) * dim_head]
            wk = qkv[:, inner + hh * dim_head:inner + (hh + 1) * dim_head]
            wv = qkv[:, 2 * inner + hh * dim_head:2 * inner + (hh + 1) * dim_head]
            pk.add(f"{p}A{hh}", (wq @ wk.T) * scale)       # (d, d), scale folded in
            pk.add(f"{p}B{hh}", wv @ ow[hh * dim_head:(hh + 1) * dim_head, :])  # (d, d)
        pk.add(p + "out_b", a["out_b"])
        pk.add(p + "fln_g", f["ln_g"])
        pk.add(p + "fln_b", f["ln_b"])
        pk.add(p + "w1", f["w1"])
        pk.add(p + "b1", f["b1"])
        pk.add(p + "w2", f["w2"])
        pk.add(p + "b2", f["b2"])
    pk.add(prefix + "norm_g", tp["norm_g"])
    pk.add(prefix + "norm_b", tp["norm_b"])


# -------------------------- in-kernel transformer (shared) --------------------------

def _transformer(x, get, prefix, depth, heads):
    """Pre-norm transformer layers + final LN.  All contractions are K=dim wide."""
    for li in range(depth):
        p = f"{prefix}{li}."
        h = _layernorm(x, get(p + "aln_g"), get(p + "aln_b"))
        attn = get(p + "out_b")                          # (1, d) out-proj bias
        for hh in range(heads):
            hA = jnp.dot(h, get(f"{p}A{hh}"), preferred_element_type=jnp.float32)
            s = lax.dot_general(hA, h, (((1,), (1,)), ((), ())),
                                preferred_element_type=jnp.float32)   # (n, n) scores
            s = s - jnp.max(s, axis=-1, keepdims=True)
            pr = jnp.exp(s)
            pr = pr * pl.reciprocal(jnp.sum(pr, axis=-1, keepdims=True), approx=True)
            hB = jnp.dot(h, get(f"{p}B{hh}"), preferred_element_type=jnp.float32)
            attn = attn + jnp.dot(pr, hB, preferred_element_type=jnp.float32)
        x = x + attn
        h2 = _layernorm(x, get(p + "fln_g"), get(p + "fln_b"))
        h2 = jnp.dot(h2, get(p + "w1"), preferred_element_type=jnp.float32) + get(p + "b1")
        h2 = _gelu(h2)
        h2 = jnp.dot(h2, get(p + "w2"), preferred_element_type=jnp.float32) + get(p + "b2")
        x = x + h2
    return _layernorm(x, get(prefix + "norm_g"), get(prefix + "norm_b"))


# ----------------------------- kernel 1: channel embedding --------------------------

def _mlp_kernel(x_ref, pk_ref, o_ref, *, offs, layers):
    get = _make_getter(pk_ref, offs)
    h = x_ref[...]
    for (wn, bn, act) in layers:
        h = jnp.dot(h, get(wn), preferred_element_type=jnp.float32) + get(bn)
        if act == "leaky":
            h = _leaky(h)
        elif act == "gelu":
            h = _gelu(h)
    o_ref[...] = h


def mlp_pallas(x, pk, offs, layers, dout, max_tile=1024):
    shape = x.shape
    din = shape[-1]
    x2 = x.reshape(-1, din).astype(jnp.float32)
    r = x2.shape[0]
    if r <= max_tile:
        tr = _round_up(r, 8)
        rp = tr
    else:
        tr = max_tile
        rp = _round_up(r, max_tile)
    if rp != r:
        x2 = jnp.pad(x2, ((0, rp - r), (0, 0)))
    out = pl.pallas_call(
        functools.partial(_mlp_kernel, offs=offs, layers=layers),
        grid=(rp // tr,),
        in_specs=[pl.BlockSpec((tr, din), lambda i: (i, 0)),
                  pl.BlockSpec(pk.shape, lambda i: (0, 0))],
        out_specs=pl.BlockSpec((tr, dout), lambda i: (i, 0)),
        out_shape=jax.ShapeDtypeStruct((rp, dout), jnp.float32),
        compiler_params=pltpu.CompilerParams(dimension_semantics=("parallel",)),
    )(x2, pk)
    return out[:r].reshape(shape[:-1] + (dout,))


# ---------------- kernel 2: subpatch embed + pos + sub-transformer + max-pool --------

def _stage1_kernel(f_ref, ctr_ref, ln1_ref, spw_ref, pk_ref, o_ref, *, offs, depth, heads):
    get = _make_getter(pk_ref, offs)
    # to_subpatch_embedding : LN(512) -> Linear(512, dim) -> LN(dim)
    h = _layernorm(f_ref[0], ln1_ref[0:1, :], ln1_ref[1:2, :])
    h = jnp.dot(h, spw_ref[...], preferred_element_type=jnp.float32) + get("sp_b")
    h = _layernorm(h, get("sp_ln2_g"), get("sp_ln2_b"))
    # + pos_embedding(subpatch_centers)
    pe = _pos_embed(ctr_ref[0], get("pe_w1"), get("pe_b1"), get("pe_w2"), get("pe_b2"))
    x = h + pe                                                    # (sub_patch, dim)
    # sub_transformer (layers + final LN)
    x = _transformer(x, get, "sub", depth, heads)
    # sub_pool = MaxPool1d(16,16) over the sub-patch axis, fused here (no HBM bounce)
    o_ref[0] = jnp.max(x, axis=0, keepdims=True)                  # (1, dim)


def stage1_pallas(features_inpatch, subpatch_centers, sp_ln1, sp_w, pk, offs, *, depth, heads):
    n, s, din = features_inpatch.shape
    dim = sp_w.shape[1]
    return pl.pallas_call(
        functools.partial(_stage1_kernel, offs=offs, depth=depth, heads=heads),
        grid=(n,),
        in_specs=[pl.BlockSpec((1, s, din), lambda i: (i, 0, 0)),
                  pl.BlockSpec((1, s, 3), lambda i: (i, 0, 0)),
                  pl.BlockSpec(sp_ln1.shape, lambda i: (0, 0)),
                  pl.BlockSpec(sp_w.shape, lambda i: (0, 0)),
                  pl.BlockSpec(pk.shape, lambda i: (0, 0))],
        out_specs=pl.BlockSpec((1, 1, dim), lambda i: (i, 0, 0)),
        out_shape=jax.ShapeDtypeStruct((n, 1, dim), jnp.float32),
        compiler_params=pltpu.CompilerParams(dimension_semantics=("parallel",)),
    )(features_inpatch, subpatch_centers, sp_ln1, sp_w, pk)


# ---- kernel 3: centering + pos + esm + concat-LN + main transformer + pool + head ---

def _stage2_kernel(spe_ref, pc_ref, esm_ref, esmw_ref, pk_ref, o_ref,
                   *, offs, dim, depth, heads):
    get = _make_getter(pk_ref, offs)
    spe = spe_ref[:, 0, :]                                        # (N, dim)
    pc = pc_ref[...]                                              # (N, 3)
    cc = pc - jnp.mean(pc, axis=0, keepdims=True)                 # center patch coords
    pe = _pos_embed(cc, get("pe_w1"), get("pe_b1"), get("pe_w2"), get("pe_b2"))
    a = spe + pe                   # torch's in-place `x += pos(...)` mutates subpatch_embedding
    e = jnp.dot(esm_ref[...], esmw_ref[...], preferred_element_type=jnp.float32) + get("esm_b")
    # concat([a, e], -1) via constant selector matmuls (no lane-shuffle concat)
    x = (jnp.dot(a, get("sel_lo"), preferred_element_type=jnp.float32)
         + jnp.dot(e, get("sel_hi"), preferred_element_type=jnp.float32))  # (N, 2*dim)
    x = _layernorm(x, get("ln_g"), get("ln_b"))
    # nn.Dropout(0.1): identity (eval mode)
    x = _transformer(x, get, "main", depth, heads)                # (N, 2*dim)
    # pool = MaxPool1d(2,2) over channels: max(even lanes, odd lanes) via selector matmuls
    ev = jnp.dot(x, get("sel_ev"), preferred_element_type=jnp.float32)
    od = jnp.dot(x, get("sel_od"), preferred_element_type=jnp.float32)
    out = jnp.maximum(ev, od) + a                                 # residual w/ mutated embedding
    # predict head: Linear(dim,16)+LReLU -> Linear(16,16)+LReLU -> Linear(16,2)
    out = _leaky(jnp.dot(out, get("ph_w1"), preferred_element_type=jnp.float32) + get("ph_b1"))
    out = _leaky(jnp.dot(out, get("ph_w2"), preferred_element_type=jnp.float32) + get("ph_b2"))
    out = jnp.dot(out, get("ph_w3"), preferred_element_type=jnp.float32) + get("ph_b3")
    o_ref[0] = out


def stage2_pallas(spe, pc, esm, esm_w, pk, offs, *, dim, depth, heads):
    n = spe.shape[0]
    # grid=(1,): attention runs over all N sites, so the whole sequence must be resident.
    return pl.pallas_call(
        functools.partial(_stage2_kernel, offs=offs, dim=dim, depth=depth, heads=heads),
        grid=(1,),
        in_specs=[pl.BlockSpec(spe.shape, lambda i: (0, 0, 0)),
                  pl.BlockSpec(pc.shape, lambda i: (0, 0)),
                  pl.BlockSpec(esm.shape, lambda i: (0, 0)),
                  pl.BlockSpec(esm_w.shape, lambda i: (0, 0)),
                  pl.BlockSpec(pk.shape, lambda i: (0, 0))],
        out_specs=pl.BlockSpec((1, n, 2), lambda i: (0, 0, 0)),
        out_shape=jax.ShapeDtypeStruct((1, n, 2), jnp.float32),
        compiler_params=pltpu.CompilerParams(dimension_semantics=("arbitrary",)),
    )(spe, pc, esm, esm_w, pk)


# ----------------------------- JAX glue (non-hot path) -----------------------------

# TODO(synk): FPS-KNN is a serial, data-dependent sampling loop (argmax / top-k / gather);
# kept as a single lax.scan + one batched top_k in XLA rather than a Pallas kernel.
def fps_knn(xyz, sub_patch, sub_neighbor, radius, key):
    B, n, _ = xyz.shape
    dist0 = jnp.sqrt(jnp.sum((xyz - xyz[:, 0:1, :]) ** 2, axis=-1))
    bad = dist0 > radius
    distance0 = jnp.where(bad, jnp.float32(-INF), jnp.float32(INF))
    vertices = jnp.where(bad[..., None], INF, xyz)                # in-place xyz mutation
    farthest0 = jax.random.randint(key, (B,), 0, 50)              # torch.randint(0, 50, (B,))
    rows = jnp.arange(B)

    def step(carry, _):
        distance, farthest = carry
        centroid = vertices[rows, farthest]                       # (B, 3)
        dist = jnp.sum((vertices - centroid[:, None, :]) ** 2, axis=-1)
        distance = jnp.where(dist < distance, dist, distance)
        nxt = jnp.argmax(distance, axis=-1)
        return (distance, nxt), (farthest, dist)

    _, (cents, dists) = lax.scan(step, (distance0, farthest0), None, length=sub_patch)
    cents = jnp.transpose(cents)                                  # (B, sub_patch)
    dists = jnp.transpose(dists, (1, 0, 2))                       # (B, sub_patch, n)
    _, k_idx = lax.top_k(-dists, sub_neighbor)                    # torch.topk(largest=False)
    return cents, k_idx, vertices


# ----------------------------- parameter prep & forward -----------------------------

def prepare_params(params, dim, heads, depth):
    """Host-side, one-time: pre-combine per-head attention weights and pack all small
    weights into one buffer per fused kernel."""
    d2 = 2 * dim
    # kernel 1: channel embedding
    ce = _Packer()
    ce.add("ce_w1", params["ce_w1"]); ce.add("ce_b1", params["ce_b1"])
    ce.add("ce_w2", params["ce_w2"]); ce.add("ce_b2", params["ce_b2"])
    ce_pk, ce_offs = ce.finalize()

    # kernel 2: subpatch embedding + sub transformer
    s1 = _Packer()
    s1.add("sp_b", params["sp_b"])
    s1.add("sp_ln2_g", params["sp_ln2_g"]); s1.add("sp_ln2_b", params["sp_ln2_b"])
    s1.add("pe_w1", params["pe_w1"]); s1.add("pe_b1", params["pe_b1"])
    s1.add("pe_w2", params["pe_w2"]); s1.add("pe_b2", params["pe_b2"])
    _pack_transformer(s1, "sub", params["sub_tr"], heads)
    s1_pk, s1_offs = s1.finalize()
    sp_ln1 = jnp.stack([jnp.asarray(params["sp_ln1_g"], jnp.float32),
                        jnp.asarray(params["sp_ln1_b"], jnp.float32)], axis=0)   # (2, 512)

    # kernel 3: stage-2 tail (prep + main transformer + pool + head)
    s2 = _Packer()
    s2.add("pe_w1", params["pe_w1"]); s2.add("pe_b1", params["pe_b1"])
    s2.add("pe_w2", params["pe_w2"]); s2.add("pe_b2", params["pe_b2"])
    s2.add("esm_b", params["esm_b"])
    s2.add("ln_g", params["ln_g"]); s2.add("ln_b", params["ln_b"])
    _pack_transformer(s2, "main", params["main_tr"], heads)
    s2.add("ph_w1", params["ph_w1"]); s2.add("ph_b1", params["ph_b1"])
    s2.add("ph_w2", params["ph_w2"]); s2.add("ph_b2", params["ph_b2"])
    s2.add("ph_w3", params["ph_w3"]); s2.add("ph_b3", params["ph_b3"])
    # constant selector matrices: concat-halves and channel-pair max-pool
    sel_lo = np.zeros((dim, d2), np.float32); sel_lo[np.arange(dim), np.arange(dim)] = 1.0
    sel_hi = np.zeros((dim, d2), np.float32); sel_hi[np.arange(dim), dim + np.arange(dim)] = 1.0
    sel_ev = np.zeros((d2, dim), np.float32); sel_ev[2 * np.arange(dim), np.arange(dim)] = 1.0
    sel_od = np.zeros((d2, dim), np.float32); sel_od[2 * np.arange(dim) + 1, np.arange(dim)] = 1.0
    s2.add("sel_lo", sel_lo); s2.add("sel_hi", sel_hi)
    s2.add("sel_ev", sel_ev); s2.add("sel_od", sel_od)
    s2_pk, s2_offs = s2.finalize()

    arrays = {"ce_pk": ce_pk,
              "s1_pk": s1_pk, "sp_ln1": sp_ln1,
              "sp_w": jnp.asarray(params["sp_w"], jnp.float32),
              "s2_pk": s2_pk,
              "esm_w": jnp.asarray(params["esm_w"], jnp.float32)}
    meta = {"ce_offs": ce_offs, "s1_offs": s1_offs, "s2_offs": s2_offs}
    return arrays, meta


def make_forward(meta, *, dim, heads, depth, sub_neighbor=16, sub_patch=16):
    ce_offs = meta["ce_offs"]
    s1_offs = meta["s1_offs"]
    s2_offs = meta["s2_offs"]

    def fwd(arrays, features, xyz, nuv, esm, fps_key):
        del nuv  # unused by the torch forward
        N, M, _ = features.shape
        xyz = xyz.astype(jnp.float32)
        features = features.astype(jnp.float32)
        esm = esm.astype(jnp.float32)

        # 1) channel_embedding (fused MLP kernel)
        f = mlp_pallas(features, arrays["ce_pk"], ce_offs,
                       [("ce_w1", "ce_b1", "leaky"), ("ce_w2", "ce_b2", "leaky")], dout=32)

        # 2) FPS + kNN (serial sampling, lax.scan) and gathers (XLA)
        _, patches, xyz_m = fps_knn(xyz, sub_patch, sub_neighbor, 20.0, fps_key)
        patches_reshape = patches.reshape(N, sub_patch * sub_neighbor)
        row_idx = jnp.arange(N)[:, None]
        features_inpatch = f[row_idx, patches_reshape].reshape(
            N, sub_patch, sub_neighbor * f.shape[-1])                      # (N, 16, 512)
        xyz_inpatch = xyz_m[row_idx, patches_reshape].reshape(
            N, sub_patch, sub_neighbor, 3)
        patch_centers = jnp.mean(xyz_m, axis=1, keepdims=True)             # (N, 1, 3)
        subpatch_centers = (jnp.mean(xyz_inpatch, axis=2) - patch_centers) # (N, 16, 3)

        # 3) stage-1 fused kernel -> per-site max-pooled subpatch embedding (N, 1, dim)
        spe = stage1_pallas(features_inpatch, subpatch_centers.astype(jnp.float32),
                            arrays["sp_ln1"], arrays["sp_w"], arrays["s1_pk"], s1_offs,
                            depth=depth, heads=heads)

        # 4) stage-2 fused kernel -> (1, N, 2)
        pc = patch_centers[:, 0, :]                                         # (N, 3)
        out = stage2_pallas(spe, pc, esm, arrays["esm_w"], arrays["s2_pk"], s2_offs,
                            dim=dim, depth=depth, heads=heads)
        return out

    return jax.jit(fwd)


# ----------------------------- parameter init ---------------------------------------

def init_params(key, dim=32, depth=1, heads=4, mlp_dim=64, channels=12, sub_neighbor=16):
    kit = iter(jax.random.split(key, 256))

    def lin(din, dout):
        k1, k2 = next(kit), next(kit)
        bound = 1.0 / np.sqrt(din)
        w = jax.random.uniform(k1, (din, dout), jnp.float32, -bound, bound)
        b = jax.random.uniform(k2, (dout,), jnp.float32, -bound, bound)
        return w, b

    def ln(d):
        return jnp.ones((d,), jnp.float32), jnp.zeros((d,), jnp.float32)

    def transformer_params(d):
        inner = heads * DIM_HEAD
        layers = []
        for _ in range(depth):
            a_g, a_b = ln(d)
            qkv_w, _ = lin(d, 3 * inner)                 # to_qkv, bias=False
            out_w, out_b = lin(inner, d)
            f_g, f_b = ln(d)
            w1, b1 = lin(d, mlp_dim)
            w2, b2 = lin(mlp_dim, d)
            layers.append({"attn": {"ln_g": a_g, "ln_b": a_b, "qkv_w": qkv_w,
                                    "out_w": out_w, "out_b": out_b},
                           "ff": {"ln_g": f_g, "ln_b": f_b,
                                  "w1": w1, "b1": b1, "w2": w2, "b2": b2}})
        ng, nb = ln(d)
        return {"layers": layers, "norm_g": ng, "norm_b": nb}

    p = {}
    p["ce_w1"], p["ce_b1"] = lin(channels, 32)
    p["ce_w2"], p["ce_b2"] = lin(32, 32)
    p["sp_ln1_g"], p["sp_ln1_b"] = ln(sub_neighbor * 32)
    p["sp_w"], p["sp_b"] = lin(sub_neighbor * 32, dim)
    p["sp_ln2_g"], p["sp_ln2_b"] = ln(dim)
    p["sub_tr"] = transformer_params(dim)
    p["esm_w"], p["esm_b"] = lin(1280, dim)
    p["pe_w1"], p["pe_b1"] = lin(3, dim)
    p["pe_w2"], p["pe_b2"] = lin(dim, dim)
    p["main_tr"] = transformer_params(2 * dim)
    p["ln_g"], p["ln_b"] = ln(2 * dim)
    p["ph_w1"], p["ph_b1"] = lin(dim, 16)
    p["ph_w2"], p["ph_b2"] = lin(16, 16)
    p["ph_w3"], p["ph_b3"] = lin(16, 2)
    return p


# --------------------------------- main ---------------------------------------------

if __name__ == "__main__":
    key = jax.random.PRNGKey(0)
    kp, kf, kx, kn, ke, kfps = jax.random.split(key, 6)

    N, M, C = 4, 64, 12            # N sites, M points per site, 12 channels
    dim, depth, heads, mlp_dim = 32, 1, 4, 64

    params = init_params(kp, dim=dim, depth=depth, heads=heads,
                         mlp_dim=mlp_dim, channels=C)
    arrays, meta = prepare_params(params, dim, heads, depth)

    features = jax.random.normal(kf, (N, M, C), dtype=jnp.float32)
    xyz = jax.random.normal(kx, (N, M, 3), dtype=jnp.float32) * 5.0
    nuv = jax.random.normal(kn, (N, M, 3), dtype=jnp.float32)   # unused by forward
    esm = jax.random.normal(ke, (N, 1280), dtype=jnp.float32)

    fwd = make_forward(meta, dim=dim, heads=heads, depth=depth,
                       sub_neighbor=16, sub_patch=16)
    out = jax.block_until_ready(fwd(arrays, features, xyz, nuv, esm, kfps))
    assert out.shape == (1, N, 2) and out.dtype == jnp.float32
    print("KERNEL_OK")
</pallas_src>

<mosaic_0001>
module attributes {stable_mosaic.version = 11 : i64} {
  func.func @_mlp_kernel(%arg0: i32, %arg1: memref<256x12xf32, #tpu.memory_space<vmem>>, %arg2: memref<64x32xf32, #tpu.memory_space<vmem>>, %arg3: memref<256x32xf32, #tpu.memory_space<vmem>>) attributes {dimension_semantics = [#tpu.dimension_semantics<parallel>], iteration_bounds = array<i64: 1>, scalar_prefetch = 0 : i64, scratch_operands = 0 : i64, tpu.core_type = #tpu.core_type<tc>, window_params = [{transform_indices = @transform_0, window_bounds = array<i64: 256, 12>}, {pipeline_mode = #tpu.pipeline_mode<synchronous>, transform_indices = @transform_1, window_bounds = array<i64: 64, 32>}, {transform_indices = @transform_2, window_bounds = array<i64: 256, 32>}]} {
    %c0 = arith.constant 0 : index
    %c0_0 = arith.constant 0 : index
    %0 = vector.load %arg1[%c0, %c0_0] : memref<256x12xf32, #tpu.memory_space<vmem>>, vector<256x12xf32>
    %c0_1 = arith.constant 0 : index
    %c0_2 = arith.constant 0 : index
    %1 = vector.load %arg2[%c0_1, %c0_2] : memref<64x32xf32, #tpu.memory_space<vmem>>, vector<12x32xf32>
    %cst = arith.constant dense<0.000000e+00> : vector<256x32xf32>
    %2 = tpu.matmul %0, %1, %cst {dimension_numbers = #tpu.dot_dimension_numbers<[1], [0], [0], [1], [0, 0, 1, 1], [], []>} : vector<256x12xf32>, vector<12x32xf32>, vector<256x32xf32> -> vector<256x32xf32>
    %c16 = arith.constant 16 : index
    %c0_3 = arith.constant 0 : index
    %3 = vector.load %arg2[%c16, %c0_3] : memref<64x32xf32, #tpu.memory_space<vmem>>, vector<1x32xf32>
    %4 = vector.broadcast %3 : vector<1x32xf32> to vector<256x32xf32>
    %5 = arith.addf %2, %4 : vector<256x32xf32>
    %cst_4 = arith.constant 0.000000e+00 : f32
    %6 = vector.broadcast %cst_4 : f32 to vector<256x32xf32>
    %7 = arith.cmpf oge, %5, %6 : vector<256x32xf32>
    %cst_5 = arith.constant 2.000000e-01 : f32
    %8 = vector.broadcast %cst_5 : f32 to vector<256x32xf32>
    %9 = arith.mulf %8, %5 : vector<256x32xf32>
    %10 = arith.select %7, %5, %9 : vector<256x32xi1>, vector<256x32xf32>
    %c24 = arith.constant 24 : index
    %c0_6 = arith.constant 0 : index
    %11 = vector.load %arg2[%c24, %c0_6] : memref<64x32xf32, #tpu.memory_space<vmem>>, vector<32x32xf32>
    %cst_7 = arith.constant dense<0.000000e+00> : vector<256x32xf32>
    %12 = tpu.matmul %10, %11, %cst_7 {dimension_numbers = #tpu.dot_dimension_numbers<[1], [0], [0], [1], [0, 0, 1, 1], [], []>} : vector<256x32xf32>, vector<32x32xf32>, vector<256x32xf32> -> vector<256x32xf32>
    %c56 = arith.constant 56 : index
    %c0_8 = arith.constant 0 : index
    %13 = vector.load %arg2[%c56, %c0_8] : memref<64x32xf32, #tpu.memory_space<vmem>>, vector<1x32xf32>
    %14 = vector.broadcast %13 : vector<1x32xf32> to vector<256x32xf32>
    %15 = arith.addf %12, %14 : vector<256x32xf32>
    %cst_9 = arith.constant 0.000000e+00 : f32
    %16 = vector.broadcast %cst_9 : f32 to vector<256x32xf32>
    %17 = arith.cmpf oge, %15, %16 : vector<256x32xf32>
    %cst_10 = arith.constant 2.000000e-01 : f32
    %18 = vector.broadcast %cst_10 : f32 to vector<256x32xf32>
    %19 = arith.mulf %18, %15 : vector<256x32xf32>
    %20 = arith.select %17, %15, %19 : vector<256x32xi1>, vector<256x32xf32>
    %c0_11 = arith.constant 0 : index
    %c0_12 = arith.constant 0 : index
    %21 = vector.load %arg3[%c0_11, %c0_12] : memref<256x32xf32, #tpu.memory_space<vmem>>, vector<256x32xf32>
    tpu.vector_store %arg3[%c0_11, %c0_12], %20 {strides = array<i32>} : memref<256x32xf32, #tpu.memory_space<vmem>>, vector<256x32xf32>,
    return
  }
  func.func @transform_0(%arg0: i32) -> (i32, i32) {
    %c0_i32 = arith.constant 0 : i32
    %c0_i32_0 = arith.constant 0 : i32
    return %arg0, %c0_i32 : i32, i32
  }
  func.func @transform_1(%arg0: i32) -> (i32, i32) {
    %c0_i32 = arith.constant 0 : i32
    %c0_i32_0 = arith.constant 0 : i32
    %c0_i32_1 = arith.constant 0 : i32
    return %c0_i32, %c0_i32_0 : i32, i32
  }
  func.func @transform_2(%arg0: i32) -> (i32, i32) {
    %c0_i32 = arith.constant 0 : i32
    %c0_i32_0 = arith.constant 0 : i32
    return %arg0, %c0_i32 : i32, i32
  }
}

module attributes {stable_mosaic.version = 11 : i64} {
  func.func @_stage1_kernel(%arg0: i32, %arg1: memref<1x16x512xf32, #tpu.memory_space<vmem>>, %arg2: memref<1x16x3xf32, #tpu.memory_space<vmem>>, %arg3: memref<2x512xf32, #tpu.memory_space<vmem>>, %arg4: memref<512x32xf32, #tpu.memory_space<vmem>>, %arg5: memref<504x64xf32, #tpu.memory_space<vmem>>, %arg6: memref<1x1x32xf32, #tpu.memory_space<vmem>>) attributes {dimension_semantics = [#tpu.dimension_semantics<parallel>], iteration_bounds = array<i64: 4>, scalar_prefetch = 0 : i64, scratch_operands = 0 : i64, tpu.core_type = #tpu.core_type<tc>, window_params = [{transform_indices = @transform_0, window_bounds = array<i64: 1, 16, 512>}, {transform_indices = @transform_1, window_bounds = array<i64: 1, 16, 3>}, {pipeline_mode = #tpu.pipeline_mode<synchronous>, transform_indices = @transform_2, window_bounds = array<i64: 2, 512>}, {pipeline_mode = #tpu.pipeline_mode<synchronous>, transform_indices = @transform_3, window_bounds = array<i64: 512, 32>}, {pipeline_mode = #tpu.pipeline_mode<synchronous>, transform_indices = @transform_4, window_bounds = array<i64: 504, 64>}, {transform_indices = @transform_5, window_bounds = array<i64: 1, 1, 32>}]} {
    %c0 = arith.constant 0 : index
    %c0_0 = arith.constant 0 : index
    %c0_1 = arith.constant 0 : index
    %0 = vector.load %arg1[%c0, %c0_0, %c0_1] : memref<1x16x512xf32, #tpu.memory_space<vmem>>, vector<1x16x512xf32>
    %1 = vector.shape_cast %0 : vector<1x16x512xf32> to vector<16x512xf32>
    %c0_2 = arith.constant 0 : index
    %c0_3 = arith.constant 0 : index
    %2 = vector.load %arg3[%c0_2, %c0_3] : memref<2x512xf32, #tpu.memory_space<vmem>>, vector<1x512xf32>
    %c1 = arith.constant 1 : index
    %c0_4 = arith.constant 0 : index
    %3 = vector.load %arg3[%c1, %c0_4] : memref<2x512xf32, #tpu.memory_space<vmem>>, vector<1x512xf32>
    %cst = arith.constant dense<0.000000e+00> : vector<16xf32>
    %4 = vector.multi_reduction <add>, %1, %cst [1] : vector<16x512xf32> to vector<16xf32>
    %5 = vector.shape_cast %4 : vector<16xf32> to vector<16x1xf32>
    %cst_5 = arith.constant 5.120000e+02 : f32
    %6 = vector.broadcast %cst_5 : f32 to vector<16x1xf32>
    %7 = arith.divf %5, %6 : vector<16x1xf32>
    %8 = vector.broadcast %7 : vector<16x1xf32> to vector<16x512xf32>
    %9 = arith.subf %1, %8 : vector<16x512xf32>
    %10 = arith.mulf %9, %9 : vector<16x512xf32>
    %cst_6 = arith.constant dense<0.000000e+00> : vector<16xf32>
    %11 = vector.multi_reduction <add>, %10, %cst_6 [1] : vector<16x512xf32> to vector<16xf32>
    %12 = vector.shape_cast %11 : vector<16xf32> to vector<16x1xf32>
    %cst_7 = arith.constant 5.120000e+02 : f32
    %13 = vector.broadcast %cst_7 : f32 to vector<16x1xf32>
    %14 = arith.divf %12, %13 : vector<16x1xf32>
    %cst_8 = arith.constant 9.99999974E-6 : f32
    %15 = vector.broadcast %cst_8 : f32 to vector<16x1xf32>
    %16 = arith.addf %14, %15 : vector<16x1xf32>
    %17 = math.rsqrt %16 : vector<16x1xf32>
    %18 = vector.broadcast %17 : vector<16x1xf32> to vector<16x512xf32>
    %19 = arith.mulf %9, %18 : vector<16x512xf32>
    %20 = vector.broadcast %2 : vector<1x512xf32> to vector<16x512xf32>
    %21 = arith.mulf %19, %20 : vector<16x512xf32>
    %22 = vector.broadcast %3 : vector<1x512xf32> to vector<16x512xf32>
    %23 = arith.addf %21, %22 : vector<16x512xf32>
    %c0_9 = arith.constant 0 : index
    %c0_10 = arith.constant 0 : index
    %24 = vector.load %arg4[%c0_9, %c0_10] : memref<512x32xf32, #tpu.memory_space<vmem>>, vector<512x32xf32>
    %cst_11 = arith.constant dense<0.000000e+00> : vector<16x32xf32>
    %25 = tpu.matmul %23, %24, %cst_11 {dimension_numbers = #tpu.dot_dimension_numbers<[1], [0], [0], [1], [0, 0, 1, 1], [], []>} : vector<16x512xf32>, vector<512x32xf32>, vector<16x32xf32> -> vector<16x32xf32>
    %c0_12 = arith.constant 0 : index
    %c0_13 = arith.constant 0 : index
    %26 = vector.load %arg5[%c0_12, %c0_13] : memref<504x64xf32, #tpu.memory_space<vmem>>, vector<1x32xf32>
    %27 = vector.broadcast %26 : vector<1x32xf32> to vector<16x32xf32>
    %28 = arith.addf %25, %27 : vector<16x32xf32>
    %c8 = arith.constant 8 : index
    %c0_14 = arith.constant 0 : index
    %29 = vector.load %arg5[%c8, %c0_14] : memref<504x64xf32, #tpu.memory_space<vmem>>, vector<1x32xf32>
    %c16 = arith.constant 16 : index
    %c0_15 = arith.constant 0 : index
    %30 = vector.load %arg5[%c16, %c0_15] : memref<504x64xf32, #tpu.memory_space<vmem>>, vector<1x32xf32>
    %cst_16 = arith.constant dense<0.000000e+00> : vector<16xf32>
    %31 = vector.multi_reduction <add>, %28, %cst_16 [1] : vector<16x32xf32> to vector<16xf32>
    %32 = vector.shape_cast %31 : vector<16xf32> to vector<16x1xf32>
    %cst_17 = arith.constant 3.200000e+01 : f32
    %33 = vector.broadcast %cst_17 : f32 to vector<16x1xf32>
    %34 = arith.divf %32, %33 : vector<16x1xf32>
    %35 = vector.broadcast %34 : vector<16x1xf32> to vector<16x32xf32>
    %36 = arith.subf %28, %35 : vector<16x32xf32>
    %37 = arith.mulf %36, %36 : vector<16x32xf32>
    %cst_18 = arith.constant dense<0.000000e+00> : vector<16xf32>
    %38 = vector.multi_reduction <add>, %37, %cst_18 [1] : vector<16x32xf32> to vector<16xf32>
    %39 = vector.shape_cast %38 : vector<16xf32> to vector<16x1xf32>
    %cst_19 = arith.constant 3.200000e+01 : f32
    %40 = vector.broadcast %cst_19 : f32 to vector<16x1xf32>
    %41 = arith.divf %39, %40 : vector<16x1xf32>
    %cst_20 = arith.constant 9.99999974E-6 : f32
    %42 = vector.broadcast %cst_20 : f32 to vector<16x1xf32>
    %43 = arith.addf %41, %42 : vector<16x1xf32>
    %44 = math.rsqrt %43 : vector<16x1xf32>
    %45 = vector.broadcast %44 : vector<16x1xf32> to vector<16x32xf32>
    %46 = arith.mulf %36, %45 : vector<16x32xf32>
    %47 = vector.broadcast %29 : vector<1x32xf32> to vector<16x32xf32>
    %48 = arith.mulf %46, %47 : vector<16x32xf32>
    %49 = vector.broadcast %30 : vector<1x32xf32> to vector<16x32xf32>
    %50 = arith.addf %48, %49 : vector<16x32xf32>
    %c0_21 = arith.constant 0 : index
    %c0_22 = arith.constant 0 : index
    %c0_23 = arith.constant 0 : index
    %51 = vector.load %arg2[%c0_21, %c0_22, %c0_23] : memref<1x16x3xf32, #tpu.memory_space<vmem>>, vector<1x16x3xf32>
    %52 = vector.shape_cast %51 : vector<1x16x3xf32> to vector<16x3xf32>
    %c24 = arith.constant 24 : index
    %c0_24 = arith.constant 0 : index
    %53 = vector.load %arg5[%c24, %c0_24] : memref<504x64xf32, #tpu.memory_space<vmem>>, vector<3x32xf32>
    %c32 = arith.constant 32 : index
    %c0_25 = arith.constant 0 : index
    %54 = vector.load %arg5[%c32, %c0_25] : memref<504x64xf32, #tpu.memory_space<vmem>>, vector<1x32xf32>
    %c40 = arith.constant 40 : index
    %c0_26 = arith.constant 0 : index
    %55 = vector.load %arg5[%c40, %c0_26] : memref<504x64xf32, #tpu.memory_space<vmem>>, vector<32x32xf32>
    %c72 = arith.constant 72 : index
    %c0_27 = arith.constant 0 : index
    %56 = vector.load %arg5[%c72, %c0_27] : memref<504x64xf32, #tpu.memory_space<vmem>>, vector<1x32xf32>
    %cst_28 = arith.constant dense<0.000000e+00> : vector<16x32xf32>
    %57 = tpu.matmul %52, %53, %cst_28 {dimension_numbers = #tpu.dot_dimension_numbers<[1], [0], [0], [1], [0, 0, 1, 1], [], []>} : vector<16x3xf32>, vector<3x32xf32>, vector<16x32xf32> -> vector<16x32xf32>
    %58 = vector.broadcast %54 : vector<1x32xf32> to vector<16x32xf32>
    %59 = arith.addf %57, %58 : vector<16x32xf32>
    %cst_29 = arith.constant 0.707106769 : f32
    %60 = vector.broadcast %cst_29 : f32 to vector<16x32xf32>
    %61 = arith.mulf %59, %60 : vector<16x32xf32>
    %62 = math.absf %61 : vector<16x32xf32>
    %cst_30 = arith.constant 0.327591091 : f32
    %63 = vector.broadcast %cst_30 : f32 to vector<16x32xf32>
    %64 = arith.mulf %63, %62 : vector<16x32xf32>
    %cst_31 = arith.constant 1.000000e+00 : f32
    %65 = vector.broadcast %cst_31 : f32 to vector<16x32xf32>
    %66 = arith.addf %65, %64 : vector<16x32xf32>
    %cst_32 = arith.constant 1.000000e+00 : f32
    %67 = vector.broadcast %cst_32 : f32 to vector<16x32xf32>
    %68 = arith.divf %67, %66 : vector<16x32xf32>
    %cst_33 = arith.constant 1.06140542 : f32
    %69 = vector.broadcast %cst_33 : f32 to vector<16x32xf32>
    %70 = arith.mulf %68, %69 : vector<16x32xf32>
    %cst_34 = arith.constant -1.45315206 : f32
    %71 = vector.broadcast %cst_34 : f32 to vector<16x32xf32>
    %72 = arith.addf %71, %70 : vector<16x32xf32>
    %73 = arith.mulf %68, %72 : vector<16x32xf32>
    %cst_35 = arith.constant 1.42141378 : f32
    %74 = vector.broadcast %cst_35 : f32 to vector<16x32xf32>
    %75 = arith.addf %74, %73 : vector<16x32xf32>
    %76 = arith.mulf %68, %75 : vector<16x32xf32>
    %cst_36 = arith.constant -0.284496725 : f32
    %77 = vector.broadcast %cst_36 : f32 to vector<16x32xf32>
    %78 = arith.addf %77, %76 : vector<16x32xf32>
    %79 = arith.mulf %68, %78 : vector<16x32xf32>
    %cst_37 = arith.constant 0.254829586 : f32
    %80 = vector.broadcast %cst_37 : f32 to vector<16x32xf32>
    %81 = arith.addf %80, %79 : vector<16x32xf32>
    %82 = arith.mulf %68, %81 : vector<16x32xf32>
    %cst_38 = arith.constant 0.000000e+00 : f32
    %83 = vector.broadcast %cst_38 : f32 to vector<16x32xf32>
    %84 = arith.subf %83, %62 : vector<16x32xf32>
    %85 = arith.mulf %84, %62 : vector<16x32xf32>
    %86 = math.exp %85 : vector<16x32xf32>
    %87 = arith.mulf %82, %86 : vector<16x32xf32>
    %cst_39 = arith.constant 1.000000e+00 : f32
    %88 = vector.broadcast %cst_39 : f32 to vector<16x32xf32>
    %89 = arith.subf %88, %87 : vector<16x32xf32>
    %cst_40 = arith.constant 0.000000e+00 : f32
    %90 = vector.broadcast %cst_40 : f32 to vector<16x32xf32>
    %91 = arith.cmpf oge, %61, %90 : vector<16x32xf32>
    %cst_41 = arith.constant 0.000000e+00 : f32
    %92 = vector.broadcast %cst_41 : f32 to vector<16x32xf32>
    %93 = arith.subf %92, %89 : vector<16x32xf32>
    %94 = arith.select %91, %89, %93 : vector<16x32xi1>, vector<16x32xf32>
    %cst_42 = arith.constant 5.000000e-01 : f32
    %95 = vector.broadcast %cst_42 : f32 to vector<16x32xf32>
    %96 = arith.mulf %59, %95 : vector<16x32xf32>
    %cst_43 = arith.constant 1.000000e+00 : f32
    %97 = vector.broadcast %cst_43 : f32 to vector<16x32xf32>
    %98 = arith.addf %97, %94 : vector<16x32xf32>
    %99 = arith.mulf %96, %98 : vector<16x32xf32>
    %cst_44 = arith.constant dense<0.000000e+00> : vector<16x32xf32>
    %100 = tpu.matmul %99, %55, %cst_44 {dimension_numbers = #tpu.dot_dimension_numbers<[1], [0], [0], [1], [0, 0, 1, 1], [], []>} : vector<16x32xf32>, vector<32x32xf32>, vector<16x32xf32> -> vector<16x32xf32>
    %101 = vector.broadcast %56 : vector<1x32xf32> to vector<16x32xf32>
    %102 = arith.addf %100, %101 : vector<16x32xf32>
    %103 = arith.addf %50, %102 : vector<16x32xf32>
    %c80 = arith.constant 80 : index
    %c0_45 = arith.constant 0 : index
    %104 = vector.load %arg5[%c80, %c0_45] : memref<504x64xf32, #tpu.memory_space<vmem>>, vector<1x32xf32>
    %c88 = arith.constant 88 : index
    %c0_46 = arith.constant 0 : index
    %105 = vector.load %arg5[%c88, %c0_46] : memref<504x64xf32, #tpu.memory_space<vmem>>, vector<1x32xf32>
    %cst_47 = arith.constant dense<0.000000e+00> : vector<16xf32>
    %106 = vector.multi_reduction <add>, %103, %cst_47 [1] : vector<16x32xf32> to vector<16xf32>
    %107 = vector.shape_cast %106 : vector<16xf32> to vector<16x1xf32>
    %cst_48 = arith.constant 3.200000e+01 : f32
    %108 = vector.broadcast %cst_48 : f32 to vector<16x1xf32>
    %109 = arith.divf %107, %108 : vector<16x1xf32>
    %110 = vector.broadcast %109 : vector<16x1xf32> to vector<16x32xf32>
    %111 = arith.subf %103, %110 : vector<16x32xf32>
    %112 = arith.mulf %111, %111 : vector<16x32xf32>
    %cst_49 = arith.constant dense<0.000000e+00> : vector<16xf32>
    %113 = vector.multi_reduction <add>, %112, %cst_49 [1] : vector<16x32xf32> to vector<16xf32>
    %114 = vector.shape_cast %113 : vector<16xf32> to vector<16x1xf32>
    %cst_50 = arith.constant 3.200000e+01 : f32
    %115 = vector.broadcast %cst_50 : f32 to vector<16x1xf32>
    %116 = arith.divf %114, %115 : vector<16x1xf32>
    %cst_51 = arith.constant 9.99999974E-6 : f32
    %117 = vector.broadcast %cst_51 : f32 to vector<16x1xf32>
    %118 = arith.addf %116, %117 : vector<16x1xf32>
    %119 = math.rsqrt %118 : vector<16x1xf32>
    %120 = vector.broadcast %119 : vector<16x1xf32> to vector<16x32xf32>
    %121 = arith.mulf %111, %120 : vector<16x32xf32>
    %122 = vector.broadcast %104 : vector<1x32xf32> to vector<16x32xf32>
    %123 = arith.mulf %121, %122 : vector<16x32xf32>
    %124 = vector.broadcast %105 : vector<1x32xf32> to vector<16x32xf32>
    %125 = arith.addf %123, %124 : vector<16x32xf32>
    %c352 = arith.constant 352 : index
    %c0_52 = arith.constant 0 : index
    %126 = vector.load %arg5[%c352, %c0_52] : memref<504x64xf32, #tpu.memory_space<vmem>>, vector<1x32xf32>
    %c96 = arith.constant 96 : index
    %c0_53 = arith.constant 0 : index
    %127 = vector.load %arg5[%c96, %c0_53] : memref<504x64xf32, #tpu.memory_space<vmem>>, vector<32x32xf32>
    %cst_54 = arith.constant dense<0.000000e+00> : vector<16x32xf32>
    %128 = tpu.matmul %125, %127, %cst_54 {dimension_numbers = #tpu.dot_dimension_numbers<[1], [0], [0], [1], [0, 0, 1, 1], [], []>} : vector<16x32xf32>, vector<32x32xf32>, vector<16x32xf32> -> vector<16x32xf32>
    %cst_55 = arith.constant dense<0.000000e+00> : vector<16x16xf32>
    %129 = tpu.matmul %128, %125, %cst_55 {dimension_numbers = #tpu.dot_dimension_numbers<[1], [1], [0], [0], [0, 0, 1, 0], [], []>} : vector<16x32xf32>, vector<16x32xf32>, vector<16x16xf32> -> vector<16x16xf32>
    %cst_56 = arith.constant dense<0xFF800000> : vector<16xf32>
    %130 = vector.multi_reduction <maximumf>, %129, %cst_56 [1] : vector<16x16xf32> to vector<16xf32>
    %131 = vector.shape_cast %130 : vector<16xf32> to vector<16x1xf32>
    %132 = vector.broadcast %131 : vector<16x1xf32> to vector<16x16xf32>
    %133 = arith.subf %129, %132 : vector<16x16xf32>
    %134 = math.exp %133 : vector<16x16xf32>
    %cst_57 = arith.constant dense<0.000000e+00> : vector<16xf32>
    %135 = vector.multi_reduction <add>, %134, %cst_57 [1] : vector<16x16xf32> to vector<16xf32>
    %136 = vector.shape_cast %135 : vector<16xf32> to vector<16x1xf32>
    %137 = tpu.reciprocal %136 {approx = true} : vector<16x1xf32> -> vector<16x1xf32>
    %138 = vector.broadcast %137 : vector<16x1xf32> to vector<16x16xf32>
    %139 = arith.mulf %134, %138 : vector<16x16xf32>
    %c128 = arith.constant 128 : index
    %c0_58 = arith.constant 0 : index
    %140 = vector.load %arg5[%c128, %c0_58] : memref<504x64xf32, #tpu.memory_space<vmem>>, vector<32x32xf32>
    %cst_59 = arith.constant dense<0.000000e+00> : vector<16x32xf32>
    %141 = tpu.matmul %125, %140, %cst_59 {dimension_numbers = #tpu.dot_dimension_numbers<[1], [0], [0], [1], [0, 0, 1, 1], [], []>} : vector<16x32xf32>, vector<32x32xf32>, vector<16x32xf32> -> vector<16x32xf32>
    %cst_60 = arith.constant dense<0.000000e+00> : vector<16x32xf32>
    %142 = tpu.matmul %139, %141, %cst_60 {dimension_numbers = #tpu.dot_dimension_numbers<[1], [0], [0], [1], [0, 0, 1, 1], [], []>} : vector<16x16xf32>, vector<16x32xf32>, vector<16x32xf32> -> vector<16x32xf32>
    %143 = vector.broadcast %126 : vector<1x32xf32> to vector<16x32xf32>
    %144 = arith.addf %143, %142 : vector<16x32xf32>
    %c160 = arith.constant 160 : index
    %c0_61 = arith.constant 0 : index
    %145 = vector.load %arg5[%c160, %c0_61] : memref<504x64xf32, #tpu.memory_space<vmem>>, vector<32x32xf32>
    %cst_62 = arith.constant dense<0.000000e+00> : vector<16x32xf32>
    %146 = tpu.matmul %125, %145, %cst_62 {dimension_numbers = #tpu.dot_dimension_numbers<[1], [0], [0], [1], [0, 0, 1, 1], [], []>} : vector<16x32xf32>, vector<32x32xf32>, vector<16x32xf32> -> vector<16x32xf32>
    %cst_63 = arith.constant dense<0.000000e+00> : vector<16x16xf32>
    %147 = tpu.matmul %146, %125, %cst_63 {dimension_numbers = #tpu.dot_dimension_numbers<[1], [1], [0], [0], [0, 0, 1, 0], [], []>} : vector<16x32xf32>, vector<16x32xf32>, vector<16x16xf32> -> vector<16x16xf32>
    %cst_64 = arith.constant dense<0xFF800000> : vector<16xf32>
    %148 = vector.multi_reduction <maximumf>, %147, %cst_64 [1] : vector<16x16xf32> to vector<16xf32>
    %149 = vector.shape_cast %148 : vector<16xf32> to vector<16x1xf32>
    %150 = vector.broadcast %149 : vector<16x1xf32> to vector<16x16xf32>
    %151 = arith.subf %147, %150 : vector<16x16xf32>
    %152 = math.exp %151 : vector<16x16xf32>
    %cst_65 = arith.constant dense<0.000000e+00> : vector<16xf32>
    %153 = vector.multi_reduction <add>, %152, %cst_65 [1] : vector<16x16xf32> to vector<16xf32>
    %154 = vector.shape_cast %153 : vector<16xf32> to vector<16x1xf32>
    %155 = tpu.reciprocal %154 {approx = true} : vector<16x1xf32> -> vector<16x1xf32>
    %156 = vector.broadcast %155 : vector<16x1xf32> to vector<16x16xf32>
    %157 = arith.mulf %152, %156 : vector<16x16xf32>
    %c192 = arith.constant 192 : index
    %c0_66 = arith.constant 0 : index
    %158 = vector.load %arg5[%c192, %c0_66] : memref<504x64xf32, #tpu.memory_space<vmem>>, vector<32x32xf32>
    %cst_67 = arith.constant dense<0.000000e+00> : vector<16x32xf32>
    %159 = tpu.matmul %125, %158, %cst_67 {dimension_numbers = #tpu.dot_dimension_numbers<[1], [0], [0], [1], [0, 0, 1, 1], [], []>} : vector<16x32xf32>, vector<32x32xf32>, vector<16x32xf32> -> vector<16x32xf32>
    %cst_68 = arith.constant dense<0.000000e+00> : vector<16x32xf32>
    %160 = tpu.matmul %157, %159, %cst_68 {dimension_numbers = #tpu.dot_dimension_numbers<[1], [0], [0], [1], [0, 0, 1, 1], [], []>} : vector<16x16xf32>, vector<16x32xf32>, vector<16x32xf32> -> vector<16x32xf32>
    %161 = arith.addf %144, %160 : vector<16x32xf32>
    %c224 = arith.constant 224 : index
    %c0_69 = arith.constant 0 : index
    %162 = vector.load %arg5[%c224, %c0_69] : memref<504x64xf32, #tpu.memory_space<vmem>>, vector<32x32xf32>
    %cst_70 = arith.constant dense<0.000000e+00> : vector<16x32xf32>
    %163 = tpu.matmul %125, %162, %cst_70 {dimension_numbers = #tpu.dot_dimension_numbers<[1], [0], [0], [1], [0, 0, 1, 1], [], []>} : vector<16x32xf32>, vector<32x32xf32>, vector<16x32xf32> -> vector<16x32xf32>
    %cst_71 = arith.constant dense<0.000000e+00> : vector<16x16xf32>
    %164 = tpu.matmul %163, %125, %cst_71 {dimension_numbers = #tpu.dot_dimension_numbers<[1], [1], [0], [0], [0, 0, 1, 0], [], []>} : vector<16x32xf32>, vector<16x32xf32>, vector<16x16xf32> -> vector<16x16xf32>
    %cst_72 = arith.constant dense<0xFF800000> : vector<16xf32>
    %165 = vector.multi_reduction <maximumf>, %164, %cst_72 [1] : vector<16x16xf32> to vector<16xf32>
    %166 = vector.shape_cast %165 : vector<16xf32> to vector<16x1xf32>
    %167 = vector.broadcast %166 : vector<16x1xf32> to vector<16x16xf32>
    %168 = arith.subf %164, %167 : vector<16x16xf32>
    %169 = math.exp %168 : vector<16x16xf32>
    %cst_73 = arith.constant dense<0.000000e+00> : vector<16xf32>
    %170 = vector.multi_reduction <add>, %169, %cst_73 [1] : vector<16x16xf32> to vector<16xf32>
    %171 = vector.shape_cast %170 : vector<16xf32> to vector<16x1xf32>
    %172 = tpu.reciprocal %171 {approx = true} : vector<16x1xf32> -> vector<16x1xf32>
    %173 = vector.broadcast %172 : vector<16x1xf32> to vector<16x16xf32>
    %174 = arith.mulf %169, %173 : vector<16x16xf32>
    %c256 = arith.constant 256 : index
    %c0_74 = arith.constant 0 : index
    %175 = vector.load %arg5[%c256, %c0_74] : memref<504x64xf32, #tpu.memory_space<vmem>>, vector<32x32xf32>
    %cst_75 = arith.constant dense<0.000000e+00> : vector<16x32xf32>
    %176 = tpu.matmul %125, %175, %cst_75 {dimension_numbers = #tpu.dot_dimension_numbers<[1], [0], [0], [1], [0, 0, 1, 1], [], []>} : vector<16x32xf32>, vector<32x32xf32>, vector<16x32xf32> -> vector<16x32xf32>
    %cst_76 = arith.constant dense<0.000000e+00> : vector<16x32xf32>
    %177 = tpu.matmul %174, %176, %cst_76 {dimension_numbers = #tpu.dot_dimension_numbers<[1], [0], [0], [1], [0, 0, 1, 1], [], []>} : vector<16x16xf32>, vector<16x32xf32>, vector<16x32xf32> -> vector<16x32xf32>
    %178 = arith.addf %161, %177 : vector<16x32xf32>
    %c288 = arith.constant 288 : index
    %c0_77 = arith.constant 0 : index
    %179 = vector.load %arg5[%c288, %c0_77] : memref<504x64xf32, #tpu.memory_space<vmem>>, vector<32x32xf32>
    %cst_78 = arith.constant dense<0.000000e+00> : vector<16x32xf32>
    %180 = tpu.matmul %125, %179, %cst_78 {dimension_numbers = #tpu.dot_dimension_numbers<[1], [0], [0], [1], [0, 0, 1, 1], [], []>} : vector<16x32xf32>, vector<32x32xf32>, vector<16x32xf32> -> vector<16x32xf32>
    %cst_79 = arith.constant dense<0.000000e+00> : vector<16x16xf32>
    %181 = tpu.matmul %180, %125, %cst_79 {dimension_numbers = #tpu.dot_dimension_numbers<[1], [1], [0], [0], [0, 0, 1, 0], [], []>} : vector<16x32xf32>, vector<16x32xf32>, vector<16x16xf32> -> vector<16x16xf32>
    %cst_80 = arith.constant dense<0xFF800000> : vector<16xf32>
    %182 = vector.multi_reduction <maximumf>, %181, %cst_80 [1] : vector<16x16xf32> to vector<16xf32>
    %183 = vector.shape_cast %182 : vector<16xf32> to vector<16x1xf32>
    %184 = vector.broadcast %183 : vector<16x1xf32> to vector<16x16xf32>
    %185 = arith.subf %181, %184 : vector<16x16xf32>
    %186 = math.exp %185 : vector<16x16xf32>
    %cst_81 = arith.constant dense<0.000000e+00> : vector<16xf32>
    %187 = vector.multi_reduction <add>, %186, %cst_81 [1] : vector<16x16xf32> to vector<16xf32>
    %188 = vector.shape_cast %187 : vector<16xf32> to vector<16x1xf32>
    %189 = tpu.reciprocal %188 {approx = true} : vector<16x1xf32> -> vector<16x1xf32>
    %190 = vector.broadcast %189 : vector<16x1xf32> to vector<16x16xf32>
    %191 = arith.mulf %186, %190 : vector<16x16xf32>
    %c320 = arith.constant 320 : index
    %c0_82 = arith.constant 0 : index
    %192 = vector.load %arg5[%c320, %c0_82] : memref<504x64xf32, #tpu.memory_space<vmem>>, vector<32x32xf32>
    %cst_83 = arith.constant dense<0.000000e+00> : vector<16x32xf32>
    %193 = tpu.matmul %125, %192, %cst_83 {dimension_numbers = #tpu.dot_dimension_numbers<[1], [0], [0], [1], [0, 0, 1, 1], [], []>} : vector<16x32xf32>, vector<32x32xf32>, vector<16x32xf32> -> vector<16x32xf32>
    %cst_84 = arith.constant dense<0.000000e+00> : vector<16x32xf32>
    %194 = tpu.matmul %191, %193, %cst_84 {dimension_numbers = #tpu.dot_dimension_numbers<[1], [0], [0], [1], [0, 0, 1, 1], [], []>} : vector<16x16xf32>, vector<16x32xf32>, vector<16x32xf32> -> vector<16x32xf32>
    %195 = arith.addf %178, %194 : vector<16x32xf32>
    %196 = arith.addf %103, %195 : vector<16x32xf32>
    %c360 = arith.constant 360 : index
    %c0_85 = arith.constant 0 : index
    %197 = vector.load %arg5[%c360, %c0_85] : memref<504x64xf32, #tpu.memory_space<vmem>>, vector<1x32xf32>
    %c368 = arith.constant 368 : index
    %c0_86 = arith.constant 0 : index
    %198 = vector.load %arg5[%c368, %c0_86] : memref<504x64xf32, #tpu.memory_space<vmem>>, vector<1x32xf32>
    %cst_87 = arith.constant dense<0.000000e+00> : vector<16xf32>
    %199 = vector.multi_reduction <add>, %196, %cst_87 [1] : vector<16x32xf32> to vector<16xf32>
    %200 = vector.shape_cast %199 : vector<16xf32> to vector<16x1xf32>
    %cst_88 = arith.constant 3.200000e+01 : f32
    %201 = vector.broadcast %cst_88 : f32 to vector<16x1xf32>
    %202 = arith.divf %200, %201 : vector<16x1xf32>
    %203 = vector.broadcast %202 : vector<16x1xf32> to vector<16x32xf32>
    %204 = arith.subf %196, %203 : vector<16x32xf32>
    %205 = arith.mulf %204, %204 : vector<16x32xf32>
    %cst_89 = arith.constant dense<0.000000e+00> : vector<16xf32>
    %206 = vector.multi_reduction <add>, %205, %cst_89 [1] : vector<16x32xf32> to vector<16xf32>
    %207 = vector.shape_cast %206 : vector<16xf32> to vector<16x1xf32>
    %cst_90 = arith.constant 3.200000e+01 : f32
    %208 = vector.broadcast %cst_90 : f32 to vector<16x1xf32>
    %209 = arith.divf %207, %208 : vector<16x1xf32>
    %cst_91 = arith.constant 9.99999974E-6 : f32
    %210 = vector.broadcast %cst_91 : f32 to vector<16x1xf32>
    %211 = arith.addf %209, %210 : vector<16x1xf32>
    %212 = math.rsqrt %211 : vector<16x1xf32>
    %213 = vector.broadcast %212 : vector<16x1xf32> to vector<16x32xf32>
    %214 = arith.mulf %204, %213 : vector<16x32xf32>
    %215 = vector.broadcast %197 : vector<1x32xf32> to vector<16x32xf32>
    %216 = arith.mulf %214, %215 : vector<16x32xf32>
    %217 = vector.broadcast %198 : vector<1x32xf32> to vector<16x32xf32>
    %218 = arith.addf %216, %217 : vector<16x32xf32>
    %c376 = arith.constant 376 : index
    %c0_92 = arith.constant 0 : index
    %219 = vector.load %arg5[%c376, %c0_92] : memref<504x64xf32, #tpu.memory_space<vmem>>, vector<32x64xf32>
    %cst_93 = arith.constant dense<0.000000e+00> : vector<16x64xf32>
    %220 = tpu.matmul %218, %219, %cst_93 {dimension_numbers = #tpu.dot_dimension_numbers<[1], [0], [0], [1], [0, 0, 1, 1], [], []>} : vector<16x32xf32>, vector<32x64xf32>, vector<16x64xf32> -> vector<16x64xf32>
    %c408 = arith.constant 408 : index
    %c0_94 = arith.constant 0 : index
    %221 = vector.load %arg5[%c408, %c0_94] : memref<504x64xf32, #tpu.memory_space<vmem>>, vector<1x64xf32>
    %222 = vector.broadcast %221 : vector<1x64xf32> to vector<16x64xf32>
    %223 = arith.addf %220, %222 : vector<16x64xf32>
    %cst_95 = arith.constant 0.707106769 : f32
    %224 = vector.broadcast %cst_95 : f32 to vector<16x64xf32>
    %225 = arith.mulf %223, %224 : vector<16x64xf32>
    %226 = math.absf %225 : vector<16x64xf32>
    %cst_96 = arith.constant 0.327591091 : f32
    %227 = vector.broadcast %cst_96 : f32 to vector<16x64xf32>
    %228 = arith.mulf %227, %226 : vector<16x64xf32>
    %cst_97 = arith.constant 1.000000e+00 : f32
    %229 = vector.broadcast %cst_97 : f32 to vector<16x64xf32>
    %230 = arith.addf %229, %228 : vector<16x64xf32>
    %cst_98 = arith.constant 1.000000e+00 : f32
    %231 = vector.broadcast %cst_98 : f32 to vector<16x64xf32>
    %232 = arith.divf %231, %230 : vector<16x64xf32>
    %cst_99 = arith.constant 1.06140542 : f32
    %233 = vector.broadcast %cst_99 : f32 to vector<16x64xf32>
    %234 = arith.mulf %232, %233 : vector<16x64xf32>
    %cst_100 = arith.constant -1.45315206 : f32
    %235 = vector.broadcast %cst_100 : f32 to vector<16x64xf32>
    %236 = arith.addf %235, %234 : vector<16x64xf32>
    %237 = arith.mulf %232, %236 : vector<16x64xf32>
    %cst_101 = arith.constant 1.42141378 : f32
    %238 = vector.broadcast %cst_101 : f32 to vector<16x64xf32>
    %239 = arith.addf %238, %237 : vector<16x64xf32>
    %240 = arith.mulf %232, %239 : vector<16x64xf32>
    %cst_102 = arith.constant -0.284496725 : f32
    %241 = vector.broadcast %cst_102 : f32 to vector<16x64xf32>
    %242 = arith.addf %241, %240 : vector<16x64xf32>
    %243 = arith.mulf %232, %242 : vector<16x64xf32>
    %cst_103 = arith.constant 0.254829586 : f32
    %244 = vector.broadcast %cst_103 : f32 to vector<16x64xf32>
    %245 = arith.addf %244, %243 : vector<16x64xf32>
    %246 = arith.mulf %232, %245 : vector<16x64xf32>
    %cst_104 = arith.constant 0.000000e+00 : f32
    %247 = vector.broadcast %cst_104 : f32 to vector<16x64xf32>
    %248 = arith.subf %247, %226 : vector<16x64xf32>
    %249 = arith.mulf %248, %226 : vector<16x64xf32>
    %250 = math.exp %249 : vector<16x64xf32>
    %251 = arith.mulf %246, %250 : vector<16x64xf32>
    %cst_105 = arith.constant 1.000000e+00 : f32
    %252 = vector.broadcast %cst_105 : f32 to vector<16x64xf32>
    %253 = arith.subf %252, %251 : vector<16x64xf32>
    %cst_106 = arith.constant 0.000000e+00 : f32
    %254 = vector.broadcast %cst_106 : f32 to vector<16x64xf32>
    %255 = arith.cmpf oge, %225, %254 : vector<16x64xf32>
    %cst_107 = arith.constant 0.000000e+00 : f32
    %256 = vector.broadcast %cst_107 : f32 to vector<16x64xf32>
    %257 = arith.subf %256, %253 : vector<16x64xf32>
    %258 = arith.select %255, %253, %257 : vector<16x64xi1>, vector<16x64xf32>
    %cst_108 = arith.constant 5.000000e-01 : f32
    %259 = vector.broadcast %cst_108 : f32 to vector<16x64xf32>
    %260 = arith.mulf %223, %259 : vector<16x64xf32>
    %cst_109 = arith.constant 1.000000e+00 : f32
    %261 = vector.broadcast %cst_109 : f32 to vector<16x64xf32>
    %262 = arith.addf %261, %258 : vector<16x64xf32>
    %263 = arith.mulf %260, %262 : vector<16x64xf32>
    %c416 = arith.constant 416 : index
    %c0_110 = arith.constant 0 : index
    %264 = vector.load %arg5[%c416, %c0_110] : memref<504x64xf32, #tpu.memory_space<vmem>>, vector<64x32xf32>
    %cst_111 = arith.constant dense<0.000000e+00> : vector<16x32xf32>
    %265 = tpu.matmul %263, %264, %cst_111 {dimension_numbers = #tpu.dot_dimension_numbers<[1], [0], [0], [1], [0, 0, 1, 1], [], []>} : vector<16x64xf32>, vector<64x32xf32>, vector<16x32xf32> -> vector<16x32xf32>
    %c480 = arith.constant 480 : index
    %c0_112 = arith.constant 0 : index
    %266 = vector.load %arg5[%c480, %c0_112] : memref<504x64xf32, #tpu.memory_space<vmem>>, vector<1x32xf32>
    %267 = vector.broadcast %266 : vector<1x32xf32> to vector<16x32xf32>
    %268 = arith.addf %265, %267 : vector<16x32xf32>
    %269 = arith.addf %196, %268 : vector<16x32xf32>
    %c488 = arith.constant 488 : index
    %c0_113 = arith.constant 0 : index
    %270 = vector.load %arg5[%c488, %c0_113] : memref<504x64xf32, #tpu.memory_space<vmem>>, vector<1x32xf32>
    %c496 = arith.constant 496 : index
    %c0_114 = arith.constant 0 : index
    %271 = vector.load %arg5[%c496, %c0_114] : memref<504x64xf32, #tpu.memory_space<vmem>>, vector<1x32xf32>
    %cst_115 = arith.constant dense<0.000000e+00> : vector<16xf32>
    %272 = vector.multi_reduction <add>, %269, %cst_115 [1] : vector<16x32xf32> to vector<16xf32>
    %273 = vector.shape_cast %272 : vector<16xf32> to vector<16x1xf32>
    %cst_116 = arith.constant 3.200000e+01 : f32
    %274 = vector.broadcast %cst_116 : f32 to vector<16x1xf32>
    %275 = arith.divf %273, %274 : vector<16x1xf32>
    %276 = vector.broadcast %275 : vector<16x1xf32> to vector<16x32xf32>
    %277 = arith.subf %269, %276 : vector<16x32xf32>
    %278 = arith.mulf %277, %277 : vector<16x32xf32>
    %cst_117 = arith.constant dense<0.000000e+00> : vector<16xf32>
    %279 = vector.multi_reduction <add>, %278, %cst_117 [1] : vector<16x32xf32> to vector<16xf32>
    %280 = vector.shape_cast %279 : vector<16xf32> to vector<16x1xf32>
    %cst_118 = arith.constant 3.200000e+01 : f32
    %281 = vector.broadcast %cst_118 : f32 to vector<16x1xf32>
    %282 = arith.divf %280, %281 : vector<16x1xf32>
    %cst_119 = arith.constant 9.99999974E-6 : f32
    %283 = vector.broadcast %cst_119 : f32 to vector<16x1xf32>
    %284 = arith.addf %282, %283 : vector<16x1xf32>
    %285 = math.rsqrt %284 : vector<16x1xf32>
    %286 = vector.broadcast %285 : vector<16x1xf32> to vector<16x32xf32>
    %287 = arith.mulf %277, %286 : vector<16x32xf32>
    %288 = vector.broadcast %270 : vector<1x32xf32> to vector<16x32xf32>
    %289 = arith.mulf %287, %288 : vector<16x32xf32>
    %290 = vector.broadcast %271 : vector<1x32xf32> to vector<16x32xf32>
    %291 = arith.addf %289, %290 : vector<16x32xf32>
    %cst_120 = arith.constant dense<0xFF800000> : vector<32xf32>
    %292 = vector.multi_reduction <maximumf>, %291, %cst_120 [0] : vector<16x32xf32> to vector<32xf32>
    %293 = vector.shape_cast %292 : vector<32xf32> to vector<1x32xf32>
    %c0_121 = arith.constant 0 : index
    %c0_122 = arith.constant 0 : index
    %c0_123 = arith.constant 0 : index
    %294 = vector.load %arg6[%c0_121, %c0_122, %c0_123] : memref<1x1x32xf32, #tpu.memory_space<vmem>>, vector<1x1x32xf32>
    %295 = vector.shape_cast %294 : vector<1x1x32xf32> to vector<1x32xf32>
    %296 = vector.shape_cast %293 : vector<1x32xf32> to vector<1x1x32xf32>
    tpu.vector_store %arg6[%c0_121, %c0_122, %c0_123], %296 {strides = array<i32>} : memref<1x1x32xf32, #tpu.memory_space<vmem>>, vector<1x1x32xf32>,
    return
  }
  func.func @transform_0(%arg0: i32) -> (i32, i32, i32) {
    %c0_i32 = arith.constant 0 : i32
    %c0_i32_0 = arith.constant 0 : i32
    %c0_i32_1 = arith.constant 0 : i32
    return %arg0, %c0_i32, %c0_i32_0 : i32, i32, i32
  }
  func.func @transform_1(%arg0: i32) -> (i32, i32, i32) {
    %c0_i32 = arith.constant 0 : i32
    %c0_i32_0 = arith.constant 0 : i32
    %c0_i32_1 = arith.constant 0 : i32
    return %arg0, %c0_i32, %c0_i32_0 : i32, i32, i32
  }
  func.func @transform_2(%arg0: i32) -> (i32, i32) {
    %c0_i32 = arith.constant 0 : i32
    %c0_i32_0 = arith.constant 0 : i32
    %c0_i32_1 = arith.constant 0 : i32
    return %c0_i32, %c0_i32_0 : i32, i32
  }
  func.func @transform_3(%arg0: i32) -> (i32, i32) {
    %c0_i32 = arith.constant 0 : i32
    %c0_i32_0 = arith.constant 0 : i32
    %c0_i32_1 = arith.constant 0 : i32
    return %c0_i32, %c0_i32_0 : i32, i32
  }
  func.func @transform_4(%arg0: i32) -> (i32, i32) {
    %c0_i32 = arith.constant 0 : i32
    %c0_i32_0 = arith.constant 0 : i32
    %c0_i32_1 = arith.constant 0 : i32
    return %c0_i32, %c0_i32_0 : i32, i32
  }
  func.func @transform_5(%arg0: i32) -> (i32, i32, i32) {
    %c0_i32 = arith.constant 0 : i32
    %c0_i32_0 = arith.constant 0 : i32
    %c0_i32_1 = arith.constant 0 : i32
    return %arg0, %c0_i32, %c0_i32_0 : i32, i32, i32
  }
}

module attributes {stable_mosaic.version = 11 : i64} {
  func.func @_stage2_kernel(%arg0: i32, %arg1: memref<4x1x32xf32, #tpu.memory_space<vmem>>, %arg2: memref<4x3xf32, #tpu.memory_space<vmem>>, %arg3: memref<4x1280xf32, #tpu.memory_space<vmem>>, %arg4: memref<1280x32xf32, #tpu.memory_space<vmem>>, %arg5: memref<1072x64xf32, #tpu.memory_space<vmem>>, %arg6: memref<1x4x2xf32, #tpu.memory_space<vmem>>) attributes {dimension_semantics = [#tpu.dimension_semantics<arbitrary>], iteration_bounds = array<i64: 1>, scalar_prefetch = 0 : i64, scratch_operands = 0 : i64, tpu.core_type = #tpu.core_type<tc>, window_params = [{pipeline_mode = #tpu.pipeline_mode<synchronous>, transform_indices = @transform_0, window_bounds = array<i64: 4, 1, 32>}, {pipeline_mode = #tpu.pipeline_mode<synchronous>, transform_indices = @transform_1, window_bounds = array<i64: 4, 3>}, {pipeline_mode = #tpu.pipeline_mode<synchronous>, transform_indices = @transform_2, window_bounds = array<i64: 4, 1280>}, {pipeline_mode = #tpu.pipeline_mode<synchronous>, transform_indices = @transform_3, window_bounds = array<i64: 1280, 32>}, {pipeline_mode = #tpu.pipeline_mode<synchronous>, transform_indices = @transform_4, window_bounds = array<i64: 1072, 64>}, {pipeline_mode = #tpu.pipeline_mode<synchronous>, transform_indices = @transform_5, window_bounds = array<i64: 1, 4, 2>}]} {
    %c0 = arith.constant 0 : index
    %c0_0 = arith.constant 0 : index
    %c0_1 = arith.constant 0 : index
    %0 = vector.load %arg1[%c0, %c0_0, %c0_1] : memref<4x1x32xf32, #tpu.memory_space<vmem>>, vector<4x1x32xf32>
    %1 = vector.shape_cast %0 : vector<4x1x32xf32> to vector<4x32xf32>
    %c0_2 = arith.constant 0 : index
    %c0_3 = arith.constant 0 : index
    %2 = vector.load %arg2[%c0_2, %c0_3] : memref<4x3xf32, #tpu.memory_space<vmem>>, vector<4x3xf32>
    %cst = arith.constant dense<0.000000e+00> : vector<3xf32>
    %3 = vector.multi_reduction <add>, %2, %cst [0] : vector<4x3xf32> to vector<3xf32>
    %4 = vector.shape_cast %3 : vector<3xf32> to vector<1x3xf32>
    %cst_4 = arith.constant 4.000000e+00 : f32
    %5 = vector.broadcast %cst_4 : f32 to vector<1x3xf32>
    %6 = arith.divf %4, %5 : vector<1x3xf32>
    %7 = vector.broadcast %6 : vector<1x3xf32> to vector<4x3xf32>
    %8 = arith.subf %2, %7 : vector<4x3xf32>
    %c0_5 = arith.constant 0 : index
    %c0_6 = arith.constant 0 : index
    %9 = vector.load %arg5[%c0_5, %c0_6] : memref<1072x64xf32, #tpu.memory_space<vmem>>, vector<3x32xf32>
    %c8 = arith.constant 8 : index
    %c0_7 = arith.constant 0 : index
    %10 = vector.load %arg5[%c8, %c0_7] : memref<1072x64xf32, #tpu.memory_space<vmem>>, vector<1x32xf32>
    %c16 = arith.constant 16 : index
    %c0_8 = arith.constant 0 : index
    %11 = vector.load %arg5[%c16, %c0_8] : memref<1072x64xf32, #tpu.memory_space<vmem>>, vector<32x32xf32>
    %c48 = arith.constant 48 : index
    %c0_9 = arith.constant 0 : index
    %12 = vector.load %arg5[%c48, %c0_9] : memref<1072x64xf32, #tpu.memory_space<vmem>>, vector<1x32xf32>
    %cst_10 = arith.constant dense<0.000000e+00> : vector<4x32xf32>
    %13 = tpu.matmul %8, %9, %cst_10 {dimension_numbers = #tpu.dot_dimension_numbers<[1], [0], [0], [1], [0, 0, 1, 1], [], []>} : vector<4x3xf32>, vector<3x32xf32>, vector<4x32xf32> -> vector<4x32xf32>
    %14 = vector.broadcast %10 : vector<1x32xf32> to vector<4x32xf32>
    %15 = arith.addf %13, %14 : vector<4x32xf32>
    %cst_11 = arith.constant 0.707106769 : f32
    %16 = vector.broadcast %cst_11 : f32 to vector<4x32xf32>
    %17 = arith.mulf %15, %16 : vector<4x32xf32>
    %18 = math.absf %17 : vector<4x32xf32>
    %cst_12 = arith.constant 0.327591091 : f32
    %19 = vector.broadcast %cst_12 : f32 to vector<4x32xf32>
    %20 = arith.mulf %19, %18 : vector<4x32xf32>
    %cst_13 = arith.constant 1.000000e+00 : f32
    %21 = vector.broadcast %cst_13 : f32 to vector<4x32xf32>
    %22 = arith.addf %21, %20 : vector<4x32xf32>
    %cst_14 = arith.constant 1.000000e+00 : f32
    %23 = vector.broadcast %cst_14 : f32 to vector<4x32xf32>
    %24 = arith.divf %23, %22 : vector<4x32xf32>
    %cst_15 = arith.constant 1.06140542 : f32
    %25 = vector.broadcast %cst_15 : f32 to vector<4x32xf32>
    %26 = arith.mulf %24, %25 : vector<4x32xf32>
    %cst_16 = arith.constant -1.45315206 : f32
    %27 = vector.broadcast %cst_16 : f32 to vector<4x32xf32>
    %28 = arith.addf %27, %26 : vector<4x32xf32>
    %29 = arith.mulf %24, %28 : vector<4x32xf32>
    %cst_17 = arith.constant 1.42141378 : f32
    %30 = vector.broadcast %cst_17 : f32 to vector<4x32xf32>
    %31 = arith.addf %30, %29 : vector<4x32xf32>
    %32 = arith.mulf %24, %31 : vector<4x32xf32>
    %cst_18 = arith.constant -0.284496725 : f32
    %33 = vector.broadcast %cst_18 : f32 to vector<4x32xf32>
    %34 = arith.addf %33, %32 : vector<4x32xf32>
    %35 = arith.mulf %24, %34 : vector<4x32xf32>
    %cst_19 = arith.constant 0.254829586 : f32
    %36 = vector.broadcast %cst_19 : f32 to vector<4x32xf32>
    %37 = arith.addf %36, %35 : vector<4x32xf32>
    %38 = arith.mulf %24, %37 : vector<4x32xf32>
    %cst_20 = arith.constant 0.000000e+00 : f32
    %39 = vector.broadcast %cst_20 : f32 to vector<4x32xf32>
    %40 = arith.subf %39, %18 : vector<4x32xf32>
    %41 = arith.mulf %40, %18 : vector<4x32xf32>
    %42 = math.exp %41 : vector<4x32xf32>
    %43 = arith.mulf %38, %42 : vector<4x32xf32>
    %cst_21 = arith.constant 1.000000e+00 : f32
    %44 = vector.broadcast %cst_21 : f32 to vector<4x32xf32>
    %45 = arith.subf %44, %43 : vector<4x32xf32>
    %cst_22 = arith.constant 0.000000e+00 : f32
    %46 = vector.broadcast %cst_22 : f32 to vector<4x32xf32>
    %47 = arith.cmpf oge, %17, %46 : vector<4x32xf32>
    %cst_23 = arith.constant 0.000000e+00 : f32
    %48 = vector.broadcast %cst_23 : f32 to vector<4x32xf32>
    %49 = arith.subf %48, %45 : vector<4x32xf32>
    %50 = arith.select %47, %45, %49 : vector<4x32xi1>, vector<4x32xf32>
    %cst_24 = arith.constant 5.000000e-01 : f32
    %51 = vector.broadcast %cst_24 : f32 to vector<4x32xf32>
    %52 = arith.mulf %15, %51 : vector<4x32xf32>
    %cst_25 = arith.constant 1.000000e+00 : f32
    %53 = vector.broadcast %cst_25 : f32 to vector<4x32xf32>
    %54 = arith.addf %53, %50 : vector<4x32xf32>
    %55 = arith.mulf %52, %54 : vector<4x32xf32>
    %cst_26 = arith.constant dense<0.000000e+00> : vector<4x32xf32>
    %56 = tpu.matmul %55, %11, %cst_26 {dimension_numbers = #tpu.dot_dimension_numbers<[1], [0], [0], [1], [0, 0, 1, 1], [], []>} : vector<4x32xf32>, vector<32x32xf32>, vector<4x32xf32> -> vector<4x32xf32>
    %57 = vector.broadcast %12 : vector<1x32xf32> to vector<4x32xf32>
    %58 = arith.addf %56, %57 : vector<4x32xf32>
    %59 = arith.addf %1, %58 : vector<4x32xf32>
    %c0_27 = arith.constant 0 : index
    %c0_28 = arith.constant 0 : index
    %60 = vector.load %arg3[%c0_27, %c0_28] : memref<4x1280xf32, #tpu.memory_space<vmem>>, vector<4x1280xf32>
    %c0_29 = arith.constant 0 : index
    %c0_30 = arith.constant 0 : index
    %61 = vector.load %arg4[%c0_29, %c0_30] : memref<1280x32xf32, #tpu.memory_space<vmem>>, vector<1280x32xf32>
    %cst_31 = arith.constant dense<0.000000e+00> : vector<4x32xf32>
    %62 = tpu.matmul %60, %61, %cst_31 {dimension_numbers = #tpu.dot_dimension_numbers<[1], [0], [0], [1], [0, 0, 1, 1], [], []>} : vector<4x1280xf32>, vector<1280x32xf32>, vector<4x32xf32> -> vector<4x32xf32>
    %c56 = arith.constant 56 : index
    %c0_32 = arith.constant 0 : index
    %63 = vector.load %arg5[%c56, %c0_32] : memref<1072x64xf32, #tpu.memory_space<vmem>>, vector<1x32xf32>
    %64 = vector.broadcast %63 : vector<1x32xf32> to vector<4x32xf32>
    %65 = arith.addf %62, %64 : vector<4x32xf32>
    %c880 = arith.constant 880 : index
    %c0_33 = arith.constant 0 : index
    %66 = vector.load %arg5[%c880, %c0_33] : memref<1072x64xf32, #tpu.memory_space<vmem>>, vector<32x64xf32>
    %cst_34 = arith.constant dense<0.000000e+00> : vector<4x64xf32>
    %67 = tpu.matmul %59, %66, %cst_34 {dimension_numbers = #tpu.dot_dimension_numbers<[1], [0], [0], [1], [0, 0, 1, 1], [], []>} : vector<4x32xf32>, vector<32x64xf32>, vector<4x64xf32> -> vector<4x64xf32>
    %c912 = arith.constant 912 : index
    %c0_35 = arith.constant 0 : index
    %68 = vector.load %arg5[%c912, %c0_35] : memref<1072x64xf32, #tpu.memory_space<vmem>>, vector<32x64xf32>
    %cst_36 = arith.constant dense<0.000000e+00> : vector<4x64xf32>
    %69 = tpu.matmul %65, %68, %cst_36 {dimension_numbers = #tpu.dot_dimension_numbers<[1], [0], [0], [1], [0, 0, 1, 1], [], []>} : vector<4x32xf32>, vector<32x64xf32>, vector<4x64xf32> -> vector<4x64xf32>
    %70 = arith.addf %67, %69 : vector<4x64xf32>
    %c64 = arith.constant 64 : index
    %c0_37 = arith.constant 0 : index
    %71 = vector.load %arg5[%c64, %c0_37] : memref<1072x64xf32, #tpu.memory_space<vmem>>, vector<1x64xf32>
    %c72 = arith.constant 72 : index
    %c0_38 = arith.constant 0 : index
    %72 = vector.load %arg5[%c72, %c0_38] : memref<1072x64xf32, #tpu.memory_space<vmem>>, vector<1x64xf32>
    %cst_39 = arith.constant dense<0.000000e+00> : vector<4xf32>
    %73 = vector.multi_reduction <add>, %70, %cst_39 [1] : vector<4x64xf32> to vector<4xf32>
    %74 = vector.shape_cast %73 : vector<4xf32> to vector<4x1xf32>
    %cst_40 = arith.constant 6.400000e+01 : f32
    %75 = vector.broadcast %cst_40 : f32 to vector<4x1xf32>
    %76 = arith.divf %74, %75 : vector<4x1xf32>
    %77 = vector.broadcast %76 : vector<4x1xf32> to vector<4x64xf32>
    %78 = arith.subf %70, %77 : vector<4x64xf32>
    %79 = arith.mulf %78, %78 : vector<4x64xf32>
    %cst_41 = arith.constant dense<0.000000e+00> : vector<4xf32>
    %80 = vector.multi_reduction <add>, %79, %cst_41 [1] : vector<4x64xf32> to vector<4xf32>
    %81 = vector.shape_cast %80 : vector<4xf32> to vector<4x1xf32>
    %cst_42 = arith.constant 6.400000e+01 : f32
    %82 = vector.broadcast %cst_42 : f32 to vector<4x1xf32>
    %83 = arith.divf %81, %82 : vector<4x1xf32>
    %cst_43 = arith.constant 9.99999974E-6 : f32
    %84 = vector.broadcast %cst_43 : f32 to vector<4x1xf32>
    %85 = arith.addf %83, %84 : vector<4x1xf32>
    %86 = math.rsqrt %85 : vector<4x1xf32>
    %87 = vector.broadcast %86 : vector<4x1xf32> to vector<4x64xf32>
    %88 = arith.mulf %78, %87 : vector<4x64xf32>
    %89 = vector.broadcast %71 : vector<1x64xf32> to vector<4x64xf32>
    %90 = arith.mulf %88, %89 : vector<4x64xf32>
    %91 = vector.broadcast %72 : vector<1x64xf32> to vector<4x64xf32>
    %92 = arith.addf %90, %91 : vector<4x64xf32>
    %c80 = arith.constant 80 : index
    %c0_44 = arith.constant 0 : index
    %93 = vector.load %arg5[%c80, %c0_44] : memref<1072x64xf32, #tpu.memory_space<vmem>>, vector<1x64xf32>
    %c88 = arith.constant 88 : index
    %c0_45 = arith.constant 0 : index
    %94 = vector.load %arg5[%c88, %c0_45] : memref<1072x64xf32, #tpu.memory_space<vmem>>, vector<1x64xf32>
    %cst_46 = arith.constant dense<0.000000e+00> : vector<4xf32>
    %95 = vector.multi_reduction <add>, %92, %cst_46 [1] : vector<4x64xf32> to vector<4xf32>
    %96 = vector.shape_cast %95 : vector<4xf32> to vector<4x1xf32>
    %cst_47 = arith.constant 6.400000e+01 : f32
    %97 = vector.broadcast %cst_47 : f32 to vector<4x1xf32>
    %98 = arith.divf %96, %97 : vector<4x1xf32>
    %99 = vector.broadcast %98 : vector<4x1xf32> to vector<4x64xf32>
    %100 = arith.subf %92, %99 : vector<4x64xf32>
    %101 = arith.mulf %100, %100 : vector<4x64xf32>
    %cst_48 = arith.constant dense<0.000000e+00> : vector<4xf32>
    %102 = vector.multi_reduction <add>, %101, %cst_48 [1] : vector<4x64xf32> to vector<4xf32>
    %103 = vector.shape_cast %102 : vector<4xf32> to vector<4x1xf32>
    %cst_49 = arith.constant 6.400000e+01 : f32
    %104 = vector.broadcast %cst_49 : f32 to vector<4x1xf32>
    %105 = arith.divf %103, %104 : vector<4x1xf32>
    %cst_50 = arith.constant 9.99999974E-6 : f32
    %106 = vector.broadcast %cst_50 : f32 to vector<4x1xf32>
    %107 = arith.addf %105, %106 : vector<4x1xf32>
    %108 = math.rsqrt %107 : vector<4x1xf32>
    %109 = vector.broadcast %108 : vector<4x1xf32> to vector<4x64xf32>
    %110 = arith.mulf %100, %109 : vector<4x64xf32>
    %111 = vector.broadcast %93 : vector<1x64xf32> to vector<4x64xf32>
    %112 = arith.mulf %110, %111 : vector<4x64xf32>
    %113 = vector.broadcast %94 : vector<1x64xf32> to vector<4x64xf32>
    %114 = arith.addf %112, %113 : vector<4x64xf32>
    %c608 = arith.constant 608 : index
    %c0_51 = arith.constant 0 : index
    %115 = vector.load %arg5[%c608, %c0_51] : memref<1072x64xf32, #tpu.memory_space<vmem>>, vector<1x64xf32>
    %c96 = arith.constant 96 : index
    %c0_52 = arith.constant 0 : index
    %116 = vector.load %arg5[%c96, %c0_52] : memref<1072x64xf32, #tpu.memory_space<vmem>>, vector<64x64xf32>
    %cst_53 = arith.constant dense<0.000000e+00> : vector<4x64xf32>
    %117 = tpu.matmul %114, %116, %cst_53 {dimension_numbers = #tpu.dot_dimension_numbers<[1], [0], [0], [1], [0, 0, 1, 1], [], []>} : vector<4x64xf32>, vector<64x64xf32>, vector<4x64xf32> -> vector<4x64xf32>
    %cst_54 = arith.constant dense<0.000000e+00> : vector<4x4xf32>
    %118 = tpu.matmul %117, %114, %cst_54 {dimension_numbers = #tpu.dot_dimension_numbers<[1], [1], [0], [0], [0, 0, 1, 0], [], []>} : vector<4x64xf32>, vector<4x64xf32>, vector<4x4xf32> -> vector<4x4xf32>
    %cst_55 = arith.constant dense<0xFF800000> : vector<4xf32>
    %119 = vector.multi_reduction <maximumf>, %118, %cst_55 [1] : vector<4x4xf32> to vector<4xf32>
    %120 = vector.shape_cast %119 : vector<4xf32> to vector<4x1xf32>
    %121 = vector.broadcast %120 : vector<4x1xf32> to vector<4x4xf32>
    %122 = arith.subf %118, %121 : vector<4x4xf32>
    %123 = math.exp %122 : vector<4x4xf32>
    %cst_56 = arith.constant dense<0.000000e+00> : vector<4xf32>
    %124 = vector.multi_reduction <add>, %123, %cst_56 [1] : vector<4x4xf32> to vector<4xf32>
    %125 = vector.shape_cast %124 : vector<4xf32> to vector<4x1xf32>
    %126 = tpu.reciprocal %125 {approx = true} : vector<4x1xf32> -> vector<4x1xf32>
    %127 = vector.broadcast %126 : vector<4x1xf32> to vector<4x4xf32>
    %128 = arith.mulf %123, %127 : vector<4x4xf32>
    %c160 = arith.constant 160 : index
    %c0_57 = arith.constant 0 : index
    %129 = vector.load %arg5[%c160, %c0_57] : memref<1072x64xf32, #tpu.memory_space<vmem>>, vector<64x64xf32>
    %cst_58 = arith.constant dense<0.000000e+00> : vector<4x64xf32>
    %130 = tpu.matmul %114, %129, %cst_58 {dimension_numbers = #tpu.dot_dimension_numbers<[1], [0], [0], [1], [0, 0, 1, 1], [], []>} : vector<4x64xf32>, vector<64x64xf32>, vector<4x64xf32> -> vector<4x64xf32>
    %cst_59 = arith.constant dense<0.000000e+00> : vector<4x64xf32>
    %131 = tpu.matmul %128, %130, %cst_59 {dimension_numbers = #tpu.dot_dimension_numbers<[1], [0], [0], [1], [0, 0, 1, 1], [], []>} : vector<4x4xf32>, vector<4x64xf32>, vector<4x64xf32> -> vector<4x64xf32>
    %132 = vector.broadcast %115 : vector<1x64xf32> to vector<4x64xf32>
    %133 = arith.addf %132, %131 : vector<4x64xf32>
    %c224 = arith.constant 224 : index
    %c0_60 = arith.constant 0 : index
    %134 = vector.load %arg5[%c224, %c0_60] : memref<1072x64xf32, #tpu.memory_space<vmem>>, vector<64x64xf32>
    %cst_61 = arith.constant dense<0.000000e+00> : vector<4x64xf32>
    %135 = tpu.matmul %114, %134, %cst_61 {dimension_numbers = #tpu.dot_dimension_numbers<[1], [0], [0], [1], [0, 0, 1, 1], [], []>} : vector<4x64xf32>, vector<64x64xf32>, vector<4x64xf32> -> vector<4x64xf32>
    %cst_62 = arith.constant dense<0.000000e+00> : vector<4x4xf32>
    %136 = tpu.matmul %135, %114, %cst_62 {dimension_numbers = #tpu.dot_dimension_numbers<[1], [1], [0], [0], [0, 0, 1, 0], [], []>} : vector<4x64xf32>, vector<4x64xf32>, vector<4x4xf32> -> vector<4x4xf32>
    %cst_63 = arith.constant dense<0xFF800000> : vector<4xf32>
    %137 = vector.multi_reduction <maximumf>, %136, %cst_63 [1] : vector<4x4xf32> to vector<4xf32>
    %138 = vector.shape_cast %137 : vector<4xf32> to vector<4x1xf32>
    %139 = vector.broadcast %138 : vector<4x1xf32> to vector<4x4xf32>
    %140 = arith.subf %136, %139 : vector<4x4xf32>
    %141 = math.exp %140 : vector<4x4xf32>
    %cst_64 = arith.constant dense<0.000000e+00> : vector<4xf32>
    %142 = vector.multi_reduction <add>, %141, %cst_64 [1] : vector<4x4xf32> to vector<4xf32>
    %143 = vector.shape_cast %142 : vector<4xf32> to vector<4x1xf32>
    %144 = tpu.reciprocal %143 {approx = true} : vector<4x1xf32> -> vector<4x1xf32>
    %145 = vector.broadcast %144 : vector<4x1xf32> to vector<4x4xf32>
    %146 = arith.mulf %141, %145 : vector<4x4xf32>
    %c288 = arith.constant 288 : index
    %c0_65 = arith.constant 0 : index
    %147 = vector.load %arg5[%c288, %c0_65] : memref<1072x64xf32, #tpu.memory_space<vmem>>, vector<64x64xf32>
    %cst_66 = arith.constant dense<0.000000e+00> : vector<4x64xf32>
    %148 = tpu.matmul %114, %147, %cst_66 {dimension_numbers = #tpu.dot_dimension_numbers<[1], [0], [0], [1], [0, 0, 1, 1], [], []>} : vector<4x64xf32>, vector<64x64xf32>, vector<4x64xf32> -> vector<4x64xf32>
    %cst_67 = arith.constant dense<0.000000e+00> : vector<4x64xf32>
    %149 = tpu.matmul %146, %148, %cst_67 {dimension_numbers = #tpu.dot_dimension_numbers<[1], [0], [0], [1], [0, 0, 1, 1], [], []>} : vector<4x4xf32>, vector<4x64xf32>, vector<4x64xf32> -> vector<4x64xf32>
    %150 = arith.addf %133, %149 : vector<4x64xf32>
    %c352 = arith.constant 352 : index
    %c0_68 = arith.constant 0 : index
    %151 = vector.load %arg5[%c352, %c0_68] : memref<1072x64xf32, #tpu.memory_space<vmem>>, vector<64x64xf32>
    %cst_69 = arith.constant dense<0.000000e+00> : vector<4x64xf32>
    %152 = tpu.matmul %114, %151, %cst_69 {dimension_numbers = #tpu.dot_dimension_numbers<[1], [0], [0], [1], [0, 0, 1, 1], [], []>} : vector<4x64xf32>, vector<64x64xf32>, vector<4x64xf32> -> vector<4x64xf32>
    %cst_70 = arith.constant dense<0.000000e+00> : vector<4x4xf32>
    %153 = tpu.matmul %152, %114, %cst_70 {dimension_numbers = #tpu.dot_dimension_numbers<[1], [1], [0], [0], [0, 0, 1, 0], [], []>} : vector<4x64xf32>, vector<4x64xf32>, vector<4x4xf32> -> vector<4x4xf32>
    %cst_71 = arith.constant dense<0xFF800000> : vector<4xf32>
    %154 = vector.multi_reduction <maximumf>, %153, %cst_71 [1] : vector<4x4xf32> to vector<4xf32>
    %155 = vector.shape_cast %154 : vector<4xf32> to vector<4x1xf32>
    %156 = vector.broadcast %155 : vector<4x1xf32> to vector<4x4xf32>
    %157 = arith.subf %153, %156 : vector<4x4xf32>
    %158 = math.exp %157 : vector<4x4xf32>
    %cst_72 = arith.constant dense<0.000000e+00> : vector<4xf32>
    %159 = vector.multi_reduction <add>, %158, %cst_72 [1] : vector<4x4xf32> to vector<4xf32>
    %160 = vector.shape_cast %159 : vector<4xf32> to vector<4x1xf32>
    %161 = tpu.reciprocal %160 {approx = true} : vector<4x1xf32> -> vector<4x1xf32>
    %162 = vector.broadcast %161 : vector<4x1xf32> to vector<4x4xf32>
    %163 = arith.mulf %158, %162 : vector<4x4xf32>
    %c416 = arith.constant 416 : index
    %c0_73 = arith.constant 0 : index
    %164 = vector.load %arg5[%c416, %c0_73] : memref<1072x64xf32, #tpu.memory_space<vmem>>, vector<64x64xf32>
    %cst_74 = arith.constant dense<0.000000e+00> : vector<4x64xf32>
    %165 = tpu.matmul %114, %164, %cst_74 {dimension_numbers = #tpu.dot_dimension_numbers<[1], [0], [0], [1], [0, 0, 1, 1], [], []>} : vector<4x64xf32>, vector<64x64xf32>, vector<4x64xf32> -> vector<4x64xf32>
    %cst_75 = arith.constant dense<0.000000e+00> : vector<4x64xf32>
    %166 = tpu.matmul %163, %165, %cst_75 {dimension_numbers = #tpu.dot_dimension_numbers<[1], [0], [0], [1], [0, 0, 1, 1], [], []>} : vector<4x4xf32>, vector<4x64xf32>, vector<4x64xf32> -> vector<4x64xf32>
    %167 = arith.addf %150, %166 : vector<4x64xf32>
    %c480 = arith.constant 480 : index
    %c0_76 = arith.constant 0 : index
    %168 = vector.load %arg5[%c480, %c0_76] : memref<1072x64xf32, #tpu.memory_space<vmem>>, vector<64x64xf32>
    %cst_77 = arith.constant dense<0.000000e+00> : vector<4x64xf32>
    %169 = tpu.matmul %114, %168, %cst_77 {dimension_numbers = #tpu.dot_dimension_numbers<[1], [0], [0], [1], [0, 0, 1, 1], [], []>} : vector<4x64xf32>, vector<64x64xf32>, vector<4x64xf32> -> vector<4x64xf32>
    %cst_78 = arith.constant dense<0.000000e+00> : vector<4x4xf32>
    %170 = tpu.matmul %169, %114, %cst_78 {dimension_numbers = #tpu.dot_dimension_numbers<[1], [1], [0], [0], [0, 0, 1, 0], [], []>} : vector<4x64xf32>, vector<4x64xf32>, vector<4x4xf32> -> vector<4x4xf32>
    %cst_79 = arith.constant dense<0xFF800000> : vector<4xf32>
    %171 = vector.multi_reduction <maximumf>, %170, %cst_79 [1] : vector<4x4xf32> to vector<4xf32>
    %172 = vector.shape_cast %171 : vector<4xf32> to vector<4x1xf32>
    %173 = vector.broadcast %172 : vector<4x1xf32> to vector<4x4xf32>
    %174 = arith.subf %170, %173 : vector<4x4xf32>
    %175 = math.exp %174 : vector<4x4xf32>
    %cst_80 = arith.constant dense<0.000000e+00> : vector<4xf32>
    %176 = vector.multi_reduction <add>, %175, %cst_80 [1] : vector<4x4xf32> to vector<4xf32>
    %177 = vector.shape_cast %176 : vector<4xf32> to vector<4x1xf32>
    %178 = tpu.reciprocal %177 {approx = true} : vector<4x1xf32> -> vector<4x1xf32>
    %179 = vector.broadcast %178 : vector<4x1xf32> to vector<4x4xf32>
    %180 = arith.mulf %175, %179 : vector<4x4xf32>
    %c544 = arith.constant 544 : index
    %c0_81 = arith.constant 0 : index
    %181 = vector.load %arg5[%c544, %c0_81] : memref<1072x64xf32, #tpu.memory_space<vmem>>, vector<64x64xf32>
    %cst_82 = arith.constant dense<0.000000e+00> : vector<4x64xf32>
    %182 = tpu.matmul %114, %181, %cst_82 {dimension_numbers = #tpu.dot_dimension_numbers<[1], [0], [0], [1], [0, 0, 1, 1], [], []>} : vector<4x64xf32>, vector<64x64xf32>, vector<4x64xf32> -> vector<4x64xf32>
    %cst_83 = arith.constant dense<0.000000e+00> : vector<4x64xf32>
    %183 = tpu.matmul %180, %182, %cst_83 {dimension_numbers = #tpu.dot_dimension_numbers<[1], [0], [0], [1], [0, 0, 1, 1], [], []>} : vector<4x4xf32>, vector<4x64xf32>, vector<4x64xf32> -> vector<4x64xf32>
    %184 = arith.addf %167, %183 : vector<4x64xf32>
    %185 = arith.addf %92, %184 : vector<4x64xf32>
    %c616 = arith.constant 616 : index
    %c0_84 = arith.constant 0 : index
    %186 = vector.load %arg5[%c616, %c0_84] : memref<1072x64xf32, #tpu.memory_space<vmem>>, vector<1x64xf32>
    %c624 = arith.constant 624 : index
    %c0_85 = arith.constant 0 : index
    %187 = vector.load %arg5[%c624, %c0_85] : memref<1072x64xf32, #tpu.memory_space<vmem>>, vector<1x64xf32>
    %cst_86 = arith.constant dense<0.000000e+00> : vector<4xf32>
    %188 = vector.multi_reduction <add>, %185, %cst_86 [1] : vector<4x64xf32> to vector<4xf32>
    %189 = vector.shape_cast %188 : vector<4xf32> to vector<4x1xf32>
    %cst_87 = arith.constant 6.400000e+01 : f32
    %190 = vector.broadcast %cst_87 : f32 to vector<4x1xf32>
    %191 = arith.divf %189, %190 : vector<4x1xf32>
    %192 = vector.broadcast %191 : vector<4x1xf32> to vector<4x64xf32>
    %193 = arith.subf %185, %192 : vector<4x64xf32>
    %194 = arith.mulf %193, %193 : vector<4x64xf32>
    %cst_88 = arith.constant dense<0.000000e+00> : vector<4xf32>
    %195 = vector.multi_reduction <add>, %194, %cst_88 [1] : vector<4x64xf32> to vector<4xf32>
    %196 = vector.shape_cast %195 : vector<4xf32> to vector<4x1xf32>
    %cst_89 = arith.constant 6.400000e+01 : f32
    %197 = vector.broadcast %cst_89 : f32 to vector<4x1xf32>
    %198 = arith.divf %196, %197 : vector<4x1xf32>
    %cst_90 = arith.constant 9.99999974E-6 : f32
    %199 = vector.broadcast %cst_90 : f32 to vector<4x1xf32>
    %200 = arith.addf %198, %199 : vector<4x1xf32>
    %201 = math.rsqrt %200 : vector<4x1xf32>
    %202 = vector.broadcast %201 : vector<4x1xf32> to vector<4x64xf32>
    %203 = arith.mulf %193, %202 : vector<4x64xf32>
    %204 = vector.broadcast %186 : vector<1x64xf32> to vector<4x64xf32>
    %205 = arith.mulf %203, %204 : vector<4x64xf32>
    %206 = vector.broadcast %187 : vector<1x64xf32> to vector<4x64xf32>
    %207 = arith.addf %205, %206 : vector<4x64xf32>
    %c632 = arith.constant 632 : index
    %c0_91 = arith.constant 0 : index
    %208 = vector.load %arg5[%c632, %c0_91] : memref<1072x64xf32, #tpu.memory_space<vmem>>, vector<64x64xf32>
    %cst_92 = arith.constant dense<0.000000e+00> : vector<4x64xf32>
    %209 = tpu.matmul %207, %208, %cst_92 {dimension_numbers = #tpu.dot_dimension_numbers<[1], [0], [0], [1], [0, 0, 1, 1], [], []>} : vector<4x64xf32>, vector<64x64xf32>, vector<4x64xf32> -> vector<4x64xf32>
    %c696 = arith.constant 696 : index
    %c0_93 = arith.constant 0 : index
    %210 = vector.load %arg5[%c696, %c0_93] : memref<1072x64xf32, #tpu.memory_space<vmem>>, vector<1x64xf32>
    %211 = vector.broadcast %210 : vector<1x64xf32> to vector<4x64xf32>
    %212 = arith.addf %209, %211 : vector<4x64xf32>
    %cst_94 = arith.constant 0.707106769 : f32
    %213 = vector.broadcast %cst_94 : f32 to vector<4x64xf32>
    %214 = arith.mulf %212, %213 : vector<4x64xf32>
    %215 = math.absf %214 : vector<4x64xf32>
    %cst_95 = arith.constant 0.327591091 : f32
    %216 = vector.broadcast %cst_95 : f32 to vector<4x64xf32>
    %217 = arith.mulf %216, %215 : vector<4x64xf32>
    %cst_96 = arith.constant 1.000000e+00 : f32
    %218 = vector.broadcast %cst_96 : f32 to vector<4x64xf32>
    %219 = arith.addf %218, %217 : vector<4x64xf32>
    %cst_97 = arith.constant 1.000000e+00 : f32
    %220 = vector.broadcast %cst_97 : f32 to vector<4x64xf32>
    %221 = arith.divf %220, %219 : vector<4x64xf32>
    %cst_98 = arith.constant 1.06140542 : f32
    %222 = vector.broadcast %cst_98 : f32 to vector<4x64xf32>
    %223 = arith.mulf %221, %222 : vector<4x64xf32>
    %cst_99 = arith.constant -1.45315206 : f32
    %224 = vector.broadcast %cst_99 : f32 to vector<4x64xf32>
    %225 = arith.addf %224, %223 : vector<4x64xf32>
    %226 = arith.mulf %221, %225 : vector<4x64xf32>
    %cst_100 = arith.constant 1.42141378 : f32
    %227 = vector.broadcast %cst_100 : f32 to vector<4x64xf32>
    %228 = arith.addf %227, %226 : vector<4x64xf32>
    %229 = arith.mulf %221, %228 : vector<4x64xf32>
    %cst_101 = arith.constant -0.284496725 : f32
    %230 = vector.broadcast %cst_101 : f32 to vector<4x64xf32>
    %231 = arith.addf %230, %229 : vector<4x64xf32>
    %232 = arith.mulf %221, %231 : vector<4x64xf32>
    %cst_102 = arith.constant 0.254829586 : f32
    %233 = vector.broadcast %cst_102 : f32 to vector<4x64xf32>
    %234 = arith.addf %233, %232 : vector<4x64xf32>
    %235 = arith.mulf %221, %234 : vector<4x64xf32>
    %cst_103 = arith.constant 0.000000e+00 : f32
    %236 = vector.broadcast %cst_103 : f32 to vector<4x64xf32>
    %237 = arith.subf %236, %215 : vector<4x64xf32>
    %238 = arith.mulf %237, %215 : vector<4x64xf32>
    %239 = math.exp %238 : vector<4x64xf32>
    %240 = arith.mulf %235, %239 : vector<4x64xf32>
    %cst_104 = arith.constant 1.000000e+00 : f32
    %241 = vector.broadcast %cst_104 : f32 to vector<4x64xf32>
    %242 = arith.subf %241, %240 : vector<4x64xf32>
    %cst_105 = arith.constant 0.000000e+00 : f32
    %243 = vector.broadcast %cst_105 : f32 to vector<4x64xf32>
    %244 = arith.cmpf oge, %214, %243 : vector<4x64xf32>
    %cst_106 = arith.constant 0.000000e+00 : f32
    %245 = vector.broadcast %cst_106 : f32 to vector<4x64xf32>
    %246 = arith.subf %245, %242 : vector<4x64xf32>
    %247 = arith.select %244, %242, %246 : vector<4x64xi1>, vector<4x64xf32>
    %cst_107 = arith.constant 5.000000e-01 : f32
    %248 = vector.broadcast %cst_107 : f32 to vector<4x64xf32>
    %249 = arith.mulf %212, %248 : vector<4x64xf32>
    %cst_108 = arith.constant 1.000000e+00 : f32
    %250 = vector.broadcast %cst_108 : f32 to vector<4x64xf32>
    %251 = arith.addf %250, %247 : vector<4x64xf32>
    %252 = arith.mulf %249, %251 : vector<4x64xf32>
    %c704 = arith.constant 704 : index
    %c0_109 = arith.constant 0 : index
    %253 = vector.load %arg5[%c704, %c0_109] : memref<1072x64xf32, #tpu.memory_space<vmem>>, vector<64x64xf32>
    %cst_110 = arith.constant dense<0.000000e+00> : vector<4x64xf32>
    %254 = tpu.matmul %252, %253, %cst_110 {dimension_numbers = #tpu.dot_dimension_numbers<[1], [0], [0], [1], [0, 0, 1, 1], [], []>} : vector<4x64xf32>, vector<64x64xf32>, vector<4x64xf32> -> vector<4x64xf32>
    %c768 = arith.constant 768 : index
    %c0_111 = arith.constant 0 : index
    %255 = vector.load %arg5[%c768, %c0_111] : memref<1072x64xf32, #tpu.memory_space<vmem>>, vector<1x64xf32>
    %256 = vector.broadcast %255 : vector<1x64xf32> to vector<4x64xf32>
    %257 = arith.addf %254, %256 : vector<4x64xf32>
    %258 = arith.addf %185, %257 : vector<4x64xf32>
    %c776 = arith.constant 776 : index
    %c0_112 = arith.constant 0 : index
    %259 = vector.load %arg5[%c776, %c0_112] : memref<1072x64xf32, #tpu.memory_space<vmem>>, vector<1x64xf32>
    %c784 = arith.constant 784 : index
    %c0_113 = arith.constant 0 : index
    %260 = vector.load %arg5[%c784, %c0_113] : memref<1072x64xf32, #tpu.memory_space<vmem>>, vector<1x64xf32>
    %cst_114 = arith.constant dense<0.000000e+00> : vector<4xf32>
    %261 = vector.multi_reduction <add>, %258, %cst_114 [1] : vector<4x64xf32> to vector<4xf32>
    %262 = vector.shape_cast %261 : vector<4xf32> to vector<4x1xf32>
    %cst_115 = arith.constant 6.400000e+01 : f32
    %263 = vector.broadcast %cst_115 : f32 to vector<4x1xf32>
    %264 = arith.divf %262, %263 : vector<4x1xf32>
    %265 = vector.broadcast %264 : vector<4x1xf32> to vector<4x64xf32>
    %266 = arith.subf %258, %265 : vector<4x64xf32>
    %267 = arith.mulf %266, %266 : vector<4x64xf32>
    %cst_116 = arith.constant dense<0.000000e+00> : vector<4xf32>
    %268 = vector.multi_reduction <add>, %267, %cst_116 [1] : vector<4x64xf32> to vector<4xf32>
    %269 = vector.shape_cast %268 : vector<4xf32> to vector<4x1xf32>
    %cst_117 = arith.constant 6.400000e+01 : f32
    %270 = vector.broadcast %cst_117 : f32 to vector<4x1xf32>
    %271 = arith.divf %269, %270 : vector<4x1xf32>
    %cst_118 = arith.constant 9.99999974E-6 : f32
    %272 = vector.broadcast %cst_118 : f32 to vector<4x1xf32>
    %273 = arith.addf %271, %272 : vector<4x1xf32>
    %274 = math.rsqrt %273 : vector<4x1xf32>
    %275 = vector.broadcast %274 : vector<4x1xf32> to vector<4x64xf32>
    %276 = arith.mulf %266, %275 : vector<4x64xf32>
    %277 = vector.broadcast %259 : vector<1x64xf32> to vector<4x64xf32>
    %278 = arith.mulf %276, %277 : vector<4x64xf32>
    %279 = vector.broadcast %260 : vector<1x64xf32> to vector<4x64xf32>
    %280 = arith.addf %278, %279 : vector<4x64xf32>
    %c944 = arith.constant 944 : index
    %c0_119 = arith.constant 0 : index
    %281 = vector.load %arg5[%c944, %c0_119] : memref<1072x64xf32, #tpu.memory_space<vmem>>, vector<64x32xf32>
    %cst_120 = arith.constant dense<0.000000e+00> : vector<4x32xf32>
    %282 = tpu.matmul %280, %281, %cst_120 {dimension_numbers = #tpu.dot_dimension_numbers<[1], [0], [0], [1], [0, 0, 1, 1], [], []>} : vector<4x64xf32>, vector<64x32xf32>, vector<4x32xf32> -> vector<4x32xf32>
    %c1008 = arith.constant 1008 : index
    %c0_121 = arith.constant 0 : index
    %283 = vector.load %arg5[%c1008, %c0_121] : memref<1072x64xf32, #tpu.memory_space<vmem>>, vector<64x32xf32>
    %cst_122 = arith.constant dense<0.000000e+00> : vector<4x32xf32>
    %284 = tpu.matmul %280, %283, %cst_122 {dimension_numbers = #tpu.dot_dimension_numbers<[1], [0], [0], [1], [0, 0, 1, 1], [], []>} : vector<4x64xf32>, vector<64x32xf32>, vector<4x32xf32> -> vector<4x32xf32>
    %285 = arith.maximumf %282, %284 : vector<4x32xf32>
    %286 = arith.addf %285, %59 : vector<4x32xf32>
    %c792 = arith.constant 792 : index
    %c0_123 = arith.constant 0 : index
    %287 = vector.load %arg5[%c792, %c0_123] : memref<1072x64xf32, #tpu.memory_space<vmem>>, vector<32x16xf32>
    %cst_124 = arith.constant dense<0.000000e+00> : vector<4x16xf32>
    %288 = tpu.matmul %286, %287, %cst_124 {dimension_numbers = #tpu.dot_dimension_numbers<[1], [0], [0], [1], [0, 0, 1, 1], [], []>} : vector<4x32xf32>, vector<32x16xf32>, vector<4x16xf32> -> vector<4x16xf32>
    %c824 = arith.constant 824 : index
    %c0_125 = arith.constant 0 : index
    %289 = vector.load %arg5[%c824, %c0_125] : memref<1072x64xf32, #tpu.memory_space<vmem>>, vector<1x16xf32>
    %290 = vector.broadcast %289 : vector<1x16xf32> to vector<4x16xf32>
    %291 = arith.addf %288, %290 : vector<4x16xf32>
    %cst_126 = arith.constant 0.000000e+00 : f32
    %292 = vector.broadcast %cst_126 : f32 to vector<4x16xf32>
    %293 = arith.cmpf oge, %291, %292 : vector<4x16xf32>
    %cst_127 = arith.constant 2.000000e-01 : f32
    %294 = vector.broadcast %cst_127 : f32 to vector<4x16xf32>
    %295 = arith.mulf %294, %291 : vector<4x16xf32>
    %296 = arith.select %293, %291, %295 : vector<4x16xi1>, vector<4x16xf32>
    %c832 = arith.constant 832 : index
    %c0_128 = arith.constant 0 : index
    %297 = vector.load %arg5[%c832, %c0_128] : memref<1072x64xf32, #tpu.memory_space<vmem>>, vector<16x16xf32>
    %cst_129 = arith.constant dense<0.000000e+00> : vector<4x16xf32>
    %298 = tpu.matmul %296, %297, %cst_129 {dimension_numbers = #tpu.dot_dimension_numbers<[1], [0], [0], [1], [0, 0, 1, 1], [], []>} : vector<4x16xf32>, vector<16x16xf32>, vector<4x16xf32> -> vector<4x16xf32>
    %c848 = arith.constant 848 : index
    %c0_130 = arith.constant 0 : index
    %299 = vector.load %arg5[%c848, %c0_130] : memref<1072x64xf32, #tpu.memory_space<vmem>>, vector<1x16xf32>
    %300 = vector.broadcast %299 : vector<1x16xf32> to vector<4x16xf32>
    %301 = arith.addf %298, %300 : vector<4x16xf32>
    %cst_131 = arith.constant 0.000000e+00 : f32
    %302 = vector.broadcast %cst_131 : f32 to vector<4x16xf32>
    %303 = arith.cmpf oge, %301, %302 : vector<4x16xf32>
    %cst_132 = arith.constant 2.000000e-01 : f32
    %304 = vector.broadcast %cst_132 : f32 to vector<4x16xf32>
    %305 = arith.mulf %304, %301 : vector<4x16xf32>
    %306 = arith.select %303, %301, %305 : vector<4x16xi1>, vector<4x16xf32>
    %c856 = arith.constant 856 : index
    %c0_133 = arith.constant 0 : index
    %307 = vector.load %arg5[%c856, %c0_133] : memref<1072x64xf32, #tpu.memory_space<vmem>>, vector<16x2xf32>
    %cst_134 = arith.constant dense<0.000000e+00> : vector<4x2xf32>
    %308 = tpu.matmul %306, %307, %cst_134 {dimension_numbers = #tpu.dot_dimension_numbers<[1], [0], [0], [1], [0, 0, 1, 1], [], []>} : vector<4x16xf32>, vector<16x2xf32>, vector<4x2xf32> -> vector<4x2xf32>
    %c872 = arith.constant 872 : index
    %c0_135 = arith.constant 0 : index
    %309 = vector.load %arg5[%c872, %c0_135] : memref<1072x64xf32, #tpu.memory_space<vmem>>, vector<1x2xf32>
    %310 = vector.broadcast %309 : vector<1x2xf32> to vector<4x2xf32>
    %311 = arith.addf %308, %310 : vector<4x2xf32>
    %c0_136 = arith.constant 0 : index
    %c0_137 = arith.constant 0 : index
    %c0_138 = arith.constant 0 : index
    %312 = vector.load %arg6[%c0_136, %c0_137, %c0_138] : memref<1x4x2xf32, #tpu.memory_space<vmem>>, vector<1x4x2xf32>
    %313 = vector.shape_cast %312 : vector<1x4x2xf32> to vector<4x2xf32>
    %314 = vector.shape_cast %311 : vector<4x2xf32> to vector<1x4x2xf32>
    tpu.vector_store %arg6[%c0_136, %c0_137, %c0_138], %314 {strides = array<i32>} : memref<1x4x2xf32, #tpu.memory_space<vmem>>, vector<1x4x2xf32>,
    return
  }
  func.func @transform_0(%arg0: i32) -> (i32, i32, i32) {
    %c0_i32 = arith.constant 0 : i32
    %c0_i32_0 = arith.constant 0 : i32
    %c0_i32_1 = arith.constant 0 : i32
    %c0_i32_2 = arith.constant 0 : i32
    return %c0_i32, %c0_i32_0, %c0_i32_1 : i32, i32, i32
  }
  func.func @transform_1(%arg0: i32) -> (i32, i32) {
    %c0_i32 = arith.constant 0 : i32
    %c0_i32_0 = arith.constant 0 : i32
    %c0_i32_1 = arith.constant 0 : i32
    return %c0_i32, %c0_i32_0 : i32, i32
  }
  func.func @transform_2(%arg0: i32) -> (i32, i32) {
    %c0_i32 = arith.constant 0 : i32
    %c0_i32_0 = arith.constant 0 : i32
    %c0_i32_1 = arith.constant 0 : i32
    return %c0_i32, %c0_i32_0 : i32, i32
  }
  func.func @transform_3(%arg0: i32) -> (i32, i32) {
    %c0_i32 = arith.constant 0 : i32
    %c0_i32_0 = arith.constant 0 : i32
    %c0_i32_1 = arith.constant 0 : i32
    return %c0_i32, %c0_i32_0 : i32, i32
  }
  func.func @transform_4(%arg0: i32) -> (i32, i32) {
    %c0_i32 = arith.constant 0 : i32
    %c0_i32_0 = arith.constant 0 : i32
    %c0_i32_1 = arith.constant 0 : i32
    return %c0_i32, %c0_i32_0 : i32, i32
  }
  func.func @transform_5(%arg0: i32) -> (i32, i32, i32) {
    %c0_i32 = arith.constant 0 : i32
    %c0_i32_0 = arith.constant 0 : i32
    %c0_i32_1 = arith.constant 0 : i32
    %c0_i32_2 = arith.constant 0 : i32
    return %c0_i32, %c0_i32_0, %c0_i32_1 : i32, i32, i32
  }
}

</mosaic_0001>

<bundles_post_ra>
// kernel: custom-call.7
= control target key start
LH: loop header
LB: loop body
LE: loop exit
PB: predicated region body
PF: predicated region fallthrough
CT: control target
= control target key end

     0   :  { %s6_s0 = inlined_call_operand.vmem [shape: f32[16,4,64], index: 0, kind: output, shape index: {}]  }

// kernel: fwd.3
= control target key start
LH: loop header
LB: loop body
LE: loop exit
PB: predicated region body
PF: predicated region fallthrough
CT: control target
= control target key end

     0   :  { %vm144_vm0 = vcmask 1043456   ;;  %vm47_vm1 = vcmask 97280   ;;  %vm363_vm3 = vcmask 261120   ;;  %s1173_s1 = inlined_call_operand.vmem [shape: f32[64,32], index: 1, kind: input, shape index: {}]   ;;  %s1174_s0 = inlined_call_operand.vmem [shape: f32[256,12], index: 0, kind: input, shape index: {}]   ;;  %s1175_s2 = inlined_call_operand.vmem [shape: f32[256,32], index: 2, kind: output, shape index: {}]  }
   0x1   :  { %v44_v0 = vld [vmem:[%s1173_s1 + $0x8] sm:$0xf]  ;;  %v43_v1 = vld [vmem:[%s1173_s1] sm:$0xff]  ;;  %v13_v4 = vld [vmem:[%s1174_s0 + $0x10] sm:$0xff] }
   0x2   :  { %705 = vmatpush.msk.msra.mxu0 %vm144_vm0, %v44_v0  ;;  %v11_v2 = vld [vmem:[%s1174_s0] sm:$0xff]  ;;  %770 = vmatpush.msk.msra.mxu3 %vm144_vm0, %v44_v0  ;;  %v12_v3 = vld [vmem:[%s1174_s0 + $0x8] sm:$0xff]  ;;  %v14_v5 = vld [vmem:[%s1174_s0 + $0x18] sm:$0xff] }
   0x3   :  { %v15_v6 = vld [vmem:[%s1174_s0 + $0x20] sm:$0xff]  ;;  %v16_v7 = vld [vmem:[%s1174_s0 + $0x28] sm:$0xff]  ;;  %v17_v8 = vld [vmem:[%s1174_s0 + $0x30] sm:$0xff] }
   0x4   :  { %163 = vmatpush.msra.mxu0 %v43_v1  ;;  %771 = vmatpush.msra.mxu3 %v43_v1  ;;  %v18_v9 = vld [vmem:[%s1174_s0 + $0x38] sm:$0xff]  ;;  %v19_v10 = vld [vmem:[%s1174_s0 + $0x40] sm:$0xff]  ;;  %v20_v11 = vld [vmem:[%s1174_s0 + $0x48] sm:$0xff] }
   0x5   :  { %706 = vmatmul.msk.f32.vlgmr.msra.gmra.mxu0 %vm47_vm1, %v11_v2  ;;  %v21_v12 = vld [vmem:[%s1174_s0 + $0x50] sm:$0xff]  ;;  %v22_v13 = vld [vmem:[%s1174_s0 + $0x58] sm:$0xff]  ;;  %v23_v15 = vld [vmem:[%s1174_s0 + $0x60] sm:$0xff] }
   0x6   :  { %v360_v14 = vld [vmem:[%s1173_s1 + $0x30] sm:$0xff]  ;;  %v359_v16 = vld [vmem:[%s1173_s1 + $0x28] sm:$0xff]  ;;  %v358_v18 = vld [vmem:[%s1173_s1 + $0x20] sm:$0xff] }
   0x7   :  { %472 = vmatpush.msra.mxu1 %v360_v14  ;;  %772 = vmatpush.msra.mxu2 %v360_v14  ;;  %v28_v17 = vld [vmem:[%s1174_s0 + $0x88] sm:$0xff]  ;;  %v357_v19 = vld [vmem:[%s1173_s1 + $0x18] sm:$0xff]  ;;  %v29_v21 = vld [vmem:[%s1174_s0 + $0x90] sm:$0xff] }
   0x8   :  { %723 = vmatmul.msk.f32.vlgmr.msra.gmra.mxu3 %vm47_vm1, %v28_v17  ;;  %v24_v20 = vld [vmem:[%s1174_s0 + $0x68] sm:$0xff]  ;;  %v25_v22 = vld [vmem:[%s1174_s0 + $0x70] sm:$0xff]  ;;  %v30_v23 = vld [vmem:[%s1174_s0 + $0x98] sm:$0xff] }
   0x9   :  { %473 = vmatpush.msra.mxu1 %v359_v16  ;;  %773 = vmatpush.msra.mxu2 %v359_v16  ;;  %v26_v24 = vld [vmem:[%s1174_s0 + $0x78] sm:$0xff]  ;;  %v31_v25 = vld [vmem:[%s1174_s0 + $0xa0] sm:$0xff]  ;;  %v894_v26 = vld [vmem:[%s1173_s1 + $0x10] ss:$0 sm:$0xff] }
   0xa   :  { %v27_v28 = vld [vmem:[%s1174_s0 + $0x80] sm:$0xff]  ;;  %v32_v30 = vld [vmem:[%s1174_s0 + $0xa8] sm:$0xff]  ;;  %v33_v35 = vld [vmem:[%s1174_s0 + $0xb0] sm:$0xff] }
   0xb   :  { %474 = vmatpush.msra.mxu1 %v358_v18  ;;  %774 = vmatpush.msra.mxu2 %v358_v18  ;;  %v34_v40 = vld [vmem:[%s1174_s0 + $0xb8] sm:$0xff]  ;;  %v35_v45 = vld [vmem:[%s1174_s0 + $0xc0] sm:$0xff]  ;;  %v36_v50 = vld [vmem:[%s1174_s0 + $0xc8] sm:$0xff] }
   0xc   :  { %v37_v55 = vld [vmem:[%s1174_s0 + $0xd0] sm:$0xff]  ;;  %v38_v60 = vld [vmem:[%s1174_s0 + $0xd8] sm:$0xff]  ;;  %v39_v1 = vld [vmem:[%s1174_s0 + $0xe0] sm:$0xff] }
   0xd   :  { %707 = vmatmul.msk.f32.gmra.mxu0 %vm47_vm1, %v12_v3  ;;  %475 = vmatpush.msra.mxu1 %v357_v19  ;;  %v42_v16 = vld [vmem:[%s1174_s0 + $0xf8] sm:$0xff] }
   0xe   :  { %775 = vmatpush.msra.mxu2 %v357_v19 }
  0x10   :  { %724 = vmatmul.msk.f32.gmra.mxu3 %vm47_vm1, %v29_v21 }
  0x15   :  { %708 = vmatmul.msk.f32.gmra.mxu0 %vm47_vm1, %v13_v4 }
  0x18   :  { %725 = vmatmul.msk.f32.gmra.mxu3 %vm47_vm1, %v30_v23 }
  0x1d   :  { %709 = vmatmul.msk.f32.gmra.mxu0 %vm47_vm1, %v14_v5 }
  0x20   :  { %726 = vmatmul.msk.f32.gmra.mxu3 %vm47_vm1, %v31_v25 }
  0x25   :  { %710 = vmatmul.msk.f32.gmra.mxu0 %vm47_vm1, %v15_v6  ;;  %v40_v6 = vld [vmem:[%s1174_s0 + $0xe8] sm:$0xff] }
  0x28   :  { %727 = vmatmul.msk.f32.gmra.mxu3 %vm47_vm1, %v32_v30 }
  0x2d   :  { %711 = vmatmul.msk.f32.gmra.mxu0 %vm47_vm1, %v16_v7 }
  0x30   :  { %728 = vmatmul.msk.f32.gmra.mxu3 %vm47_vm1, %v33_v35 }
  0x35   :  { %712 = vmatmul.msk.f32.gmra.mxu0 %vm47_vm1, %v17_v8 }
  0x38   :  { %729 = vmatmul.msk.f32.gmra.mxu3 %vm47_vm1, %v34_v40 }
  0x3d   :  { %713 = vmatmul.msk.f32.gmra.mxu0 %vm47_vm1, %v18_v9 }
  0x40   :  { %730 = vmatmul.msk.f32.gmra.mxu3 %vm47_vm1, %v35_v45 }
  0x45   :  { %714 = vmatmul.msk.f32.gmra.mxu0 %vm47_vm1, %v19_v10 }
  0x48   :  { %731 = vmatmul.msk.f32.gmra.mxu3 %vm47_vm1, %v36_v50 }
  0x4d   :  { %715 = vmatmul.msk.f32.gmra.mxu0 %vm47_vm1, %v20_v11  ;;  %v41_v11 = vld [vmem:[%s1174_s0 + $0xf0] sm:$0xff] }
  0x50   :  { %732 = vmatmul.msk.f32.gmra.mxu3 %vm47_vm1, %v37_v55 }
  0x55   :  { %716 = vmatmul.msk.f32.gmra.mxu0 %vm47_vm1, %v21_v12 }
  0x58   :  { %733 = vmatmul.msk.f32.gmra.mxu3 %vm47_vm1, %v38_v60 }
  0x5d   :  { %717 = vmatmul.msk.f32.gmra.mxu0 %vm47_vm1, %v22_v13 }
  0x60   :  { %734 = vmatmul.msk.f32.gmra.mxu3 %vm47_vm1, %v39_v1 }
  0x65   :  { %718 = vmatmul.msk.f32.gmra.mxu0 %vm47_vm1, %v23_v15 }
  0x68   :  { %735 = vmatmul.msk.f32.gmra.mxu3 %vm47_vm1, %v40_v6 }
  0x6d   :  { %719 = vmatmul.msk.f32.gmra.mxu0 %vm47_vm1, %v24_v20 }
  0x70   :  { %736 = vmatmul.msk.f32.gmra.mxu3 %vm47_vm1, %v41_v11 }
  0x75   :  { %720 = vmatmul.msk.f32.gmra.mxu0 %vm47_vm1, %v25_v22 }
  0x78   :  { %737 = vmatmul.msk.f32.gmra.mxu3 %vm47_vm1, %v42_v16 }
  0x7d   :  { %721 = vmatmul.msk.f32.gmra.mxu0 %vm47_vm1, %v26_v24 }
  0x82   :  { %v165_v27 = vpop.f32.mrf.mxu0 }
  0x83   :  { %v166_v29 = vadd.f32 %v894_v26, %v165_v27 }
  0x85   :  { %v293_v31 = vmul.f32 0.2, %v166_v29  ;;  %722 = vmatmul.msk.f32.gmra.mxu0 %vm47_vm1, %v27_v28  ;;  %vm261_vm2 = vcmp.ge.f32.partialorder %v166_v29, 0.0 }
  0x87   :  { %v325_v32 = vsel %vm261_vm2, %v166_v29, %v293_v31 }
  0x88   :  { %738 = vmatmul.msk.f32.vlgmr.msra.gmra.mxu1 %vm363_vm3, %v325_v32 }
  0x8a   :  { %v168_v33 = vpop.f32.mrf.mxu0 }
  0x8b   :  { %v169_v34 = vadd.f32 %v894_v26, %v168_v33  ;;  %v216_v28 = vpop.f32.mrf.mxu3 }
  0x8c   :  { %v217_v50 = vadd.f32 %v894_v26, %v216_v28 }
  0x8d   :  { %v294_v36 = vmul.f32 0.2, %v169_v34  ;;  %vm262_vm4 = vcmp.ge.f32.partialorder %v169_v34, 0.0 }
  0x8f   :  { %v326_v37 = vsel %vm262_vm4, %v169_v34, %v294_v36 }
  0x90   :  { %739 = vmatmul.msk.f32.gmra.mxu1 %vm363_vm3, %v326_v37 }
  0x92   :  { %v171_v38 = vpop.f32.mrf.mxu0 }
  0x93   :  { %v172_v39 = vadd.f32 %v894_v26, %v171_v38  ;;  %v219_v34 = vpop.f32.mrf.mxu3 }
  0x95   :  { %v295_v41 = vmul.f32 0.2, %v172_v39  ;;  %vm263_vm5 = vcmp.ge.f32.partialorder %v172_v39, 0.0 }
  0x97   :  { %v327_v42 = vsel %vm263_vm5, %v172_v39, %v295_v41 }
  0x98   :  { %740 = vmatmul.msk.f32.gmra.mxu1 %vm363_vm3, %v327_v42 }
  0x9a   :  { %v174_v43 = vpop.f32.mrf.mxu0 }
  0x9b   :  { %v175_v44 = vadd.f32 %v894_v26, %v174_v43  ;;  %v222_v40 = vpop.f32.mrf.mxu3 }
  0x9c   :  { %v223_v1 = vadd.f32 %v894_v26, %v222_v40 }
  0x9d   :  { %v296_v46 = vmul.f32 0.2, %v175_v44  ;;  %vm264_vm6 = vcmp.ge.f32.partialorder %v175_v44, 0.0 }
  0x9e   :  { %v312_v6 = vmul.f32 0.2, %v223_v1 }
  0x9f   :  { %v328_v47 = vsel %vm264_vm6, %v175_v44, %v296_v46  ;;  %v979_v44 = vld [vmem:[%s1173_s1 + $0x38] ss:$0 sm:$0xff]  ;;  %vm278_vm6 = vcmp.ge.f32.partialorder %v217_v50, 0.0 }
  0xa0   :  { %741 = vmatmul.msk.f32.gmra.mxu1 %vm363_vm3, %v328_v47 }
  0xa2   :  { %v177_v48 = vpop.f32.mrf.mxu0 }
  0xa3   :  { %v178_v49 = vadd.f32 %v894_v26, %v177_v48 }
  0xa5   :  { %v297_v51 = vmul.f32 0.2, %v178_v49  ;;  %vm265_vm7 = vcmp.ge.f32.partialorder %v178_v49, 0.0 }
  0xa7   :  { %v329_v52 = vsel %vm265_vm7, %v178_v49, %v297_v51  ;;  %v225_v49 = vpop.f32.mrf.mxu3 }
  0xa8   :  { %742 = vmatmul.msk.f32.gmra.mxu1 %vm363_vm3, %v329_v52 }
  0xaa   :  { %v180_v53 = vpop.f32.mrf.mxu0 }
  0xab   :  { %v181_v54 = vadd.f32 %v894_v26, %v180_v53 }
  0xad   :  { %v298_v56 = vmul.f32 0.2, %v181_v54  ;;  %vm266_vm8 = vcmp.ge.f32.partialorder %v181_v54, 0.0 }
  0xaf   :  { %v330_v57 = vsel %vm266_vm8, %v181_v54, %v298_v56  ;;  %v310_v54 = vmul.f32 0.2, %v217_v50  ;;  %v228_v60 = vpop.f32.mrf.mxu3 }
  0xb0   :  { %743 = vmatmul.msk.f32.gmra.mxu1 %vm363_vm3, %v330_v57  ;;  %v220_v57 = vadd.f32 %v894_v26, %v219_v34 }
  0xb2   :  { %v183_v58 = vpop.f32.mrf.mxu0  ;;  %vm279_vm8 = vcmp.ge.f32.partialorder %v220_v57, 0.0 }
  0xb3   :  { %v184_v59 = vadd.f32 %v894_v26, %v183_v58  ;;  %v342_v58 = vsel %vm278_vm6, %v217_v50, %v310_v54 }
  0xb5   :  { %v299_v61 = vmul.f32 0.2, %v184_v59  ;;  %vm267_vm9 = vcmp.ge.f32.partialorder %v184_v59, 0.0 }
  0xb7   :  { %v331_v62 = vsel %vm267_vm9, %v184_v59, %v299_v61 }
  0xb8   :  { %744 = vmatmul.msk.f32.gmra.mxu1 %vm363_vm3, %v331_v62  ;;  %v311_v62 = vmul.f32 0.2, %v220_v57 }
  0xba   :  { %v186_v63 = vpop.f32.mrf.mxu0 }
  0xbb   :  { %v187_v0 = vadd.f32 %v894_v26, %v186_v63 }
  0xbd   :  { %v300_v2 = vmul.f32 0.2, %v187_v0  ;;  %vm268_vm10 = vcmp.ge.f32.partialorder %v187_v0, 0.0 }
  0xbf   :  { %v332_v3 = vsel %vm268_vm10, %v187_v0, %v300_v2  ;;  %v343_v2 = vsel %vm279_vm8, %v220_v57, %v311_v62  ;;  %vm280_vm10 = vcmp.ge.f32.partialorder %v223_v1, 0.0 }
  0xc0   :  { %745 = vmatmul.msk.f32.gmra.mxu1 %vm363_vm3, %v332_v3 }
  0xc2   :  { %v189_v4 = vpop.f32.mrf.mxu0 }
  0xc3   :  { %v190_v5 = vadd.f32 %v894_v26, %v189_v4 }
  0xc5   :  { %v301_v7 = vmul.f32 0.2, %v190_v5  ;;  %vm269_vm11 = vcmp.ge.f32.partialorder %v190_v5, 0.0 }
  0xc7   :  { %v333_v8 = vsel %vm269_vm11, %v190_v5, %v301_v7  ;;  %v231_v5 = vpop.f32.mrf.mxu3 }
  0xc8   :  { %746 = vmatmul.msk.f32.gmra.mxu1 %vm363_vm3, %v333_v8 }
  0xca   :  { %v192_v9 = vpop.f32.mrf.mxu0 }
  0xcb   :  { %v193_v10 = vadd.f32 %v894_v26, %v192_v9  ;;  %v226_v9 = vadd.f32 %v894_v26, %v225_v49 }
  0xcd   :  { %v302_v12 = vmul.f32 0.2, %v193_v10  ;;  %vm270_vm12 = vcmp.ge.f32.partialorder %v193_v10, 0.0 }
  0xcf   :  { %v334_v13 = vsel %vm270_vm12, %v193_v10, %v302_v12  ;;  %v344_v10 = vsel %vm280_vm10, %v223_v1, %v312_v6  ;;  %vm281_vm12 = vcmp.ge.f32.partialorder %v226_v9, 0.0 }
  0xd0   :  { %747 = vmatmul.msk.f32.gmra.mxu1 %vm363_vm3, %v334_v13  ;;  %v313_v13 = vmul.f32 0.2, %v226_v9 }
  0xd2   :  { %v195_v14 = vpop.f32.mrf.mxu0 }
  0xd3   :  { %v196_v15 = vadd.f32 %v894_v26, %v195_v14  ;;  %v234_v14 = vpop.f32.mrf.mxu3 }
  0xd5   :  { %v303_v17 = vmul.f32 0.2, %v196_v15  ;;  %vm271_vm13 = vcmp.ge.f32.partialorder %v196_v15, 0.0 }
  0xd7   :  { %v335_v18 = vsel %vm271_vm13, %v196_v15, %v303_v17  ;;  %v229_v17 = vadd.f32 %v894_v26, %v228_v60 }
  0xd8   :  { %748 = vmatmul.msk.f32.gmra.mxu1 %vm363_vm3, %v335_v18  ;;  %v345_v18 = vsel %vm281_vm12, %v226_v9, %v313_v13 }
  0xda   :  { %v198_v19 = vpop.f32.mrf.mxu0 }
  0xdb   :  { %v199_v20 = vadd.f32 %v894_v26, %v198_v19 }
  0xdd   :  { %v304_v21 = vmul.f32 0.2, %v199_v20  ;;  %vm272_vm14 = vcmp.ge.f32.partialorder %v199_v20, 0.0 }
  0xdf   :  { %v336_v22 = vsel %vm272_vm14, %v199_v20, %v304_v21  ;;  %v314_v21 = vmul.f32 0.2, %v229_v17  ;;  %vm282_vm14 = vcmp.ge.f32.partialorder %v229_v17, 0.0 }
  0xe0   :  { %749 = vmatmul.msk.f32.gmra.mxu1 %vm363_vm3, %v336_v22 }
  0xe2   :  { %v201_v23 = vpop.f32.mrf.mxu0 }
  0xe3   :  { %v202_v24 = vadd.f32 %v894_v26, %v201_v23 }
  0xe5   :  { %v305_v25 = vmul.f32 0.2, %v202_v24  ;;  %vm273_vm15 = vcmp.ge.f32.partialorder %v202_v24, 0.0 }
  0xe7   :  { %v337_v27 = vsel %vm273_vm15, %v202_v24, %v305_v25  ;;  %v237_v24 = vpop.f32.mrf.mxu3  ;;  %v232_v25 = vadd.f32 %v894_v26, %v231_v5 }
  0xe8   :  { %750 = vmatmul.msk.f32.gmra.mxu1 %vm363_vm3, %v337_v27  ;;  %v346_v27 = vsel %vm282_vm14, %v229_v17, %v314_v21 }
  0xea   :  { %v204_v29 = vpop.f32.mrf.mxu0 }
  0xeb   :  { %v205_v30 = vadd.f32 %v894_v26, %v204_v29 }
  0xed   :  { %v306_v31 = vmul.f32 0.2, %v205_v30  ;;  %vm274_vm0 = vcmp.ge.f32.partialorder %v205_v30, 0.0 }
  0xef   :  { %v338_v32 = vsel %vm274_vm0, %v205_v30, %v306_v31  ;;  %v315_v30 = vmul.f32 0.2, %v232_v25  ;;  %vm283_vm0 = vcmp.ge.f32.partialorder %v232_v25, 0.0 }
  0xf0   :  { %751 = vmatmul.msk.f32.gmra.mxu1 %vm363_vm3, %v338_v32 }
  0xf1   :  { %v347_v34 = vsel %vm283_vm0, %v232_v25, %v315_v30 }
  0xf2   :  { %v207_v33 = vpop.f32.mrf.mxu0 }
  0xf3   :  { %v208_v35 = vadd.f32 %v894_v26, %v207_v33  ;;  %v235_v33 = vadd.f32 %v894_v26, %v234_v14 }
  0xf5   :  { %v307_v36 = vmul.f32 0.2, %v208_v35  ;;  %vm275_vm1 = vcmp.ge.f32.partialorder %v208_v35, 0.0 }
  0xf7   :  { %v339_v37 = vsel %vm275_vm1, %v208_v35, %v307_v36  ;;  %v240_v36 = vpop.f32.mrf.mxu3 }
  0xf8   :  { %752 = vmatmul.msk.f32.gmra.mxu1 %vm363_vm3, %v339_v37  ;;  %v241_v50 = vadd.f32 %v894_v26, %v240_v36 }
  0xfa   :  { %v210_v38 = vpop.f32.mrf.mxu0  ;;  %v318_v54 = vmul.f32 0.2, %v241_v50 }
  0xfb   :  { %v211_v39 = vadd.f32 %v894_v26, %v210_v38  ;;  %v316_v38 = vmul.f32 0.2, %v235_v33 }
  0xfd   :  { %v308_v41 = vmul.f32 0.2, %v211_v39  ;;  %vm276_vm2 = vcmp.ge.f32.partialorder %v211_v39, 0.0 }
  0xff   :  { %v340_v42 = vsel %vm276_vm2, %v211_v39, %v308_v41  ;;  %vm284_vm2 = vcmp.ge.f32.partialorder %v235_v33, 0.0  ;;  %v238_v41 = vadd.f32 %v894_v26, %v237_v24 }
 0x100   :  { %753 = vmatmul.msk.f32.gmra.mxu1 %vm363_vm3, %v340_v42  ;;  %v348_v42 = vsel %vm284_vm2, %v235_v33, %v316_v38 }
 0x102   :  { %v213_v43 = vpop.f32.mrf.mxu0 }
 0x103   :  { %v214_v45 = vadd.f32 %v894_v26, %v213_v43 }
 0x105   :  { %v309_v46 = vmul.f32 0.2, %v214_v45  ;;  %v477_v47 = vpop.f32.mrf.mxu1  ;;  %vm277_vm4 = vcmp.ge.f32.partialorder %v214_v45, 0.0 }
 0x106   :  { %v478_v48 = vadd.f32 %v979_v44, %v477_v47  ;;  %v317_v47 = vmul.f32 0.2, %v238_v41 }
 0x107   :  { %v341_v51 = vsel %vm277_vm4, %v214_v45, %v309_v46  ;;  %v243_v46 = vpop.f32.mrf.mxu3 }
 0x108   :  { %vm573_vm5 = vcmp.ge.f32.partialorder %v478_v48, 0.0  ;;  %v605_v52 = vmul.f32 0.2, %v478_v48  ;;  %754 = vmatmul.msk.f32.vlgmr.msra.gmra.mxu2 %vm363_vm3, %v341_v51 }
 0x10a   :  { %v637_v53 = vsel %vm573_vm5, %v478_v48, %v605_v52  ;;  %vm285_vm5 = vcmp.ge.f32.partialorder %v238_v41, 0.0 }
 0x10b   :  { %669 = vst.msk [vmem:[%s1175_s2] sm:$0xff] %vm363_vm3, %v637_v53  ;;  %v349_v51 = vsel %vm285_vm5, %v238_v41, %v317_v47 }
 0x10d   :  { %v480_v55 = vpop.f32.mrf.mxu1 }
 0x10e   :  { %v481_v56 = vadd.f32 %v979_v44, %v480_v55 }
 0x10f   :  { %v246_v55 = vpop.f32.mrf.mxu3 }
 0x110   :  { %vm574_vm7 = vcmp.ge.f32.partialorder %v481_v56, 0.0  ;;  %v606_v59 = vmul.f32 0.2, %v481_v56  ;;  %755 = vmatmul.msk.f32.gmra.mxu2 %vm363_vm3, %v342_v58  ;;  %v244_v58 = vadd.f32 %v894_v26, %v243_v46 }
 0x112   :  { %v638_v61 = vsel %vm574_vm7, %v481_v56, %v606_v59  ;;  %vm286_vm7 = vcmp.ge.f32.partialorder %v241_v50, 0.0  ;;  %v319_v62 = vmul.f32 0.2, %v244_v58 }
 0x113   :  { %670 = vst.msk [vmem:[%s1175_s2 + $0x8] sm:$0xff] %vm363_vm3, %v638_v61  ;;  %v350_v59 = vsel %vm286_vm7, %v241_v50, %v318_v54 }
 0x115   :  { %v483_v63 = vpop.f32.mrf.mxu1 }
 0x116   :  { %v484_v0 = vadd.f32 %v979_v44, %v483_v63 }
 0x117   :  { %v249_v1 = vpop.f32.mrf.mxu3 }
 0x118   :  { %vm575_vm9 = vcmp.ge.f32.partialorder %v484_v0, 0.0  ;;  %v607_v3 = vmul.f32 0.2, %v484_v0  ;;  %756 = vmatmul.msk.f32.gmra.mxu2 %vm363_vm3, %v343_v2  ;;  %v247_v2 = vadd.f32 %v894_v26, %v246_v55  ;;  %v250_v9 = vadd.f32 %v894_v26, %v249_v1 }
 0x11a   :  { %v639_v4 = vsel %vm575_vm9, %v484_v0, %v607_v3  ;;  %vm287_vm9 = vcmp.ge.f32.partialorder %v244_v58, 0.0  ;;  %v320_v6 = vmul.f32 0.2, %v247_v2  ;;  %v321_v14 = vmul.f32 0.2, %v250_v9 }
 0x11b   :  { %671 = vst.msk [vmem:[%s1175_s2 + $0x10] sm:$0xff] %vm363_vm3, %v639_v4  ;;  %v351_v3 = vsel %vm287_vm9, %v244_v58, %v319_v62 }
 0x11d   :  { %v486_v7 = vpop.f32.mrf.mxu1 }
 0x11e   :  { %v487_v8 = vadd.f32 %v979_v44, %v486_v7 }
 0x120   :  { %vm576_vm11 = vcmp.ge.f32.partialorder %v487_v8, 0.0  ;;  %v608_v11 = vmul.f32 0.2, %v487_v8  ;;  %757 = vmatmul.msk.f32.gmra.mxu2 %vm363_vm3, %v344_v10 }
 0x122   :  { %v640_v12 = vsel %vm576_vm11, %v487_v8, %v608_v11  ;;  %vm288_vm11 = vcmp.ge.f32.partialorder %v247_v2, 0.0 }
 0x123   :  { %672 = vst.msk [vmem:[%s1175_s2 + $0x18] sm:$0xff] %vm363_vm3, %v640_v12  ;;  %v352_v10 = vsel %vm288_vm11, %v247_v2, %v320_v6  ;;  %v252_v12 = vpop.f32.mrf.mxu3 }
 0x124   :  { %v253_v17 = vadd.f32 %v894_v26, %v252_v12 }
 0x125   :  { %v489_v15 = vpop.f32.mrf.mxu1 }
 0x126   :  { %v490_v16 = vadd.f32 %v979_v44, %v489_v15 }
 0x128   :  { %vm577_vm13 = vcmp.ge.f32.partialorder %v490_v16, 0.0  ;;  %v609_v19 = vmul.f32 0.2, %v490_v16  ;;  %758 = vmatmul.msk.f32.gmra.mxu2 %vm363_vm3, %v345_v18 }
 0x12a   :  { %v641_v20 = vsel %vm577_vm13, %v490_v16, %v609_v19  ;;  %vm289_vm13 = vcmp.ge.f32.partialorder %v250_v9, 0.0 }
 0x12b   :  { %673 = vst.msk [vmem:[%s1175_s2 + $0x20] sm:$0xff] %vm363_vm3, %v641_v20  ;;  %v353_v18 = vsel %vm289_vm13, %v250_v9, %v321_v14  ;;  %v255_v21 = vpop.f32.mrf.mxu3 }
 0x12c   :  { %v256_v25 = vadd.f32 %v894_v26, %v255_v21 }
 0x12d   :  { %v492_v22 = vpop.f32.mrf.mxu1 }
 0x12e   :  { %v493_v23 = vadd.f32 %v979_v44, %v492_v22  ;;  %v322_v22 = vmul.f32 0.2, %v253_v17  ;;  %v323_v30 = vmul.f32 0.2, %v256_v25 }
 0x130   :  { %vm578_vm15 = vcmp.ge.f32.partialorder %v493_v23, 0.0  ;;  %v610_v28 = vmul.f32 0.2, %v493_v23  ;;  %759 = vmatmul.msk.f32.gmra.mxu2 %vm363_vm3, %v346_v27 }
 0x132   :  { %v642_v29 = vsel %vm578_vm15, %v493_v23, %v610_v28  ;;  %vm290_vm15 = vcmp.ge.f32.partialorder %v253_v17, 0.0 }
 0x133   :  { %674 = vst.msk [vmem:[%s1175_s2 + $0x28] sm:$0xff] %vm363_vm3, %v642_v29  ;;  %v354_v27 = vsel %vm290_vm15, %v253_v17, %v322_v22 }
 0x135   :  { %v495_v31 = vpop.f32.mrf.mxu1 }
 0x136   :  { %v496_v32 = vadd.f32 %v979_v44, %v495_v31  ;;  %v258_v31 = vpop.f32.mrf.mxu3 }
 0x138   :  { %vm579_vm1 = vcmp.ge.f32.partialorder %v496_v32, 0.0  ;;  %v611_v35 = vmul.f32 0.2, %v496_v32  ;;  %760 = vmatmul.msk.f32.gmra.mxu2 %vm363_vm3, %v347_v34  ;;  %v259_v34 = vadd.f32 %v894_v26, %v258_v31 }
 0x13a   :  { %v643_v37 = vsel %vm579_vm1, %v496_v32, %v611_v35  ;;  %vm291_vm1 = vcmp.ge.f32.partialorder %v256_v25, 0.0  ;;  %v324_v38 = vmul.f32 0.2, %v259_v34 }
 0x13b   :  { %675 = vst.msk [vmem:[%s1175_s2 + $0x30] sm:$0xff] %vm363_vm3, %v643_v37  ;;  %v355_v35 = vsel %vm291_vm1, %v256_v25, %v323_v30 }
 0x13d   :  { %v498_v39 = vpop.f32.mrf.mxu1 }
 0x13e   :  { %v499_v40 = vadd.f32 %v979_v44, %v498_v39 }
 0x140   :  { %vm580_vm4 = vcmp.ge.f32.partialorder %v499_v40, 0.0  ;;  %v612_v43 = vmul.f32 0.2, %v499_v40  ;;  %761 = vmatmul.msk.f32.gmra.mxu2 %vm363_vm3, %v348_v42 }
 0x142   :  { %v644_v45 = vsel %vm580_vm4, %v499_v40, %v612_v43  ;;  %vm292_vm4 = vcmp.ge.f32.partialorder %v259_v34, 0.0 }
 0x143   :  { %676 = vst.msk [vmem:[%s1175_s2 + $0x38] sm:$0xff] %vm363_vm3, %v644_v45  ;;  %v356_v41 = vsel %vm292_vm4, %v259_v34, %v324_v38 }
 0x145   :  { %v501_v48 = vpop.f32.mrf.mxu1 }
 0x146   :  { %v502_v49 = vadd.f32 %v979_v44, %v501_v48 }
 0x148   :  { %vm581_vm6 = vcmp.ge.f32.partialorder %v502_v49, 0.0  ;;  %v613_v52 = vmul.f32 0.2, %v502_v49  ;;  %762 = vmatmul.msk.f32.gmra.mxu2 %vm363_vm3, %v349_v51 }
 0x14a   :  { %v645_v53 = vsel %vm581_vm6, %v502_v49, %v613_v52 }
 0x14b   :  { %677 = vst.msk [vmem:[%s1175_s2 + $0x40] sm:$0xff] %vm363_vm3, %v645_v53 }
 0x14d   :  { %v504_v56 = vpop.f32.mrf.mxu1 }
 0x14e   :  { %v505_v57 = vadd.f32 %v979_v44, %v504_v56 }
 0x150   :  { %vm582_vm8 = vcmp.ge.f32.partialorder %v505_v57, 0.0  ;;  %v614_v60 = vmul.f32 0.2, %v505_v57  ;;  %763 = vmatmul.msk.f32.gmra.mxu2 %vm363_vm3, %v350_v59 }
 0x152   :  { %v646_v61 = vsel %vm582_vm8, %v505_v57, %v614_v60 }
 0x153   :  { %678 = vst.msk [vmem:[%s1175_s2 + $0x48] sm:$0xff] %vm363_vm3, %v646_v61 }
 0x155   :  { %v507_v63 = vpop.f32.mrf.mxu1 }
 0x156   :  { %v508_v0 = vadd.f32 %v979_v44, %v507_v63 }
 0x158   :  { %vm583_vm10 = vcmp.ge.f32.partialorder %v508_v0, 0.0  ;;  %v615_v4 = vmul.f32 0.2, %v508_v0  ;;  %764 = vmatmul.msk.f32.gmra.mxu2 %vm363_vm3, %v351_v3 }
 0x15a   :  { %v647_v5 = vsel %vm583_vm10, %v508_v0, %v615_v4 }
 0x15b   :  { %679 = vst.msk [vmem:[%s1175_s2 + $0x50] sm:$0xff] %vm363_vm3, %v647_v5 }
 0x15d   :  { %v510_v7 = vpop.f32.mrf.mxu1 }
 0x15e   :  { %v511_v8 = vadd.f32 %v979_v44, %v510_v7 }
 0x160   :  { %vm584_vm12 = vcmp.ge.f32.partialorder %v511_v8, 0.0  ;;  %v616_v11 = vmul.f32 0.2, %v511_v8  ;;  %765 = vmatmul.msk.f32.gmra.mxu2 %vm363_vm3, %v352_v10 }
 0x162   :  { %v648_v13 = vsel %vm584_vm12, %v511_v8, %v616_v11 }
 0x163   :  { %680 = vst.msk [vmem:[%s1175_s2 + $0x58] sm:$0xff] %vm363_vm3, %v648_v13 }
 0x165   :  { %v513_v15 = vpop.f32.mrf.mxu1 }
 0x166   :  { %v514_v16 = vadd.f32 %v979_v44, %v513_v15 }
 0x168   :  { %vm585_vm14 = vcmp.ge.f32.partialorder %v514_v16, 0.0  ;;  %v617_v19 = vmul.f32 0.2, %v514_v16  ;;  %766 = vmatmul.msk.f32.gmra.mxu2 %vm363_vm3, %v353_v18 }
 0x16a   :  { %v649_v20 = vsel %vm585_vm14, %v514_v16, %v617_v19 }
 0x16b   :  { %681 = vst.msk [vmem:[%s1175_s2 + $0x60] sm:$0xff] %vm363_vm3, %v649_v20 }
 0x16d   :  { %v516_v23 = vpop.f32.mrf.mxu1 }
 0x16e   :  { %v517_v24 = vadd.f32 %v979_v44, %v516_v23 }
 0x170   :  { %vm586_vm0 = vcmp.ge.f32.partialorder %v517_v24, 0.0  ;;  %v618_v28 = vmul.f32 0.2, %v517_v24  ;;  %767 = vmatmul.msk.f32.gmra.mxu2 %vm363_vm3, %v354_v27 }
 0x172   :  { %v650_v29 = vsel %vm586_vm0, %v517_v24, %v618_v28 }
 0x173   :  { %682 = vst.msk [vmem:[%s1175_s2 + $0x68] sm:$0xff] %vm363_vm3, %v650_v29 }
 0x175   :  { %v519_v32 = vpop.f32.mrf.mxu1 }
 0x176   :  { %v520_v33 = vadd.f32 %v979_v44, %v519_v32 }
 0x178   :  { %vm587_vm2 = vcmp.ge.f32.partialorder %v520_v33, 0.0  ;;  %v619_v36 = vmul.f32 0.2, %v520_v33  ;;  %768 = vmatmul.msk.f32.gmra.mxu2 %vm363_vm3, %v355_v35 }
 0x17a   :  { %v651_v37 = vsel %vm587_vm2, %v520_v33, %v619_v36 }
 0x17b   :  { %683 = vst.msk [vmem:[%s1175_s2 + $0x70] sm:$0xff] %vm363_vm3, %v651_v37 }
 0x17d   :  { %v522_v39 = vpop.f32.mrf.mxu1 }
 0x17e   :  { %v523_v40 = vadd.f32 %v979_v44, %v522_v39 }
 0x180   :  { %vm588_vm5 = vcmp.ge.f32.partialorder %v523_v40, 0.0  ;;  %v620_v42 = vmul.f32 0.2, %v523_v40  ;;  %769 = vmatmul.msk.f32.gmra.mxu2 %vm363_vm3, %v356_v41 }
 0x182   :  { %v652_v26 = vsel %vm588_vm5, %v523_v40, %v620_v42 }
 0x183   :  { %684 = vst.msk [vmem:[%s1175_s2 + $0x78] sm:$0xff] %vm363_vm3, %v652_v26 }
 0x18b   :  { %v525_v43 = vpop.f32.mrf.mxu2 }
 0x18c   :  { %v526_v45 = vadd.f32 %v979_v44, %v525_v43 }
 0x18e   :  { %vm589_vm6 = vcmp.ge.f32.partialorder %v526_v45, 0.0  ;;  %v621_v46 = vmul.f32 0.2, %v526_v45 }
 0x190   :  { %v653_v47 = vsel %vm589_vm6, %v526_v45, %v621_v46 }
 0x191   :  { %685 = vst.msk [vmem:[%s1175_s2 + $0x80] sm:$0xff] %vm363_vm3, %v653_v47 }
 0x193   :  { %v528_v48 = vpop.f32.mrf.mxu2 }
 0x194   :  { %v529_v49 = vadd.f32 %v979_v44, %v528_v48 }
 0x196   :  { %vm590_vm7 = vcmp.ge.f32.partialorder %v529_v49, 0.0  ;;  %v622_v50 = vmul.f32 0.2, %v529_v49 }
 0x198   :  { %v654_v51 = vsel %vm590_vm7, %v529_v49, %v622_v50 }
 0x199   :  { %686 = vst.msk [vmem:[%s1175_s2 + $0x88] sm:$0xff] %vm363_vm3, %v654_v51 }
 0x19b   :  { %v531_v52 = vpop.f32.mrf.mxu2 }
 0x19c   :  { %v532_v53 = vadd.f32 %v979_v44, %v531_v52 }
 0x19e   :  { %vm591_vm8 = vcmp.ge.f32.partialorder %v532_v53, 0.0  ;;  %v623_v54 = vmul.f32 0.2, %v532_v53 }
 0x1a0   :  { %v655_v55 = vsel %vm591_vm8, %v532_v53, %v623_v54 }
 0x1a1   :  { %687 = vst.msk [vmem:[%s1175_s2 + $0x90] sm:$0xff] %vm363_vm3, %v655_v55 }
 0x1a3   :  { %v534_v56 = vpop.f32.mrf.mxu2 }
 0x1a4   :  { %v535_v57 = vadd.f32 %v979_v44, %v534_v56 }
 0x1a6   :  { %vm592_vm9 = vcmp.ge.f32.partialorder %v535_v57, 0.0  ;;  %v624_v58 = vmul.f32 0.2, %v535_v57 }
 0x1a8   :  { %v656_v59 = vsel %vm592_vm9, %v535_v57, %v624_v58 }
 0x1a9   :  { %688 = vst.msk [vmem:[%s1175_s2 + $0x98] sm:$0xff] %vm363_vm3, %v656_v59 }
 0x1ab   :  { %v537_v60 = vpop.f32.mrf.mxu2 }
 0x1ac   :  { %v538_v61 = vadd.f32 %v979_v44, %v537_v60 }
 0x1ae   :  { %vm593_vm10 = vcmp.ge.f32.partialorder %v538_v61, 0.0  ;;  %v625_v62 = vmul.f32 0.2, %v538_v61 }
 0x1b0   :  { %v657_v63 = vsel %vm593_vm10, %v538_v61, %v625_v62 }
 0x1b1   :  { %689 = vst.msk [vmem:[%s1175_s2 + $0xa0] sm:$0xff] %vm363_vm3, %v657_v63 }
 0x1b3   :  { %v540_v0 = vpop.f32.mrf.mxu2 }
 0x1b4   :  { %v541_v1 = vadd.f32 %v979_v44, %v540_v0 }
 0x1b6   :  { %vm594_vm11 = vcmp.ge.f32.partialorder %v541_v1, 0.0  ;;  %v626_v2 = vmul.f32 0.2, %v541_v1 }
 0x1b8   :  { %v658_v3 = vsel %vm594_vm11, %v541_v1, %v626_v2 }
 0x1b9   :  { %690 = vst.msk [vmem:[%s1175_s2 + $0xa8] sm:$0xff] %vm363_vm3, %v658_v3 }
 0x1bb   :  { %v543_v4 = vpop.f32.mrf.mxu2 }
 0x1bc   :  { %v544_v5 = vadd.f32 %v979_v44, %v543_v4 }
 0x1be   :  { %vm595_vm12 = vcmp.ge.f32.partialorder %v544_v5, 0.0  ;;  %v627_v6 = vmul.f32 0.2, %v544_v5 }
 0x1c0   :  { %v659_v7 = vsel %vm595_vm12, %v544_v5, %v627_v6 }
 0x1c1   :  { %691 = vst.msk [vmem:[%s1175_s2 + $0xb0] sm:$0xff] %vm363_vm3, %v659_v7 }
 0x1c3   :  { %v546_v8 = vpop.f32.mrf.mxu2 }
 0x1c4   :  { %v547_v9 = vadd.f32 %v979_v44, %v546_v8 }
 0x1c6   :  { %vm596_vm13 = vcmp.ge.f32.partialorder %v547_v9, 0.0  ;;  %v628_v10 = vmul.f32 0.2, %v547_v9 }
 0x1c8   :  { %v660_v11 = vsel %vm596_vm13, %v547_v9, %v628_v10 }
 0x1c9   :  { %692 = vst.msk [vmem:[%s1175_s2 + $0xb8] sm:$0xff] %vm363_vm3, %v660_v11 }
 0x1cb   :  { %v549_v12 = vpop.f32.mrf.mxu2 }
 0x1cc   :  { %v550_v13 = vadd.f32 %v979_v44, %v549_v12 }
 0x1ce   :  { %vm597_vm14 = vcmp.ge.f32.partialorder %v550_v13, 0.0  ;;  %v629_v14 = vmul.f32 0.2, %v550_v13 }
 0x1d0   :  { %v661_v15 = vsel %vm597_vm14, %v550_v13, %v629_v14 }
 0x1d1   :  { %693 = vst.msk [vmem:[%s1175_s2 + $0xc0] sm:$0xff] %vm363_vm3, %v661_v15 }
 0x1d3   :  { %v552_v16 = vpop.f32.mrf.mxu2 }
 0x1d4   :  { %v553_v17 = vadd.f32 %v979_v44, %v552_v16 }
 0x1d6   :  { %vm598_vm15 = vcmp.ge.f32.partialorder %v553_v17, 0.0  ;;  %v630_v18 = vmul.f32 0.2, %v553_v17 }
 0x1d8   :  { %v662_v19 = vsel %vm598_vm15, %v553_v17, %v630_v18 }
 0x1d9   :  { %694 = vst.msk [vmem:[%s1175_s2 + $0xc8] sm:$0xff] %vm363_vm3, %v662_v19 }
 0x1db   :  { %v555_v20 = vpop.f32.mrf.mxu2 }
 0x1dc   :  { %v556_v21 = vadd.f32 %v979_v44, %v555_v20 }
 0x1de   :  { %vm599_vm0 = vcmp.ge.f32.partialorder %v556_v21, 0.0  ;;  %v631_v22 = vmul.f32 0.2, %v556_v21 }
 0x1e0   :  { %v663_v23 = vsel %vm599_vm0, %v556_v21, %v631_v22 }
 0x1e1   :  { %695 = vst.msk [vmem:[%s1175_s2 + $0xd0] sm:$0xff] %vm363_vm3, %v663_v23 }
 0x1e3   :  { %v558_v24 = vpop.f32.mrf.mxu2 }
 0x1e4   :  { %v559_v25 = vadd.f32 %v979_v44, %v558_v24 }
 0x1e6   :  { %vm600_vm1 = vcmp.ge.f32.partialorder %v559_v25, 0.0  ;;  %v632_v27 = vmul.f32 0.2, %v559_v25 }
 0x1e8   :  { %v664_v28 = vsel %vm600_vm1, %v559_v25, %v632_v27 }
 0x1e9   :  { %696 = vst.msk [vmem:[%s1175_s2 + $0xd8] sm:$0xff] %vm363_vm3, %v664_v28 }
 0x1eb   :  { %v561_v29 = vpop.f32.mrf.mxu2 }
 0x1ec   :  { %v562_v30 = vadd.f32 %v979_v44, %v561_v29 }
 0x1ee   :  { %vm601_vm2 = vcmp.ge.f32.partialorder %v562_v30, 0.0  ;;  %v633_v31 = vmul.f32 0.2, %v562_v30 }
 0x1f0   :  { %v665_v32 = vsel %vm601_vm2, %v562_v30, %v633_v31 }
 0x1f1   :  { %697 = vst.msk [vmem:[%s1175_s2 + $0xe0] sm:$0xff] %vm363_vm3, %v665_v32 }
 0x1f3   :  { %v564_v33 = vpop.f32.mrf.mxu2 }
 0x1f4   :  { %v565_v34 = vadd.f32 %v979_v44, %v564_v33 }
 0x1f6   :  { %vm602_vm4 = vcmp.ge.f32.partialorder %v565_v34, 0.0  ;;  %v634_v35 = vmul.f32 0.2, %v565_v34 }
 0x1f8   :  { %v666_v36 = vsel %vm602_vm4, %v565_v34, %v634_v35 }
 0x1f9   :  { %698 = vst.msk [vmem:[%s1175_s2 + $0xe8] sm:$0xff] %vm363_vm3, %v666_v36 }
 0x1fb   :  { %v567_v37 = vpop.f32.mrf.mxu2 }
 0x1fc   :  { %v568_v38 = vadd.f32 %v979_v44, %v567_v37 }
 0x1fe   :  { %vm603_vm5 = vcmp.ge.f32.partialorder %v568_v38, 0.0  ;;  %v635_v39 = vmul.f32 0.2, %v568_v38 }
 0x200   :  { %v667_v40 = vsel %vm603_vm5, %v568_v38, %v635_v39 }
 0x201   :  { %699 = vst.msk [vmem:[%s1175_s2 + $0xf0] sm:$0xff] %vm363_vm3, %v667_v40 }
 0x203   :  { %v570_v41 = vpop.f32.mrf.mxu2 }
 0x204   :  { %v571_v42 = vadd.f32 %v979_v44, %v570_v41 }
 0x206   :  { %vm604_vm6 = vcmp.ge.f32.partialorder %v571_v42, 0.0  ;;  %v636_v26 = vmul.f32 0.2, %v571_v42 }
 0x208   :  { %v668_v43 = vsel %vm604_vm6, %v571_v42, %v636_v26 }
 0x209   :  { %700 = vst.msk [vmem:[%s1175_s2 + $0xf8] sm:$0xff] %vm363_vm3, %v668_v43 }

// kernel: fwd.4
= control target key start
LH: loop header
LB: loop body
LE: loop exit
PB: predicated region body
PF: predicated region fallthrough
CT: control target
= control target key end

     0   :  { %s1874_s18 = smov 0   ;;  %s2512_s0 = inlined_call_operand.vmem [shape: f32[4,16,512], index: 0, kind: input, shape index: {}]   ;;  %s2513_s1 = inlined_call_operand.vmem [shape: f32[4,16,3], index: 1, kind: input, shape index: {}]   ;;  %s2514_s2 = inlined_call_operand.vmem [shape: f32[2,512], index: 2, kind: input, shape index: {}]   ;;  %s2515_s3 = inlined_call_operand.vmem [shape: f32[512,32], index: 3, kind: input, shape index: {}]   ;;  %s2516_s4 = inlined_call_operand.vmem [shape: f32[504,64], index: 4, kind: input, shape index: {}]   ;;  %s2517_s5 = inlined_call_operand.vmem [shape: f32[4,1,32], index: 5, kind: output, shape index: {}]  }
   0x1 LB: > { %s1675_s19 = sadd.s32 4294967295, %s1840_s18   ;;  %p1679_p0 = scmp.ge.s32.totalorder %s1840_s18, 1  ;;  %s1840_s18 = sphi %s1874_s18, %s15_s18  }
   0x2   : > { %p197_p1 = scmp.lt.s32.totalorder %s1840_s18, 5 }
   0x4   : > { %p198_p2 = pnand %p1679_p0, %p197_p1 }
   0x5   : > { %p228_p3 = scmp.lt.s32.totalorder (!%p198_p2), %s1675_s19, 3 }
   0x6   : > { %201 = sbr.rel (%p198_p2) target bundleno = 2548 (0x9f4), region = 40 }
   0xb   : > { %s2519_s19 = smov (!%p228_p3, %s1675_s19), 3  ;;  %v1842_v14 = vmov 512.0   ;;  %v378_v18 = vld [vmem:[%s2515_s3 + $0x78] sm:$0xff]  ;;  %v377_v23 = vld [vmem:[%s2515_s3 + $0x70] sm:$0xff]  ;;  %v376_v55 = vld [vmem:[%s2515_s3 + $0x68] sm:$0xff]  ;;  %vm598_vm1 = vcmask 1042432  }
   0xc   : > { %s1736_s20 = sshll.u32 %s2519_s19, 6  ;;  %1762 = vrcp.f32 %v1842_v14  ;;  %v394_v19 = vld [vmem:[%s2515_s3 + $0xf8] sm:$0xff]  ;;  %429 = vmatpush.msra.mxu0 %v378_v18  ;;  %v393_v24 = vld [vmem:[%s2515_s3 + $0xf0] sm:$0xff]  ;;  %v392_v56 = vld [vmem:[%s2515_s3 + $0xe8] sm:$0xff]  ;;  %vm591_vm8 = vcmask 23552   ;;  %vm523_vm9 = vcmask 261120   ;;  %s240_s10 = scalar_lea.vmem %s2517_s5, %s2519_s19 }
   0xd   : > { %s232_s23 = scalar_lea.vmem %s2512_s0, %s1736_s20  ;;  %v410_v20 = vld [vmem:[%s2515_s3 + $0x178] sm:$0xff]  ;;  %452 = vmatpush.msra.mxu1 %v394_v19  ;;  %v409_v25 = vld [vmem:[%s2515_s3 + $0x170] sm:$0xff]  ;;  %v408_v57 = vld [vmem:[%s2515_s3 + $0x168] sm:$0xff]  ;;  %s1737_s20 = sshll.u32 %s2519_s19, 4 }
   0xe   : > { %v241_v0 = vld [vmem:[%s232_s23] sm:$0xff]  ;;  %v242_v1 = vld [vmem:[%s232_s23 + $0x8] sm:$0xff]  ;;  %v243_v2 = vld [vmem:[%s232_s23 + $0x10] sm:$0xff]  ;;  %475 = vmatpush.msra.mxu2 %v410_v20  ;;  %430 = vmatpush.msra.mxu0 %v377_v23 }
   0xf   : > { %v252_v3 = vadd.f32 %v242_v1, %v241_v0  ;;  %v245_v4 = vld [vmem:[%s232_s23 + $0x20] sm:$0xff]  ;;  %v246_v5 = vld [vmem:[%s232_s23 + $0x28] sm:$0xff]  ;;  %v244_v6 = vld [vmem:[%s232_s23 + $0x18] sm:$0xff]  ;;  %453 = vmatpush.msra.mxu1 %v393_v24 }
  0x10   : > { %v257_v8 = vadd.f32 %v246_v5, %v245_v4  ;;  %v247_v9 = vld [vmem:[%s232_s23 + $0x30] sm:$0xff]  ;;  %v248_v12 = vld [vmem:[%s232_s23 + $0x38] sm:$0xff]  ;;  %476 = vmatpush.msra.mxu2 %v409_v25  ;;  %431 = vmatpush.msra.mxu0 %v376_v55  ;;  %v424_v58 = vld [vmem:[%s2515_s3 + $0x1e8] sm:$0xff]  ;;  %s237_s23 = scalar_lea.vmem %s2513_s1, %s1737_s20 }
  0x11   : > { %v253_v7 = vadd.f32 %v252_v3, %v243_v2  ;;  %v426_v22 = vld [vmem:[%s2515_s3 + $0x1f8] sm:$0xff]  ;;  %v425_v26 = vld [vmem:[%s2515_s3 + $0x1f0] sm:$0xff]  ;;  %454 = vmatpush.msra.mxu1 %v392_v56  ;;  %v375_v59 = vld [vmem:[%s2515_s3 + $0x60] sm:$0xff] }
  0x12   : > { %v258_v11 = vadd.f32 %v257_v8, %v247_v9  ;;  %v1763_v15 = vpop.eup %1762  ;;  %498 = vmatpush.msra.mxu3 %v426_v22  ;;  %477 = vmatpush.msra.mxu2 %v408_v57  ;;  %v391_v60 = vld [vmem:[%s2515_s3 + $0xe0] sm:$0xff]  ;;  %v374_v63 = vld [vmem:[%s2515_s3 + $0x58] sm:$0xff]  ;;  %v373_v3 = vld [vmem:[%s2515_s3 + $0x50] sm:$0xff] }
  0x13   : > { %v254_v10 = vadd.f32 %v253_v7, %v244_v6  ;;  %v263_v16 = vmul.f32 512.0, %v1763_v15  ;;  %vm267_vm0 = vweird.f32 %v1763_v15  ;;  %v407_v61 = vld [vmem:[%s2515_s3 + $0x160] sm:$0xff]  ;;  %432 = vmatpush.msra.mxu0 %v375_v59  ;;  %455 = vmatpush.msra.mxu1 %v391_v60  ;;  %v372_v7 = vld [vmem:[%s2515_s3 + $0x48] sm:$0xff]  ;;  %v418_v18 = vld [vmem:[%s2515_s3 + $0x1b8] sm:$0xff] }
  0x14   : > { %v259_v13 = vadd.f32 %v258_v11, %v248_v12  ;;  %499 = vmatpush.msra.mxu3 %v425_v26  ;;  %v423_v62 = vld [vmem:[%s2515_s3 + $0x1e0] sm:$0xff]  ;;  %478 = vmatpush.msra.mxu2 %v407_v61  ;;  %v388_v8 = vld [vmem:[%s2515_s3 + $0xc8] sm:$0xff]  ;;  %v369_v19 = vld [vmem:[%s2515_s3 + $0x30] sm:$0xff] }
  0x15   : > { %255 = vadd.xlane.f32.xlu0 %v254_v10  ;;  %v264_v17 = vsub.f32 1.0, %v263_v16  ;;  %433 = vmatpush.msra.mxu0 %v374_v63  ;;  %v420_v10 = vld [vmem:[%s2515_s3 + $0x1c8] sm:$0xff]  ;;  %v371_v11 = vld [vmem:[%s2515_s3 + $0x40] sm:$0xff]  ;;  %v386_v16 = vld [vmem:[%s2515_s3 + $0xb8] sm:$0xff] }
  0x16   : > { %500 = vmatpush.msra.mxu3 %v424_v58  ;;  %v419_v14 = vld [vmem:[%s2515_s3 + $0x1c0] sm:$0xff]  ;;  %v385_v20 = vld [vmem:[%s2515_s3 + $0xb0] sm:$0xff]  ;;  %v368_v23 = vld [vmem:[%s2515_s3 + $0x28] sm:$0xff] }
  0x17   : > { %v265_v21 = vmul.f32 %v1763_v15, %v264_v17  ;;  %434 = vmatpush.msra.mxu0 %v373_v3  ;;  %v402_v17 = vld [vmem:[%s2515_s3 + $0x138] sm:$0xff]  ;;  %v417_v22 = vld [vmem:[%s2515_s3 + $0x1b0] sm:$0xff]  ;;  %v384_v24 = vld [vmem:[%s2515_s3 + $0xa8] sm:$0xff] }
  0x18   : > { %501 = vmatpush.msra.mxu3 %v423_v62  ;;  %v400_v25 = vld [vmem:[%s2515_s3 + $0x128] sm:$0xff]  ;;  %v411_v55 = vld [vmem:[%s2515_s3 + $0x180] sm:$0xff]  ;;  %v583_v59 = vld [vmem:[%s2516_s4 + $0x18] sm:$0x7] }
  0x19   : > { %v266_v27 = vadd.f32 %v1763_v15, %v265_v21  ;;  %435 = vmatpush.msra.mxu0 %v372_v7  ;;  %v401_v21 = vld [vmem:[%s2515_s3 + $0x130] sm:$0xff]  ;;  %v416_v26 = vld [vmem:[%s2515_s3 + $0x1a8] sm:$0xff]  ;;  %v249_v3 = vld [vmem:[%s2514_s2] ss:$2 sm:$0xf] }
  0x1a   : > { %v330_v7 = vperm.slane %v249_v3, 0 }
  0x1b   : > { %v1912_v28 = vsel %vm267_vm0, %v1763_v15, %v266_v27  ;;  %436 = vmatpush.msra.mxu0 %v371_v11  ;;  %v370_v15 = vld [vmem:[%s2515_s3 + $0x38] sm:$0xff]  ;;  %v367_v27 = vld [vmem:[%s2515_s3 + $0x20] sm:$0xff] }
  0x1d   : > { %260 = vadd.xlane.f32.xlu0 %v259_v13  ;;  %v403_v13 = vld [vmem:[%s2515_s3 + $0x140] sm:$0xff]  ;;  %437 = vmatpush.msra.mxu0 %v370_v15 }
  0x1f   : > { %438 = vmatpush.msra.mxu0 %v369_v19 }
  0x21   : > { %439 = vmatpush.msra.mxu0 %v368_v23 }
  0x23   : > { %440 = vmatpush.msra.mxu0 %v367_v27 }
  0x88   : > { %v256_v29 = vpop.xlane.xlu0 %255 }
  0x89   : > { %v269_v30 = vmul.f32 %v1912_v28, %v256_v29  ;;  %v383_v29 = vld [vmem:[%s2515_s3 + $0xa0] sm:$0xff] }
  0x8b   : > { %v1915_v31 = vsub.f32 %v241_v0, %v269_v30  ;;  %v1917_v32 = vsub.f32 %v242_v1, %v269_v30  ;;  %v1919_v33 = vsub.f32 %v243_v2, %v269_v30  ;;  %v1921_v34 = vsub.f32 %v244_v6, %v269_v30  ;;  %v390_v0 = vld [vmem:[%s2515_s3 + $0xd8] sm:$0xff]  ;;  %v421_v6 = vld [vmem:[%s2515_s3 + $0x1d0] sm:$0xff]  ;;  %v399_v30 = vld [vmem:[%s2515_s3 + $0x120] sm:$0xff] }
  0x8c   : > { %v406_v1 = vld [vmem:[%s2515_s3 + $0x158] sm:$0xff]  ;;  %456 = vmatpush.msra.mxu1 %v390_v0 }
  0x8d   : > { %v279_v35 = vmul.f32 %v1915_v31, %v1915_v31  ;;  %v280_v36 = vmul.f32 %v1917_v32, %v1917_v32  ;;  %v281_v37 = vmul.f32 %v1919_v33, %v1919_v33  ;;  %v282_v41 = vmul.f32 %v1921_v34, %v1921_v34  ;;  %v422_v2 = vld [vmem:[%s2515_s3 + $0x1d8] sm:$0xff]  ;;  %479 = vmatpush.msra.mxu2 %v406_v1 }
  0x8e   : > { %502 = vmatpush.msra.mxu3 %v422_v2 }
  0x8f   : > { %v287_v38 = vadd.f32 %v280_v36, %v279_v35  ;;  %v415_v35 = vld [vmem:[%s2515_s3 + $0x1a0] sm:$0xff]  ;;  %v366_v36 = vld [vmem:[%s2515_s3 + $0x18] sm:$0xff] }
  0x90   : > { %v261_v39 = vpop.xlane.xlu0 %260  ;;  %503 = vmatpush.msra.mxu3 %v421_v6  ;;  %441 = vmatpush.msra.mxu0 %v366_v36 }
  0x91   : > { %v270_v40 = vmul.f32 %v1912_v28, %v261_v39  ;;  %v288_v42 = vadd.f32 %v287_v38, %v281_v37  ;;  %v382_v37 = vld [vmem:[%s2515_s3 + $0x98] sm:$0xff] }
  0x92   : > { %504 = vmatpush.msra.mxu3 %v420_v10  ;;  %v398_v38 = vld [vmem:[%s2515_s3 + $0x118] sm:$0xff] }
  0x93   : > { %v1932_v43 = vsub.f32 %v245_v4, %v270_v40  ;;  %v1934_v44 = vsub.f32 %v246_v5, %v270_v40  ;;  %v289_v45 = vadd.f32 %v288_v42, %v282_v41  ;;  %v1936_v46 = vsub.f32 %v247_v9, %v270_v40  ;;  %v389_v4 = vld [vmem:[%s2515_s3 + $0xd0] sm:$0xff]  ;;  %v404_v9 = vld [vmem:[%s2515_s3 + $0x148] sm:$0xff]  ;;  %v414_v39 = vld [vmem:[%s2515_s3 + $0x198] sm:$0xff] }
  0x94   : > { %v1938_v47 = vsub.f32 %v248_v12, %v270_v40  ;;  %v405_v5 = vld [vmem:[%s2515_s3 + $0x150] sm:$0xff]  ;;  %457 = vmatpush.msra.mxu1 %v389_v4  ;;  %v387_v12 = vld [vmem:[%s2515_s3 + $0xc0] sm:$0xff]  ;;  %505 = vmatpush.msra.mxu3 %v419_v14 }
  0x95   : > { %290 = vadd.xlane.f32.xlu1 %v289_v45  ;;  %v283_v48 = vmul.f32 %v1932_v43, %v1932_v43  ;;  %v284_v49 = vmul.f32 %v1934_v44, %v1934_v44  ;;  %v285_v50 = vmul.f32 %v1936_v46, %v1936_v46  ;;  %480 = vmatpush.msra.mxu2 %v405_v5  ;;  %v365_v40 = vld [vmem:[%s2515_s3 + $0x10] sm:$0xff]  ;;  %v1684_v5 = vld [vmem:[%s2514_s2 + $0x1] ss:$2 sm:$0xf] }
  0x96   : > { %v286_v52 = vmul.f32 %v1938_v47, %v1938_v47  ;;  %458 = vmatpush.msra.mxu1 %v388_v8  ;;  %506 = vmatpush.msra.mxu3 %v418_v18  ;;  %v381_v41 = vld [vmem:[%s2515_s3 + $0x90] sm:$0xff]  ;;  %v347_v10 = vperm.slane %v1684_v5, 0  ;;  %v348_v11 = vperm.slane %v1684_v5, 1 }
  0x97   : > { %v292_v51 = vadd.f32 %v284_v49, %v283_v48  ;;  %481 = vmatpush.msra.mxu2 %v404_v9  ;;  %v397_v42 = vld [vmem:[%s2515_s3 + $0x110] sm:$0xff]  ;;  %442 = vmatpush.msra.mxu0 %v365_v40  ;;  %v364_v48 = vld [vmem:[%s2515_s3 + $0x8] sm:$0xff]  ;;  %v331_v9 = vperm.slane %v249_v3, 1 }
  0x98   : > { %459 = vmatpush.msra.mxu1 %v387_v12  ;;  %507 = vmatpush.msra.mxu3 %v417_v22  ;;  %v413_v45 = vld [vmem:[%s2515_s3 + $0x190] sm:$0xff]  ;;  %v380_v49 = vld [vmem:[%s2515_s3 + $0x88] sm:$0xff]  ;;  %v332_v12 = vperm.slane %v249_v3, 2 }
  0x99   : > { %v293_v53 = vadd.f32 %v292_v51, %v285_v50  ;;  %482 = vmatpush.msra.mxu2 %v403_v13  ;;  %v396_v50 = vld [vmem:[%s2515_s3 + $0x108] sm:$0xff]  ;;  %443 = vmatpush.msra.mxu0 %v364_v48  ;;  %v333_v13 = vperm.slane %v249_v3, 3 }
  0x9a   : > { %460 = vmatpush.msra.mxu1 %v386_v16  ;;  %508 = vmatpush.msra.mxu3 %v416_v26  ;;  %v412_v51 = vld [vmem:[%s2515_s3 + $0x188] sm:$0xff]  ;;  %v349_v16 = vperm.slane %v1684_v5, 2 }
  0x9b   : > { %v294_v54 = vadd.f32 %v293_v53, %v286_v52  ;;  %483 = vmatpush.msra.mxu2 %v402_v17  ;;  %v363_v52 = vld [vmem:[%s2515_s3] sm:$0xff]  ;;  %v350_v17 = vperm.slane %v1684_v5, 3 }
  0x9c   : > { %461 = vmatpush.msra.mxu1 %v385_v20  ;;  %509 = vmatpush.msra.mxu3 %v415_v35  ;;  %v379_v53 = vld [vmem:[%s2515_s3 + $0x80] sm:$0xff] }
  0x9d   : > { %295 = vadd.xlane.f32.xlu1 %v294_v54  ;;  %484 = vmatpush.msra.mxu2 %v401_v21  ;;  %v395_v54 = vld [vmem:[%s2515_s3 + $0x100] sm:$0xff] }
  0x9e   : > { %462 = vmatpush.msra.mxu1 %v384_v24  ;;  %510 = vmatpush.msra.mxu3 %v414_v39 }
  0x9f   : > { %485 = vmatpush.msra.mxu2 %v400_v25  ;;  %444 = vmatpush.msra.mxu0 %v363_v52 }
  0xa0   : > { %463 = vmatpush.msra.mxu1 %v383_v29  ;;  %511 = vmatpush.msra.mxu3 %v413_v45 }
  0xa1   : > { %486 = vmatpush.msra.mxu2 %v399_v30  ;;  %1685 = vmatpush.msk.msrb.mxu0 %vm598_vm1, %v583_v59 }
  0xa2   : > { %464 = vmatpush.msra.mxu1 %v382_v37  ;;  %512 = vmatpush.msra.mxu3 %v412_v51 }
  0xa3   : > { %487 = vmatpush.msra.mxu2 %v398_v38 }
  0xa4   : > { %465 = vmatpush.msra.mxu1 %v381_v41  ;;  %513 = vmatpush.msra.mxu3 %v411_v55 }
  0xa5   : > { %488 = vmatpush.msra.mxu2 %v397_v42 }
  0xa6   : > { %466 = vmatpush.msra.mxu1 %v380_v49 }
  0xa7   : > { %489 = vmatpush.msra.mxu2 %v396_v50 }
  0xa8   : > { %467 = vmatpush.msra.mxu1 %v379_v53 }
  0xa9   : > { %490 = vmatpush.msra.mxu2 %v395_v54 }
 0x108   : > { %v291_v56 = vpop.xlane.xlu1 %290 }
 0x109   : > { %v297_v57 = vmul.f32 %v291_v56, %v1912_v28 }
 0x10b   : > { %v299_v58 = vadd.f32 1e-05, %v297_v57 }
 0x10d   : > { %1764 = vrsqrt.f32 %v299_v58  ;;  %vm307_vm3 = vweird.f32 %v299_v58 }
 0x110   : > { %v296_v60 = vpop.xlane.xlu1 %295 }
 0x111   : > { %v298_v61 = vmul.f32 %v296_v60, %v1912_v28 }
 0x113   : > { %v1765_v62 = vpop.eup %1764  ;;  %v300_v63 = vadd.f32 1e-05, %v298_v61 }
 0x114   : > { %v302_v0 = vmul.f32 %v1765_v62, %v299_v58  ;;  %vm308_vm2 = vweird.f32 %v1765_v62 }
 0x115   : > { %1766 = vrsqrt.f32 %v300_v63  ;;  %vm309_vm4 = vmor %vm307_vm3, %vm308_vm2  ;;  %vm317_vm6 = vweird.f32 %v300_v63 }
 0x116   : > { %v303_v1 = vmul.f32 %v1765_v62, %v302_v0 }
 0x118   : > { %v304_v2 = vmul.f32 0.5, %v303_v1 }
 0x11a   : > { %v305_v4 = vsub.f32 1.5, %v304_v2 }
 0x11b   : > { %v1767_v6 = vpop.eup %1766 }
 0x11c   : > { %v306_v8 = vmul.f32 %v1765_v62, %v305_v4  ;;  %v312_v28 = vmul.f32 %v1767_v6, %v300_v63  ;;  %vm318_vm5 = vweird.f32 %v1767_v6 }
 0x11d   : > { %vm319_vm7 = vmor %vm317_vm6, %vm318_vm5 }
 0x11e   : > { %v310_v14 = vsel %vm309_vm4, %v1765_v62, %v306_v8  ;;  %v313_v15 = vmul.f32 %v1767_v6, %v312_v28  ;;  %v1749_v62 = vld [vmem:[%s2516_s4 + $0x20] ss:$0 sm:$0xff] }
 0x11f   : > { %v321_v18 = vmul.f32 %v310_v14, %v1915_v31  ;;  %v322_v19 = vmul.f32 %v310_v14, %v1917_v32  ;;  %v323_v20 = vmul.f32 %v310_v14, %v1919_v33  ;;  %v324_v21 = vmul.f32 %v310_v14, %v1921_v34 }
 0x120   : > { %v314_v22 = vmul.f32 0.5, %v313_v15 }
 0x121   : > { %v338_v23 = vmul.f32 %v330_v7, %v321_v18  ;;  %v339_v24 = vmul.f32 %v331_v9, %v322_v19  ;;  %v340_v25 = vmul.f32 %v332_v12, %v323_v20  ;;  %v341_v26 = vmul.f32 %v333_v13, %v324_v21 }
 0x122   : > { %v315_v27 = vsub.f32 1.5, %v314_v22 }
 0x123   : > { %v355_v29 = vadd.f32 %v347_v10, %v338_v23  ;;  %v356_v30 = vadd.f32 %v348_v11, %v339_v24  ;;  %v357_v35 = vadd.f32 %v349_v16, %v340_v25  ;;  %v358_v36 = vadd.f32 %v350_v17, %v341_v26  ;;  %v588_v23 = vld [vmem:[%s2516_s4 + $0x40] sm:$0xff]  ;;  %v587_v24 = vld [vmem:[%s2516_s4 + $0x38] sm:$0xff] }
 0x124   : > { %v316_v37 = vmul.f32 %v1767_v6, %v315_v27  ;;  %724 = vmatpush.msrb.mxu1 %v588_v23  ;;  %v586_v27 = vld [vmem:[%s2516_s4 + $0x30] sm:$0xff] }
 0x125   : > { %445 = vmatmul.f32.vlgmr.msra.gmra.mxu0 %v355_v29  ;;  %468 = vmatmul.f32.vlgmr.msra.gmra.mxu1 %v356_v30 }
 0x126   : > { %v320_v31 = vsel %vm319_vm7, %v1767_v6, %v316_v37  ;;  %491 = vmatmul.f32.vlgmr.msra.gmra.mxu2 %v357_v35  ;;  %514 = vmatmul.f32.vlgmr.msra.gmra.mxu3 %v358_v36  ;;  %v585_v37 = vld [vmem:[%s2516_s4 + $0x28] sm:$0xff] }
 0x127   : > { %v325_v32 = vmul.f32 %v320_v31, %v1932_v43  ;;  %v326_v33 = vmul.f32 %v320_v31, %v1934_v44  ;;  %v327_v34 = vmul.f32 %v320_v31, %v1936_v46  ;;  %v328_v38 = vmul.f32 %v320_v31, %v1938_v47  ;;  %v581_v43 = vld [vmem:[%s237_s23] sm:$0xff]  ;;  %v582_v44 = vld [vmem:[%s237_s23 + $0x8] sm:$0xff]  ;;  %725 = vmatpush.msrb.mxu1 %v587_v24 }
 0x128   : > { %v1748_v46 = vld [vmem:[%s2516_s4] ss:$0 sm:$0xff] }
 0x129   : > { %v342_v39 = vmul.f32 %v330_v7, %v325_v32  ;;  %v343_v40 = vmul.f32 %v331_v9, %v326_v33  ;;  %v344_v41 = vmul.f32 %v332_v12, %v327_v34  ;;  %v345_v42 = vmul.f32 %v333_v13, %v328_v38  ;;  %726 = vmatpush.msrb.mxu1 %v586_v27 }
 0x12b   : > { %v359_v45 = vadd.f32 %v347_v10, %v342_v39  ;;  %v360_v48 = vadd.f32 %v348_v11, %v343_v40  ;;  %v361_v49 = vadd.f32 %v349_v16, %v344_v41  ;;  %v362_v50 = vadd.f32 %v350_v17, %v345_v42  ;;  %727 = vmatpush.msrb.mxu1 %v585_v37 }
 0x12d   : > { %448 = vmatmul.f32.gmra.mxu0 %v359_v45  ;;  %471 = vmatmul.f32.gmra.mxu1 %v360_v48 }
 0x12e   : > { %494 = vmatmul.f32.gmra.mxu2 %v361_v49  ;;  %517 = vmatmul.f32.gmra.mxu3 %v362_v50 }
 0x135   : > { %1686 = vmatmul.msk.f32.vlgmr.msrb.gmra.mxu0 %vm591_vm8, %v581_v43 }
 0x13d   : > { %1687 = vmatmul.msk.f32.gmra.mxu0 %vm591_vm8, %v582_v44 }
 0x1a2   : > { %v446_v47 = vpop.f32.mrf.mxu0  ;;  %v469_v52 = vpop.f32.mrf.mxu1 }
 0x1a3   : > { %v447_v51 = vadd.f32 %v1748_v46, %v446_v47 }
 0x1a5   : > { %v470_v53 = vadd.f32 %v469_v52, %v447_v51 }
 0x1a9   : > { %v492_v54 = vpop.f32.mrf.mxu2  ;;  %v515_v55 = vpop.f32.mrf.mxu3 }
 0x1aa   : > { %v493_v56 = vadd.f32 %v492_v54, %v470_v53  ;;  %v449_v57 = vpop.f32.mrf.mxu0  ;;  %v472_v61 = vpop.f32.mrf.mxu1 }
 0x1ab   : > { %v450_v59 = vadd.f32 %v1748_v46, %v449_v57 }
 0x1ac   : > { %v2142_v58 = vadd.f32 %v515_v55, %v493_v56 }
 0x1ad   : > { %v473_v63 = vadd.f32 %v472_v61, %v450_v59 }
 0x1ae   : > { %v524_v60 = vsel %vm523_vm9, %v2142_v58, 0.0 }
 0x1af   : > { %525 = vadd.xlane.f32.xlu2 %v524_v60 }
 0x1b1   : > { %v495_v0 = vpop.f32.mrf.mxu2  ;;  %v518_v3 = vpop.f32.mrf.mxu3 }
 0x1b2   : > { %v496_v1 = vadd.f32 %v495_v0, %v473_v63  ;;  %v619_v2 = vpop.f32.mrf.mxu0 }
 0x1b3   : > { %v2149_v4 = vadd.f32 %v1749_v62, %v619_v2 }
 0x1b4   : > { %v2151_v5 = vadd.f32 %v518_v3, %v496_v1 }
 0x1b5   : > { %v2154_v6 = vmul.f32 0.70710677, %v2149_v4 }
 0x1b6   : > { %v527_v7 = vsel %vm523_vm9, %v2151_v5, 0.0 }
 0x1b7   : > { %528 = vadd.xlane.f32.xlu2 %v527_v7  ;;  %v627_v8 = vand.u32 2147483647, %v2154_v6  ;;  %vm693_vm2 = vcmp.ge.f32.partialorder %v2154_v6, 0.0  ;;  %v699_v7 = vmul.f32 0.5, %v2149_v4  ;;  %v1843_v4 = vmov 32.0  }
 0x1b9   : > { %v629_v28 = vmul.f32 0.3275911, %v627_v8  ;;  %v681_v26 = vsub.f32 0.0, %v627_v8 }
 0x1ba   : > { %v622_v9 = vpop.f32.mrf.mxu0 }
 0x1bb   : > { %v631_v10 = vadd.f32 1.0, %v629_v28  ;;  %v2159_v11 = vadd.f32 %v1749_v62, %v622_v9  ;;  %v683_v32 = vmul.f32 %v681_v26, %v627_v8 }
 0x1bd   : > { %1768 = vrcp.f32 %v631_v10  ;;  %v2162_v12 = vmul.f32 0.70710677, %v2159_v11  ;;  %vm638_vm10 = vweird.f32 %v631_v10  ;;  %v644_v18 = vand.u32 2147483648, %v631_v10 }
 0x1be   : > { %v642_v20 = vand.u32 2147483647, %v631_v10  ;;  %v685_v45 = vmul.f32 1.442695, %v683_v32 }
 0x1bf   : > { %v628_v13 = vand.u32 2147483647, %v2162_v12  ;;  %v645_v22 = vor.u32 1.1754944e-38, %v644_v18  ;;  %vm694_vm3 = vcmp.ge.f32.partialorder %v2162_v12, 0.0  ;;  %v700_v18 = vmul.f32 0.5, %v2159_v11 }
 0x1c0   : > { %vm643_vm13 = vcmp.eq.f32.partialorder %v642_v20, 8.507059e+37 }
 0x1c1   : > { %v630_v14 = vmul.f32 0.3275911, %v628_v13  ;;  %v682_v50 = vsub.f32 0.0, %v628_v13 }
 0x1c3   : > { %v1769_v15 = vpop.eup %1768  ;;  %v632_v17 = vadd.f32 1.0, %v630_v14  ;;  %v684_v52 = vmul.f32 %v682_v50, %v628_v13 }
 0x1c4   : > { %v634_v16 = vmul.f32 %v1769_v15, %v631_v10  ;;  %vm639_vm11 = vweird.f32 %v1769_v15 }
 0x1c5   : > { %1770 = vrcp.f32 %v632_v17  ;;  %vm640_vm12 = vmor %vm638_vm10, %vm639_vm11  ;;  %v659_v33 = vand.u32 2147483648, %v632_v17  ;;  %vm653_vm14 = vweird.f32 %v632_v17  ;;  %v657_v38 = vand.u32 2147483647, %v632_v17 }
 0x1c6   : > { %v635_v19 = vsub.f32 1.0, %v634_v16  ;;  %1772 = vpow2.f32 %v685_v45  ;;  %v687_v57 = vmul.f32 1.442695, %v684_v52  ;;  %v1750_v52 = vld [vmem:[%s2516_s4 + $0x48] ss:$0 sm:$0xff] }
 0x1c7   : > { %v660_v42 = vor.u32 1.1754944e-38, %v659_v33  ;;  %vm658_vm1 = vcmp.eq.f32.partialorder %v657_v38, 8.507059e+37 }
 0x1c8   : > { %v636_v21 = vmul.f32 %v1769_v15, %v635_v19  ;;  %1774 = vpow2.f32 %v687_v57 }
 0x1c9   : > { %1776 = vrcp.f32 %v1843_v4  ;;  %v793_v4 = vld [vmem:[%s2516_s4 + $0x78] sm:$0xff] }
 0x1ca   : > { %v637_v25 = vadd.f32 %v1769_v15, %v636_v21  ;;  %812 = vmatpush.msrb.mxu2 %v793_v4 }
 0x1cb   : > { %v1771_v29 = vpop.eup %1770 }
 0x1cc   : > { %v641_v30 = vsel %vm640_vm12, %v1769_v15, %v637_v25  ;;  %v649_v36 = vmul.f32 %v1771_v29, %v632_v17  ;;  %vm654_vm15 = vweird.f32 %v1771_v29  ;;  %v1773_v59 = vpop.eup %1772 }
 0x1cd   : > { %v646_v35 = vsel %vm643_vm13, %v645_v22, %v641_v30  ;;  %vm655_vm0 = vmor %vm653_vm14, %vm654_vm15 }
 0x1ce   : > { %v663_v31 = vmul.f32 1.0614054, %v646_v35  ;;  %v650_v34 = vsub.f32 1.0, %v649_v36  ;;  %v1775_v28 = vpop.eup %1774 }
 0x1cf   : > { %v1777_v21 = vpop.eup %1776 }
 0x1d0   : > { %v665_v39 = vadd.f32 -1.4531521, %v663_v31  ;;  %v651_v40 = vmul.f32 %v1771_v29, %v650_v34  ;;  %v531_v22 = vmul.f32 32.0, %v1777_v21  ;;  %vm535_vm4 = vweird.f32 %v1777_v21 }
 0x1d2   : > { %v667_v41 = vmul.f32 %v665_v39, %v646_v35  ;;  %v652_v48 = vadd.f32 %v1771_v29, %v651_v40  ;;  %v532_v23 = vsub.f32 1.0, %v531_v22  ;;  %v792_v22 = vld [vmem:[%s2516_s4 + $0x70] sm:$0xff] }
 0x1d3   : > { %813 = vmatpush.msrb.mxu2 %v792_v22 }
 0x1d4   : > { %v669_v49 = vadd.f32 1.4214138, %v667_v41  ;;  %v656_v43 = vsel %vm655_vm0, %v1771_v29, %v652_v48  ;;  %v533_v24 = vmul.f32 %v1777_v21, %v532_v23  ;;  %v877_v23 = vld [vmem:[%s2516_s4 + $0x90] sm:$0xff] }
 0x1d5   : > { %v661_v46 = vsel %vm658_vm1, %v660_v42, %v656_v43 }
 0x1d6   : > { %v671_v44 = vmul.f32 %v669_v49, %v646_v35  ;;  %v664_v47 = vmul.f32 1.0614054, %v661_v46  ;;  %v534_v25 = vadd.f32 %v1777_v21, %v533_v24  ;;  %v791_v24 = vld [vmem:[%s2516_s4 + $0x68] sm:$0xff] }
 0x1d7   : > { %814 = vmatpush.msrb.mxu2 %v791_v24 }
 0x1d8   : > { %v673_v51 = vadd.f32 -0.28449672, %v671_v44  ;;  %v666_v53 = vadd.f32 -1.4531521, %v664_v47  ;;  %v2183_v26 = vsel %vm535_vm4, %v1777_v21, %v534_v25  ;;  %v1751_v44 = vld [vmem:[%s2516_s4 + $0x8] ss:$0 sm:$0xff] }
 0x1d9   : > { %v878_v21 = vld [vmem:[%s2516_s4 + $0x98] sm:$0xff]  ;;  %v876_v25 = vld [vmem:[%s2516_s4 + $0x88] sm:$0xff] }
 0x1da   : > { %v675_v54 = vmul.f32 %v673_v51, %v646_v35  ;;  %v668_v55 = vmul.f32 %v666_v53, %v661_v46  ;;  %891 = vmatpush.msra.mxu0 %v878_v21 }
 0x1dc   : > { %v677_v56 = vadd.f32 0.2548296, %v675_v54  ;;  %v670_v60 = vadd.f32 1.4214138, %v668_v55  ;;  %v1752_v54 = vld [vmem:[%s2516_s4 + $0x10] ss:$0 sm:$0xff]  ;;  %892 = vmatpush.msra.mxu0 %v877_v23 }
 0x1de   : > { %v679_v61 = vmul.f32 %v677_v56, %v646_v35  ;;  %v672_v62 = vmul.f32 %v670_v60, %v661_v46  ;;  %893 = vmatpush.msra.mxu0 %v876_v25 }
 0x1e0   : > { %v689_v63 = vmul.f32 %v1773_v59, %v679_v61  ;;  %v674_v0 = vadd.f32 -0.28449672, %v672_v62 }
 0x1e2   : > { %v691_v1 = vsub.f32 1.0, %v689_v63  ;;  %v676_v2 = vmul.f32 %v674_v0, %v661_v46 }
 0x1e4   : > { %v695_v3 = vsub.f32 0.0, %v691_v1  ;;  %v678_v8 = vadd.f32 0.2548296, %v676_v2 }
 0x1e6   : > { %v697_v9 = vsel %vm693_vm2, %v691_v1, %v695_v3  ;;  %v680_v13 = vmul.f32 %v678_v8, %v661_v46  ;;  %vm852_vm2 = vcmask 130048  }
 0x1e7   : > { %v701_v10 = vadd.f32 1.0, %v697_v9 }
 0x1e8   : > { %v690_v15 = vmul.f32 %v1775_v28, %v680_v13 }
 0x1e9   : > { %v703_v14 = vmul.f32 %v701_v10, %v699_v7 }
 0x1ea   : > { %v692_v16 = vsub.f32 1.0, %v690_v15 }
 0x1eb   : > { %1688 = vmatmul.msk.f32.vlgmr.msrb.gmra.mxu1 %vm523_vm9, %v703_v14 }
 0x1ec   : > { %v696_v17 = vsub.f32 0.0, %v692_v16 }
 0x1ee   : > { %v698_v6 = vsel %vm694_vm3, %v692_v16, %v696_v17 }
 0x1ef   : > { %v702_v19 = vadd.f32 1.0, %v698_v6 }
 0x1f1   : > { %v704_v20 = vmul.f32 %v702_v19, %v700_v18 }
 0x1f3   : > { %1689 = vmatmul.msk.f32.gmra.mxu1 %vm523_vm9, %v704_v20 }
 0x222   : > { %v526_v27 = vpop.xlane.xlu2 %525 }
 0x223   : > { %v537_v12 = vmul.f32 %v2183_v26, %v526_v27  ;;  %v790_v27 = vld [vmem:[%s2516_s4 + $0x60] sm:$0xff] }
 0x224   : > { %815 = vmatpush.msrb.mxu2 %v790_v27 }
 0x225   : > { %v539_v11 = vsub.f32 %v2142_v58, %v537_v12  ;;  %v875_v12 = vld [vmem:[%s2516_s4 + $0x80] sm:$0xff] }
 0x226   : > { %894 = vmatpush.msra.mxu0 %v875_v12 }
 0x227   : > { %v541_v29 = vmul.f32 %v539_v11, %v539_v11 }
 0x229   : > { %v543_v30 = vsel %vm523_vm9, %v541_v29, 0.0 }
 0x22a   : > { %544 = vadd.xlane.f32.xlu0 %v543_v30  ;;  %v529_v35 = vpop.xlane.xlu2 %528 }
 0x22b   : > { %v538_v36 = vmul.f32 %v2183_v26, %v529_v35  ;;  %v937_v35 = vld [vmem:[%s2516_s4 + $0xb8] sm:$0xff] }
 0x22c   : > { %950 = vmatpush.msra.mxu2 %v937_v35 }
 0x22d   : > { %v540_v37 = vsub.f32 %v2151_v5, %v538_v36  ;;  %v936_v36 = vld [vmem:[%s2516_s4 + $0xb0] sm:$0xff] }
 0x22e   : > { %951 = vmatpush.msra.mxu2 %v936_v36 }
 0x22f   : > { %v542_v31 = vmul.f32 %v540_v37, %v540_v37 }
 0x231   : > { %v546_v32 = vsel %vm523_vm9, %v542_v31, 0.0  ;;  %v1015_v31 = vld [vmem:[%s2516_s4 + $0xd8] sm:$0xff] }
 0x232   : > { %547 = vadd.xlane.f32.xlu1 %v546_v32  ;;  %v1014_v32 = vld [vmem:[%s2516_s4 + $0xd0] sm:$0xff]  ;;  %1028 = vmatpush.msrb.mxu0 %v1015_v31 }
 0x234   : > { %1029 = vmatpush.msrb.mxu0 %v1014_v32 }
 0x268   : > { %v729_v46 = vpop.f32.mrf.mxu1 }
 0x269   : > { %v730_v59 = vadd.f32 %v1750_v52, %v729_v46 }
 0x270   : > { %v732_v2 = vpop.f32.mrf.mxu1 }
 0x271   : > { %v733_v7 = vadd.f32 %v1750_v52, %v732_v2  ;;  %v1071_v2 = vld [vmem:[%s2516_s4 + $0xe8] sm:$0xff] }
 0x29d   : > { %v545_v33 = vpop.xlane.xlu0 %544 }
 0x29e   : > { %v549_v34 = vmul.f32 %v545_v33, %v2183_v26 }
 0x2a0   : > { %v551_v38 = vadd.f32 1e-05, %v549_v34 }
 0x2a2   : > { %1778 = vrsqrt.f32 %v551_v38  ;;  %vm559_vm6 = vweird.f32 %v551_v38 }
 0x2a5   : > { %v548_v39 = vpop.xlane.xlu1 %547 }
 0x2a6   : > { %v550_v58 = vmul.f32 %v548_v39, %v2183_v26  ;;  %v1013_v39 = vld [vmem:[%s2516_s4 + $0xc8] sm:$0xff] }
 0x2a7   : > { %1030 = vmatpush.msrb.mxu0 %v1013_v39 }
 0x2a8   : > { %v1779_v40 = vpop.eup %1778  ;;  %v552_v41 = vadd.f32 1e-05, %v550_v58  ;;  %v1012_v58 = vld [vmem:[%s2516_s4 + $0xc0] sm:$0xff] }
 0x2a9   : > { %v554_v42 = vmul.f32 %v1779_v40, %v551_v38  ;;  %vm560_vm5 = vweird.f32 %v1779_v40  ;;  %v934_v38 = vld [vmem:[%s2516_s4 + $0xa0] sm:$0xff]  ;;  %1031 = vmatpush.msrb.mxu0 %v1012_v58 }
 0x2aa   : > { %1780 = vrsqrt.f32 %v552_v41  ;;  %vm561_vm7 = vmor %vm559_vm6, %vm560_vm5  ;;  %vm569_vm10 = vweird.f32 %v552_v41 }
 0x2ab   : > { %v555_v45 = vmul.f32 %v1779_v40, %v554_v42 }
 0x2ad   : > { %v556_v48 = vmul.f32 0.5, %v555_v45 }
 0x2af   : > { %v557_v49 = vsub.f32 1.5, %v556_v48 }
 0x2b0   : > { %v1781_v5 = vpop.eup %1780 }
 0x2b1   : > { %v558_v50 = vmul.f32 %v1779_v40, %v557_v49  ;;  %v564_v43 = vmul.f32 %v1781_v5, %v552_v41  ;;  %vm570_vm8 = vweird.f32 %v1781_v5 }
 0x2b2   : > { %vm571_vm11 = vmor %vm569_vm10, %vm570_vm8 }
 0x2b3   : > { %v562_v47 = vsel %vm561_vm7, %v1779_v40, %v558_v50  ;;  %v565_v51 = vmul.f32 %v1781_v5, %v564_v43 }
 0x2b4   : > { %v573_v53 = vmul.f32 %v562_v47, %v539_v11 }
 0x2b5   : > { %v566_v55 = vmul.f32 0.5, %v565_v51  ;;  %v1754_v51 = vld [vmem:[%s2516_s4 + $0x58] ss:$0 sm:$0xff] }
 0x2b6   : > { %v576_v56 = vmul.f32 %v1751_v44, %v573_v53 }
 0x2b7   : > { %v567_v57 = vsub.f32 1.5, %v566_v55 }
 0x2b8   : > { %v579_v60 = vadd.f32 %v1752_v54, %v576_v56 }
 0x2b9   : > { %v568_v61 = vmul.f32 %v1781_v5, %v567_v57  ;;  %v1073_v57 = vld [vmem:[%s2516_s4 + $0xf8] sm:$0xff] }
 0x2ba   : > { %v2202_v62 = vadd.f32 %v730_v59, %v579_v60  ;;  %v1151_v59 = vld [vmem:[%s2516_s4 + $0x118] sm:$0xff] }
 0x2bb   : > { %v572_v63 = vsel %vm571_vm11, %v1781_v5, %v568_v61  ;;  %v1072_v61 = vld [vmem:[%s2516_s4 + $0xf0] sm:$0xff] }
 0x2bc   : > { %v574_v0 = vmul.f32 %v572_v63, %v540_v37  ;;  %v739_v1 = vsel %vm523_vm9, %v2202_v62, 0.0  ;;  %v935_v37 = vld [vmem:[%s2516_s4 + $0xa8] sm:$0xff]  ;;  %v1150_v63 = vld [vmem:[%s2516_s4 + $0x110] sm:$0xff] }
 0x2bd   : > { %740 = vadd.xlane.f32.xlu2 %v739_v1  ;;  %952 = vmatpush.msra.mxu2 %v935_v37 }
 0x2be   : > { %v577_v3 = vmul.f32 %v1751_v44, %v574_v0  ;;  %v1753_v44 = vld [vmem:[%s2516_s4 + $0x50] ss:$0 sm:$0xff] }
 0x2bf   : > { %953 = vmatpush.msra.mxu2 %v934_v38 }
 0x2c0   : > { %v580_v8 = vadd.f32 %v1752_v54, %v577_v3  ;;  %v1149_v3 = vld [vmem:[%s2516_s4 + $0x108] sm:$0xff] }
 0x2c2   : > { %v2206_v28 = vadd.f32 %v733_v7, %v580_v8  ;;  %v1070_v8 = vld [vmem:[%s2516_s4 + $0xe0] sm:$0xff] }
 0x2c4   : > { %v742_v9 = vsel %vm523_vm9, %v2206_v28, 0.0 }
 0x2c5   : > { %743 = vadd.xlane.f32.xlu0 %v742_v9  ;;  %v1148_v9 = vld [vmem:[%s2516_s4 + $0x100] sm:$0xff] }
 0x330   : > { %v741_v10 = vpop.xlane.xlu2 %740 }
 0x331   : > { %v745_v13 = vmul.f32 %v741_v10, %v2183_v26 }
 0x333   : > { %v2212_v14 = vsub.f32 %v2202_v62, %v745_v13  ;;  %v1209_v13 = vld [vmem:[%s2516_s4 + $0x138] sm:$0xff] }
 0x335   : > { %v749_v15 = vmul.f32 %v2212_v14, %v2212_v14 }
 0x337   : > { %v751_v16 = vsel %vm523_vm9, %v749_v15, 0.0  ;;  %v1208_v15 = vld [vmem:[%s2516_s4 + $0x130] sm:$0xff] }
 0x338   : > { %752 = vadd.xlane.f32.xlu1 %v751_v16  ;;  %v744_v17 = vpop.xlane.xlu0 %743  ;;  %v1286_v16 = vld [vmem:[%s2516_s4 + $0x150] sm:$0xff] }
 0x339   : > { %v746_v18 = vmul.f32 %v744_v17, %v2183_v26  ;;  %v1207_v17 = vld [vmem:[%s2516_s4 + $0x128] sm:$0xff] }
 0x33b   : > { %v2219_v6 = vsub.f32 %v2206_v28, %v746_v18  ;;  %v1285_v18 = vld [vmem:[%s2516_s4 + $0x148] sm:$0xff] }
 0x33d   : > { %v750_v19 = vmul.f32 %v2219_v6, %v2219_v6 }
 0x33f   : > { %v754_v20 = vsel %vm523_vm9, %v750_v19, 0.0  ;;  %v1206_v19 = vld [vmem:[%s2516_s4 + $0x120] sm:$0xff] }
 0x340   : > { %755 = vadd.xlane.f32.xlu2 %v754_v20 }
 0x3ab   : > { %v753_v11 = vpop.xlane.xlu1 %752 }
 0x3ac   : > { %v757_v29 = vmul.f32 %v753_v11, %v2183_v26 }
 0x3ae   : > { %v759_v30 = vadd.f32 1e-05, %v757_v29 }
 0x3b0   : > { %1782 = vrsqrt.f32 %v759_v30  ;;  %vm767_vm13 = vweird.f32 %v759_v30 }
 0x3b3   : > { %v756_v33 = vpop.xlane.xlu2 %755 }
 0x3b4   : > { %v758_v34 = vmul.f32 %v756_v33, %v2183_v26 }
 0x3b6   : > { %v1783_v40 = vpop.eup %1782  ;;  %v760_v41 = vadd.f32 1e-05, %v758_v34 }
 0x3b7   : > { %v762_v42 = vmul.f32 %v1783_v40, %v759_v30  ;;  %vm768_vm12 = vweird.f32 %v1783_v40 }
 0x3b8   : > { %1784 = vrsqrt.f32 %v760_v41  ;;  %vm769_vm14 = vmor %vm767_vm13, %vm768_vm12  ;;  %vm777_vm0 = vweird.f32 %v760_v41 }
 0x3b9   : > { %v763_v45 = vmul.f32 %v1783_v40, %v762_v42 }
 0x3bb   : > { %v764_v48 = vmul.f32 0.5, %v763_v45 }
 0x3bd   : > { %v765_v49 = vsub.f32 1.5, %v764_v48 }
 0x3be   : > { %v1785_v5 = vpop.eup %1784 }
 0x3bf   : > { %v766_v50 = vmul.f32 %v1783_v40, %v765_v49  ;;  %v772_v43 = vmul.f32 %v1785_v5, %v760_v41  ;;  %vm778_vm15 = vweird.f32 %v1785_v5 }
 0x3c0   : > { %vm779_vm1 = vmor %vm777_vm0, %vm778_vm15 }
 0x3c1   : > { %v770_v46 = vsel %vm769_vm14, %v1783_v40, %v766_v50  ;;  %v773_v47 = vmul.f32 %v1785_v5, %v772_v43 }
 0x3c2   : > { %v781_v52 = vmul.f32 %v770_v46, %v2212_v14  ;;  %v1287_v14 = vld [vmem:[%s2516_s4 + $0x158] sm:$0xff] }
 0x3c3   : > { %v774_v53 = vmul.f32 0.5, %v773_v47 }
 0x3c4   : > { %v784_v54 = vmul.f32 %v1753_v44, %v781_v52 }
 0x3c5   : > { %v775_v55 = vsub.f32 1.5, %v774_v53 }
 0x3c6   : > { %v2281_v56 = vadd.f32 %v1754_v51, %v784_v54 }
 0x3c7   : > { %v776_v60 = vmul.f32 %v1785_v5, %v775_v55 }
 0x3c8   : > { %1690 = vmatmul.msk.f32.vlgmr.msrb.gmra.mxu2 %vm523_vm9, %v2281_v56  ;;  %1696 = vmatmul.msk.f32.vlgmr.msra.gmra.mxu0 %vm523_vm9, %v2281_v56 }
 0x3c9   : > { %v780_v0 = vsel %vm779_vm1, %v1785_v5, %v776_v60  ;;  %1086 = vmatpush.msrb.mxu2 %v1073_v57  ;;  %1164 = vmatpush.msra.mxu0 %v1151_v59 }
 0x3ca   : > { %v782_v1 = vmul.f32 %v780_v0, %v2219_v6  ;;  %v1284_v6 = vld [vmem:[%s2516_s4 + $0x140] sm:$0xff] }
 0x3cb   : > { %1087 = vmatpush.msrb.mxu2 %v1072_v61  ;;  %1165 = vmatpush.msra.mxu0 %v1150_v63 }
 0x3cc   : > { %v785_v7 = vmul.f32 %v1753_v44, %v782_v1 }
 0x3cd   : > { %1088 = vmatpush.msrb.mxu2 %v1071_v2  ;;  %1166 = vmatpush.msra.mxu0 %v1149_v3 }
 0x3ce   : > { %v788_v10 = vadd.f32 %v1754_v51, %v785_v7 }
 0x3cf   : > { %1089 = vmatpush.msrb.mxu2 %v1070_v8  ;;  %1167 = vmatpush.msra.mxu0 %v1148_v9 }
 0x3d0   : > { %1691 = vmatmul.msk.f32.gmra.mxu2 %vm523_vm9, %v788_v10  ;;  %1692 = vmatpush.xpose.msk.msrb.mxu3 %vm523_vm9, %v788_v10 }
 0x3d1   : > { %1697 = vmatmul.msk.f32.gmra.mxu0 %vm523_vm9, %v788_v10 }
 0x3d4   : > { %1693 = vmatpush.xpose.msk.msrb.mxu3 %vm523_vm9, %v2281_v56 }
 0x3d8   : > { %1702 = vmatpush.xpose.msk.msra.mxu3 %vm523_vm9, %v788_v10  ;;  %1700 = vmatmul.msk.f32.vlgmr.msra.gmra.mxu2 %vm523_vm9, %v2281_v56 }
 0x3d9   : > { %1706 = vmatmul.msk.f32.vlgmr.msrb.gmra.mxu0 %vm523_vm9, %v2281_v56  ;;  %1222 = vmatpush.msra.mxu2 %v1209_v13 }
 0x3da   : > { %1300 = vmatpush.msrb.mxu0 %v1287_v14 }
 0x3db   : > { %1223 = vmatpush.msra.mxu2 %v1208_v15 }
 0x3dc   : > { %1703 = vmatpush.xpose.msk.msra.mxu3 %vm523_vm9, %v2281_v56  ;;  %1301 = vmatpush.msrb.mxu0 %v1286_v16 }
 0x3dd   : > { %1224 = vmatpush.msra.mxu2 %v1207_v17 }
 0x3de   : > { %1302 = vmatpush.msrb.mxu0 %v1285_v18 }
 0x3df   : > { %1225 = vmatpush.msra.mxu2 %v1206_v19 }
 0x3e0   : > { %1701 = vmatmul.msk.f32.gmra.mxu2 %vm523_vm9, %v788_v10  ;;  %1303 = vmatpush.msrb.mxu0 %v1284_v6 }
 0x3e1   : > { %1707 = vmatmul.msk.f32.gmra.mxu0 %vm523_vm9, %v788_v10 }
 0x3e8   : > { %1710 = vmatmul.msk.f32.vlgmr.msrb.gmra.mxu2 %vm523_vm9, %v2281_v56 }
 0x3e9   : > { %1716 = vmatmul.msk.f32.vlgmr.msra.gmra.mxu0 %vm523_vm9, %v2281_v56 }
 0x3f0   : > { %1711 = vmatmul.msk.f32.gmra.mxu2 %vm523_vm9, %v788_v10 }
 0x3f1   : > { %1717 = vmatmul.msk.f32.gmra.mxu0 %vm523_vm9, %v788_v10 }
 0x3f8   : > { %1720 = vmatmul.msk.f32.vlgmr.msra.gmra.mxu2 %vm523_vm9, %v2281_v56 }
 0x3f9   : > { %1726 = vmatmul.msk.f32.vlgmr.msrb.gmra.mxu0 %vm523_vm9, %v2281_v56 }
 0x400   : > { %1721 = vmatmul.msk.f32.gmra.mxu2 %vm523_vm9, %v788_v10 }
 0x401   : > { %1727 = vmatmul.msk.f32.gmra.mxu0 %vm523_vm9, %v788_v10 }
 0x445   : > { %v896_v20 = vpop.f32.mrf.mxu0 }
 0x44b   : > { %v817_v4 = vpop.f32.mrf.mxu2 }
 0x44c   : > { %1694 = vmatmul.msk.f32.vlgmr.msrb.gmra.mxu3 %vm523_vm9, %v817_v4 }
 0x44d   : > { %1712 = vmatpush.xpose.msk.msrb.mxu3 %vm523_vm9, %v788_v10 }
 0x44e   : > { %v899_v21 = vpop.f32.mrf.mxu0 }
 0x44f   : > { %922 = vmatpush.msra.mxu1 %v899_v21 }
 0x451   : > { %923 = vmatpush.msra.mxu1 %v896_v20  ;;  %1713 = vmatpush.xpose.msk.msrb.mxu3 %vm523_vm9, %v2281_v56 }
 0x453   : > { %v820_v22 = vpop.f32.mrf.mxu2 }
 0x454   : > { %1695 = vmatmul.msk.f32.gmra.mxu3 %vm523_vm9, %v820_v22 }
 0x456   : > { %v1033_v23 = vpop.f32.mrf.mxu0 }
 0x45b   : > { %v955_v24 = vpop.f32.mrf.mxu2 }
 0x45c   : > { %1704 = vmatmul.msk.f32.vlgmr.msra.gmra.mxu3 %vm523_vm9, %v955_v24 }
 0x45d   : > { %1722 = vmatpush.xpose.msk.msra.mxu3 %vm523_vm9, %v788_v10 }
 0x45e   : > { %v1036_v25 = vpop.f32.mrf.mxu0 }
 0x45f   : > { %1059 = vmatpush.msrb.mxu1 %v1036_v25 }
 0x461   : > { %1060 = vmatpush.msrb.mxu1 %v1033_v23  ;;  %1723 = vmatpush.xpose.msk.msra.mxu3 %vm523_vm9, %v2281_v56 }
 0x463   : > { %v958_v27 = vpop.f32.mrf.mxu2 }
 0x464   : > { %1705 = vmatmul.msk.f32.gmra.mxu3 %vm523_vm9, %v958_v27 }
 0x466   : > { %v1169_v27 = vpop.f32.mrf.mxu0 }
 0x46b   : > { %v1091_v12 = vpop.f32.mrf.mxu2 }
 0x46c   : > { %1714 = vmatmul.msk.f32.vlgmr.msrb.gmra.mxu3 %vm523_vm9, %v1091_v12 }
 0x473   : > { %v1094_v11 = vpop.f32.mrf.mxu2 }
 0x474   : > { %1715 = vmatmul.msk.f32.gmra.mxu3 %vm523_vm9, %v1094_v11  ;;  %v1172_v11 = vpop.f32.mrf.mxu0 }
 0x47b   : > { %v1227_v29 = vpop.f32.mrf.mxu2 }
 0x47c   : > { %1724 = vmatmul.msk.f32.vlgmr.msra.gmra.mxu3 %vm523_vm9, %v1227_v29 }
 0x483   : > { %v1230_v30 = vpop.f32.mrf.mxu2 }
 0x484   : > { %1725 = vmatmul.msk.f32.gmra.mxu3 %vm523_vm9, %v1230_v30 }
 0x4cf   : > { %v846_v35 = vpop.f32.mrf.mxu3 }
 0x4d0   : > { %v853_v36 = vsel %vm852_vm2, %v846_v35, -inf }
 0x4d1   : > { %854 = vmax.xlane.f32.xlu0 %v853_v36 }
 0x4d7   : > { %v849_v37 = vpop.f32.mrf.mxu3 }
 0x4d8   : > { %v856_v31 = vsel %vm852_vm2, %v849_v37, -inf }
 0x4d9   : > { %857 = vmax.xlane.f32.xlu1 %v856_v31 }
 0x4df   : > { %v984_v32 = vpop.f32.mrf.mxu3 }
 0x4e0   : > { %v990_v33 = vsel %vm852_vm2, %v984_v32, -inf }
 0x4e1   : > { %991 = vmax.xlane.f32.xlu2 %v990_v33 }
 0x4e7   : > { %v987_v34 = vpop.f32.mrf.mxu3 }
 0x4e8   : > { %v993_v38 = vsel %vm852_vm2, %v987_v34, -inf }
 0x4e9   : > { %994 = vmax.xlane.f32.xlu0 %v993_v38 }
 0x4ef   : > { %v1120_v39 = vpop.f32.mrf.mxu3 }
 0x4f0   : > { %v1126_v58 = vsel %vm852_vm2, %v1120_v39, -inf }
 0x4f1   : > { %1127 = vmax.xlane.f32.xlu1 %v1126_v58 }
 0x4f7   : > { %v1123_v40 = vpop.f32.mrf.mxu3 }
 0x4f8   : > { %v1129_v41 = vsel %vm852_vm2, %v1123_v40, -inf }
 0x4f9   : > { %1130 = vmax.xlane.f32.xlu2 %v1129_v41 }
 0x4ff   : > { %v1256_v42 = vpop.f32.mrf.mxu3 }
 0x500   : > { %v1262_v45 = vsel %vm852_vm2, %v1256_v42, -inf }
 0x501   : > { %1263 = vmax.xlane.f32.xlu0 %v1262_v45 }
 0x507   : > { %v1259_v48 = vpop.f32.mrf.mxu3 }
 0x508   : > { %v1265_v49 = vsel %vm852_vm2, %v1259_v48, -inf }
 0x509   : > { %1266 = vmax.xlane.f32.xlu2 %v1265_v49 }
 0x544   : > { %v855_v5 = vpop.xlane.xlu0 %854 }
 0x545   : > { %v859_v50 = vsub.f32 %v846_v35, %v855_v5 }
 0x547   : > { %v861_v43 = vmul.f32 1.442695, %v859_v50 }
 0x549   : > { %1786 = vpow2.f32 %v861_v43 }
 0x54c   : > { %v858_v44 = vpop.xlane.xlu1 %857 }
 0x54d   : > { %v860_v46 = vsub.f32 %v849_v37, %v858_v44  ;;  %v1305_v37 = vpop.f32.mrf.mxu0 }
 0x54f   : > { %v1787_v47 = vpop.eup %1786  ;;  %v863_v51 = vmul.f32 1.442695, %v860_v46 }
 0x550   : > { %v865_v52 = vsel %vm852_vm2, %v1787_v47, 0.0 }
 0x551   : > { %1788 = vpow2.f32 %v863_v51  ;;  %866 = vadd.xlane.f32.xlu1 %v865_v52 }
 0x554   : > { %v992_v53 = vpop.xlane.xlu2 %991 }
 0x555   : > { %v996_v54 = vsub.f32 %v984_v32, %v992_v53 }
 0x557   : > { %v1789_v55 = vpop.eup %1788  ;;  %v998_v56 = vmul.f32 1.442695, %v996_v54 }
 0x558   : > { %v868_v57 = vsel %vm852_vm2, %v1789_v55, 0.0 }
 0x559   : > { %1790 = vpow2.f32 %v998_v56  ;;  %869 = vadd.xlane.f32.xlu0 %v868_v57  ;;  %v1755_v57 = vld [vmem:[%s2516_s4 + $0x160] ss:$0 sm:$0xff] }
 0x55c   : > { %v995_v59 = vpop.xlane.xlu0 %994 }
 0x55d   : > { %v997_v60 = vsub.f32 %v987_v34, %v995_v59 }
 0x55f   : > { %v1791_v61 = vpop.eup %1790  ;;  %v1000_v63 = vmul.f32 1.442695, %v997_v60 }
 0x560   : > { %v1002_v0 = vsel %vm852_vm2, %v1791_v61, 0.0 }
 0x561   : > { %1792 = vpow2.f32 %v1000_v63  ;;  %1003 = vadd.xlane.f32.xlu1 %v1002_v0 }
 0x564   : > { %v1128_v1 = vpop.xlane.xlu1 %1127 }
 0x565   : > { %v1132_v2 = vsub.f32 %v1120_v39, %v1128_v1  ;;  %v1308_v39 = vpop.f32.mrf.mxu0 }
 0x567   : > { %v1793_v3 = vpop.eup %1792  ;;  %v1134_v7 = vmul.f32 1.442695, %v1132_v2 }
 0x568   : > { %v1005_v8 = vsel %vm852_vm2, %v1793_v3, 0.0 }
 0x569   : > { %1794 = vpow2.f32 %v1134_v7  ;;  %1006 = vadd.xlane.f32.xlu2 %v1005_v8 }
 0x56c   : > { %v1131_v9 = vpop.xlane.xlu2 %1130 }
 0x56d   : > { %v1133_v10 = vsub.f32 %v1123_v40, %v1131_v9 }
 0x56f   : > { %v1795_v13 = vpop.eup %1794  ;;  %v1136_v14 = vmul.f32 1.442695, %v1133_v10 }
 0x570   : > { %v1138_v15 = vsel %vm852_vm2, %v1795_v13, 0.0 }
 0x571   : > { %1796 = vpow2.f32 %v1136_v14  ;;  %1139 = vadd.xlane.f32.xlu0 %v1138_v15 }
 0x574   : > { %v1264_v16 = vpop.xlane.xlu0 %1263 }
 0x575   : > { %v1268_v17 = vsub.f32 %v1256_v42, %v1264_v16 }
 0x577   : > { %v1797_v18 = vpop.eup %1796  ;;  %v1270_v6 = vmul.f32 1.442695, %v1268_v17 }
 0x578   : > { %v1141_v19 = vsel %vm852_vm2, %v1797_v18, 0.0 }
 0x579   : > { %1798 = vpow2.f32 %v1270_v6  ;;  %1142 = vadd.xlane.f32.xlu1 %v1141_v19 }
 0x57c   : > { %v1267_v20 = vpop.xlane.xlu2 %1266 }
 0x57d   : > { %v1269_v4 = vsub.f32 %v1259_v48, %v1267_v20 }
 0x57f   : > { %v1799_v21 = vpop.eup %1798  ;;  %v1272_v22 = vmul.f32 1.442695, %v1269_v4 }
 0x580   : > { %v1274_v23 = vsel %vm852_vm2, %v1799_v21, 0.0 }
 0x581   : > { %1800 = vpow2.f32 %v1272_v22  ;;  %1275 = vadd.xlane.f32.xlu2 %v1274_v23  ;;  %v1399_v22 = vld [vmem:[%s2516_s4 + $0x190] sm:$0xff]  ;;  %v1398_v23 = vld [vmem:[%s2516_s4 + $0x188] sm:$0xff] }
 0x582   : > { %1420 = vmatpush.msrb.mxu2 %v1399_v22 }
 0x584   : > { %1421 = vmatpush.msrb.mxu2 %v1398_v23 }
 0x587   : > { %v1801_v24 = vpop.eup %1800 }
 0x588   : > { %v1277_v25 = vsel %vm852_vm2, %v1801_v24, 0.0 }
 0x589   : > { %1278 = vadd.xlane.f32.xlu0 %v1277_v25  ;;  %v1396_v25 = vld [vmem:[%s2516_s4 + $0x178] sm:$0xff] }
 0x5c4   : > { %v867_v12 = vpop.xlane.xlu1 %866 }
 0x5c5   : > { %1802 = vrcp.f32 %v867_v12 }
 0x5cb   : > { %v1803_v29 = vpop.eup %1802 }
 0x5cc   : > { %v873_v30 = vmul.f32 %v1803_v29, %v1787_v47  ;;  %v870_v35 = vpop.xlane.xlu0 %869 }
 0x5cd   : > { %1804 = vrcp.f32 %v870_v35 }
 0x5ce   : > { %1698 = vmatmul.msk.f32.vlgmr.msra.gmra.mxu1 %vm852_vm2, %v873_v30 }
 0x5cf   : > { %1195 = vmatpush.msra.mxu1 %v1172_v11 }
 0x5d1   : > { %1196 = vmatpush.msra.mxu1 %v1169_v27 }
 0x5d3   : > { %v1805_v36 = vpop.eup %1804 }
 0x5d4   : > { %v1004_v31 = vpop.xlane.xlu1 %1003  ;;  %v874_v32 = vmul.f32 %v1805_v36, %v1789_v55 }
 0x5d5   : > { %1806 = vrcp.f32 %v1004_v31 }
 0x5d6   : > { %1699 = vmatmul.msk.f32.gmra.mxu1 %vm852_vm2, %v874_v32 }
 0x5db   : > { %v1807_v33 = vpop.eup %1806 }
 0x5dc   : > { %v1010_v34 = vmul.f32 %v1807_v33, %v1791_v61  ;;  %v1007_v38 = vpop.xlane.xlu2 %1006 }
 0x5dd   : > { %1808 = vrcp.f32 %v1007_v38 }
 0x5de   : > { %1708 = vmatmul.msk.f32.vlgmr.msrb.gmra.mxu1 %vm852_vm2, %v1010_v34 }
 0x5df   : > { %1331 = vmatpush.msrb.mxu1 %v1308_v39 }
 0x5e1   : > { %1332 = vmatpush.msrb.mxu1 %v1305_v37 }
 0x5e3   : > { %v1809_v58 = vpop.eup %1808 }
 0x5e4   : > { %v1140_v40 = vpop.xlane.xlu0 %1139  ;;  %v1011_v41 = vmul.f32 %v1809_v58, %v1793_v3  ;;  %v1756_v58 = vld [vmem:[%s2516_s4 + $0x168] ss:$0 sm:$0xff] }
 0x5e5   : > { %1810 = vrcp.f32 %v1140_v40 }
 0x5e6   : > { %1709 = vmatmul.msk.f32.gmra.mxu1 %vm852_vm2, %v1011_v41 }
 0x5eb   : > { %v1811_v42 = vpop.eup %1810 }
 0x5ec   : > { %v1146_v45 = vmul.f32 %v1811_v42, %v1795_v13  ;;  %v1143_v48 = vpop.xlane.xlu1 %1142 }
 0x5ed   : > { %1812 = vrcp.f32 %v1143_v48 }
 0x5ee   : > { %1718 = vmatmul.msk.f32.vlgmr.msra.gmra.mxu1 %vm852_vm2, %v1146_v45  ;;  %v1757_v45 = vld [vmem:[%s2516_s4 + $0x170] ss:$0 sm:$0xff] }
 0x5f3   : > { %v1813_v49 = vpop.eup %1812 }
 0x5f4   : > { %v1276_v5 = vpop.xlane.xlu2 %1275  ;;  %v1147_v50 = vmul.f32 %v1813_v49, %v1797_v18 }
 0x5f5   : > { %1814 = vrcp.f32 %v1276_v5 }
 0x5f6   : > { %1719 = vmatmul.msk.f32.gmra.mxu1 %vm852_vm2, %v1147_v50 }
 0x5fb   : > { %v1815_v43 = vpop.eup %1814 }
 0x5fc   : > { %v1282_v44 = vmul.f32 %v1815_v43, %v1799_v21  ;;  %v1279_v46 = vpop.xlane.xlu0 %1278 }
 0x5fd   : > { %1816 = vrcp.f32 %v1279_v46 }
 0x5fe   : > { %1728 = vmatmul.msk.f32.vlgmr.msrb.gmra.mxu1 %vm852_vm2, %v1282_v44 }
 0x603   : > { %v1817_v47 = vpop.eup %1816 }
 0x604   : > { %v1283_v51 = vmul.f32 %v1817_v47, %v1801_v24  ;;  %v1397_v24 = vld [vmem:[%s2516_s4 + $0x180] sm:$0xff] }
 0x605   : > { %1422 = vmatpush.msrb.mxu2 %v1397_v24 }
 0x606   : > { %1729 = vmatmul.msk.f32.gmra.mxu1 %vm852_vm2, %v1283_v51 }
 0x607   : > { %1423 = vmatpush.msrb.mxu2 %v1396_v25 }
 0x64b   : > { %v925_v52 = vpop.f32.mrf.mxu1 }
 0x64c   : > { %v932_v60 = vadd.f32 %v1755_v57, %v925_v52  ;;  %v1758_v52 = vld [vmem:[%s2516_s4 + $0x198] ss:$0 sm:$0xff] }
 0x653   : > { %v928_v53 = vpop.f32.mrf.mxu1 }
 0x654   : > { %v933_v2 = vadd.f32 %v1755_v57, %v928_v53 }
 0x65b   : > { %v1062_v54 = vpop.f32.mrf.mxu1 }
 0x65c   : > { %v1068_v61 = vadd.f32 %v1062_v54, %v932_v60 }
 0x663   : > { %v1065_v55 = vpop.f32.mrf.mxu1 }
 0x664   : > { %v1069_v7 = vadd.f32 %v1065_v55, %v933_v2 }
 0x66b   : > { %v1198_v56 = vpop.f32.mrf.mxu1 }
 0x66c   : > { %v1204_v63 = vadd.f32 %v1198_v56, %v1068_v61 }
 0x673   : > { %v1201_v59 = vpop.f32.mrf.mxu1 }
 0x674   : > { %v1205_v9 = vadd.f32 %v1201_v59, %v1069_v7  ;;  %v1516_v7 = vld [vmem:[%s2516_s4 + $0x1c8] sm:$0xff] }
 0x67b   : > { %v1334_v0 = vpop.f32.mrf.mxu1 }
 0x67c   : > { %v1340_v1 = vadd.f32 %v1334_v0, %v1204_v63  ;;  %v1518_v63 = vld [vmem:[%s2516_s4 + $0x1d8] sm:$0xff] }
 0x67d   : > { %1536 = vmatpush.msrb.mxu3 %v1518_v63 }
 0x67e   : > { %v2404_v3 = vadd.f32 %v1340_v1, %v2202_v62  ;;  %v1517_v1 = vld [vmem:[%s2516_s4 + $0x1d0] sm:$0xff] }
 0x67f   : > { %1537 = vmatpush.msrb.mxu3 %v1517_v1 }
 0x680   : > { %v1346_v8 = vsel %vm523_vm9, %v2404_v3, 0.0 }
 0x681   : > { %1347 = vadd.xlane.f32.xlu1 %v1346_v8  ;;  %1538 = vmatpush.msrb.mxu3 %v1516_v7 }
 0x683   : > { %v1337_v10 = vpop.f32.mrf.mxu1 }
 0x684   : > { %v1341_v13 = vadd.f32 %v1337_v10, %v1205_v9  ;;  %v1515_v10 = vld [vmem:[%s2516_s4 + $0x1c0] sm:$0xff] }
 0x685   : > { %1539 = vmatpush.msrb.mxu3 %v1515_v10 }
 0x686   : > { %v2409_v14 = vadd.f32 %v1341_v13, %v2206_v28 }
 0x688   : > { %v1349_v15 = vsel %vm523_vm9, %v2409_v14, 0.0 }
 0x689   : > { %1350 = vadd.xlane.f32.xlu2 %v1349_v15 }
 0x6f4   : > { %v1348_v16 = vpop.xlane.xlu1 %1347 }
 0x6f5   : > { %v1352_v17 = vmul.f32 %v1348_v16, %v2183_v26  ;;  %v1514_v16 = vld [vmem:[%s2516_s4 + $0x1b8] sm:$0xff] }
 0x6f6   : > { %1540 = vmatpush.msrb.mxu3 %v1514_v16 }
 0x6f7   : > { %v1354_v62 = vsub.f32 %v2404_v3, %v1352_v17 }
 0x6f9   : > { %v1356_v18 = vmul.f32 %v1354_v62, %v1354_v62 }
 0x6fb   : > { %v1358_v6 = vsel %vm523_vm9, %v1356_v18, 0.0  ;;  %v1513_v18 = vld [vmem:[%s2516_s4 + $0x1b0] sm:$0xff] }
 0x6fc   : > { %1359 = vadd.xlane.f32.xlu0 %v1358_v6  ;;  %v1351_v19 = vpop.xlane.xlu2 %1350  ;;  %1541 = vmatpush.msrb.mxu3 %v1513_v18 }
 0x6fd   : > { %v1353_v20 = vmul.f32 %v1351_v19, %v2183_v26 }
 0x6ff   : > { %v1355_v4 = vsub.f32 %v2409_v14, %v1353_v20  ;;  %v1512_v20 = vld [vmem:[%s2516_s4 + $0x1a8] sm:$0xff] }
 0x700   : > { %1542 = vmatpush.msrb.mxu3 %v1512_v20 }
 0x701   : > { %v1357_v28 = vmul.f32 %v1355_v4, %v1355_v4 }
 0x703   : > { %v1361_v21 = vsel %vm523_vm9, %v1357_v28, 0.0 }
 0x704   : > { %1362 = vadd.xlane.f32.xlu1 %v1361_v21 }
 0x76f   : > { %v1360_v27 = vpop.xlane.xlu0 %1359 }
 0x770   : > { %v1364_v12 = vmul.f32 %v1360_v27, %v2183_v26 }
 0x772   : > { %v1366_v11 = vadd.f32 1e-05, %v1364_v12 }
 0x774   : > { %1818 = vrsqrt.f32 %v1366_v11  ;;  %vm1374_vm4 = vweird.f32 %v1366_v11 }
 0x777   : > { %v1363_v29 = vpop.xlane.xlu1 %1362 }
 0x778   : > { %v1365_v30 = vmul.f32 %v1363_v29, %v2183_v26 }
 0x77a   : > { %v1819_v35 = vpop.eup %1818  ;;  %v1367_v36 = vadd.f32 1e-05, %v1365_v30 }
 0x77b   : > { %v1369_v37 = vmul.f32 %v1819_v35, %v1366_v11  ;;  %vm1375_vm3 = vweird.f32 %v1819_v35 }
 0x77c   : > { %1820 = vrsqrt.f32 %v1367_v36  ;;  %vm1376_vm5 = vmor %vm1374_vm4, %vm1375_vm3  ;;  %vm1384_vm7 = vweird.f32 %v1367_v36  ;;  %vm1521_vm3 = vcmask 523264  }
 0x77d   : > { %v1370_v31 = vmul.f32 %v1819_v35, %v1369_v37 }
 0x77f   : > { %v1371_v32 = vmul.f32 0.5, %v1370_v31 }
 0x781   : > { %v1372_v33 = vsub.f32 1.5, %v1371_v32 }
 0x782   : > { %v1821_v34 = vpop.eup %1820 }
 0x783   : > { %v1373_v38 = vmul.f32 %v1819_v35, %v1372_v33  ;;  %v1379_v39 = vmul.f32 %v1821_v34, %v1367_v36  ;;  %vm1385_vm6 = vweird.f32 %v1821_v34 }
 0x784   : > { %vm1386_vm8 = vmor %vm1384_vm7, %vm1385_vm6 }
 0x785   : > { %v1377_v40 = vsel %vm1376_vm5, %v1819_v35, %v1373_v38  ;;  %v1380_v41 = vmul.f32 %v1821_v34, %v1379_v39 }
 0x786   : > { %v1388_v42 = vmul.f32 %v1377_v40, %v1354_v62 }
 0x787   : > { %v1381_v48 = vmul.f32 0.5, %v1380_v41 }
 0x788   : > { %v1391_v49 = vmul.f32 %v1756_v58, %v1388_v42 }
 0x789   : > { %v1382_v5 = vsub.f32 1.5, %v1381_v48 }
 0x78a   : > { %v1394_v50 = vadd.f32 %v1757_v45, %v1391_v49 }
 0x78b   : > { %v1383_v43 = vmul.f32 %v1821_v34, %v1382_v5 }
 0x78c   : > { %1730 = vmatmul.msk.f32.vlgmr.msrb.gmra.mxu2 %vm523_vm9, %v1394_v50 }
 0x78d   : > { %v1387_v44 = vsel %vm1386_vm8, %v1821_v34, %v1383_v43 }
 0x78e   : > { %v1389_v46 = vmul.f32 %v1387_v44, %v1355_v4  ;;  %v1511_v4 = vld [vmem:[%s2516_s4 + $0x1a0] sm:$0xff] }
 0x78f   : > { %1543 = vmatpush.msrb.mxu3 %v1511_v4 }
 0x790   : > { %v1392_v47 = vmul.f32 %v1756_v58, %v1389_v46 }
 0x792   : > { %v1395_v51 = vadd.f32 %v1757_v45, %v1392_v47 }
 0x794   : > { %1731 = vmatmul.msk.f32.gmra.mxu2 %vm523_vm9, %v1395_v51 }
 0x80f   : > { %v1425_v53 = vpop.f32.mrf.mxu2 }
 0x810   : > { %v2444_v54 = vadd.f32 %v1758_v52, %v1425_v53 }
 0x812   : > { %v2447_v55 = vmul.f32 0.70710677, %v2444_v54  ;;  %v1505_v7 = vmul.f32 0.5, %v2444_v54  ;;  %v1759_v54 = vld [vmem:[%s2516_s4 + $0x1e0] ss:$0 sm:$0xff] }
 0x814   : > { %v1433_v56 = vand.u32 2147483647, %v2447_v55  ;;  %vm1499_vm2 = vcmp.ge.f32.partialorder %v2447_v55, 0.0 }
 0x816   : > { %v1435_v57 = vmul.f32 0.3275911, %v1433_v56  ;;  %v1487_v25 = vsub.f32 0.0, %v1433_v56 }
 0x817   : > { %v1428_v59 = vpop.f32.mrf.mxu2 }
 0x818   : > { %v1437_v60 = vadd.f32 1.0, %v1435_v57  ;;  %v2450_v61 = vadd.f32 %v1758_v52, %v1428_v59  ;;  %v1489_v35 = vmul.f32 %v1487_v25, %v1433_v56 }
 0x81a   : > { %1822 = vrcp.f32 %v1437_v60  ;;  %v2456_v0 = vmul.f32 0.70710677, %v2450_v61  ;;  %v1450_v62 = vand.u32 2147483648, %v1437_v60  ;;  %v1448_v19 = vand.u32 2147483647, %v1437_v60 }
 0x81b   : > { %vm1444_vm11 = vweird.f32 %v1437_v60  ;;  %v1491_v38 = vmul.f32 1.442695, %v1489_v35 }
 0x81c   : > { %v1434_v2 = vand.u32 2147483647, %v2456_v0  ;;  %v1451_v21 = vor.u32 1.1754944e-38, %v1450_v62  ;;  %vm1449_vm13 = vcmp.eq.f32.partialorder %v1448_v19, 8.507059e+37  ;;  %vm1500_vm4 = vcmp.ge.f32.partialorder %v2456_v0, 0.0 }
 0x81d   : > { %v1506_v62 = vmul.f32 0.5, %v2450_v61 }
 0x81e   : > { %v1436_v8 = vmul.f32 0.3275911, %v1434_v2  ;;  %v1488_v40 = vsub.f32 0.0, %v1434_v2 }
 0x820   : > { %v1823_v9 = vpop.eup %1822  ;;  %v1438_v15 = vadd.f32 1.0, %v1436_v8  ;;  %v1490_v5 = vmul.f32 %v1488_v40, %v1434_v2 }
 0x821   : > { %v1440_v13 = vmul.f32 %v1823_v9, %v1437_v60  ;;  %vm1445_vm10 = vweird.f32 %v1823_v9 }
 0x822   : > { %1824 = vrcp.f32 %v1438_v15  ;;  %vm1446_vm12 = vmor %vm1444_vm11, %vm1445_vm10  ;;  %v1465_v30 = vand.u32 2147483648, %v1438_v15  ;;  %v1463_v37 = vand.u32 2147483647, %v1438_v15  ;;  %vm1459_vm15 = vweird.f32 %v1438_v15 }
 0x823   : > { %v1441_v17 = vsub.f32 1.0, %v1440_v13  ;;  %1826 = vpow2.f32 %v1491_v38  ;;  %v1493_v47 = vmul.f32 1.442695, %v1490_v5 }
 0x824   : > { %v1466_v34 = vor.u32 1.1754944e-38, %v1465_v30  ;;  %vm1464_vm1 = vcmp.eq.f32.partialorder %v1463_v37, 8.507059e+37 }
 0x825   : > { %v1442_v6 = vmul.f32 %v1823_v9, %v1441_v17  ;;  %1828 = vpow2.f32 %v1493_v47 }
 0x827   : > { %v1443_v28 = vadd.f32 %v1823_v9, %v1442_v6 }
 0x828   : > { %v1825_v22 = vpop.eup %1824 }
 0x829   : > { %v1447_v23 = vsel %vm1446_vm12, %v1823_v9, %v1443_v28  ;;  %v1455_v27 = vmul.f32 %v1825_v22, %v1438_v15  ;;  %vm1460_vm14 = vweird.f32 %v1825_v22  ;;  %v1827_v51 = vpop.eup %1826  ;;  %vm1614_vm12 = vcmask 253952  }
 0x82a   : > { %v1452_v24 = vsel %vm1449_vm13, %v1451_v21, %v1447_v23  ;;  %vm1461_vm0 = vmor %vm1459_vm15, %vm1460_vm14 }
 0x82b   : > { %v1469_v12 = vmul.f32 1.0614054, %v1452_v24  ;;  %v1456_v11 = vsub.f32 1.0, %v1455_v27  ;;  %v1829_v9 = vpop.eup %1828 }
 0x82d   : > { %v1471_v29 = vadd.f32 -1.4531521, %v1469_v12  ;;  %v1457_v36 = vmul.f32 %v1825_v22, %v1456_v11 }
 0x82f   : > { %v1473_v31 = vmul.f32 %v1471_v29, %v1452_v24  ;;  %v1458_v32 = vadd.f32 %v1825_v22, %v1457_v36 }
 0x831   : > { %v1475_v33 = vadd.f32 1.4214138, %v1473_v31  ;;  %v1462_v39 = vsel %vm1461_vm0, %v1825_v22, %v1458_v32 }
 0x832   : > { %v1467_v41 = vsel %vm1464_vm1, %v1466_v34, %v1462_v39 }
 0x833   : > { %v1477_v58 = vmul.f32 %v1475_v33, %v1452_v24  ;;  %v1470_v42 = vmul.f32 1.0614054, %v1467_v41 }
 0x835   : > { %v1479_v45 = vadd.f32 -0.28449672, %v1477_v58  ;;  %v1472_v48 = vadd.f32 -1.4531521, %v1470_v42 }
 0x837   : > { %v1481_v49 = vmul.f32 %v1479_v45, %v1452_v24  ;;  %v1474_v50 = vmul.f32 %v1472_v48, %v1467_v41 }
 0x839   : > { %v1483_v43 = vadd.f32 0.2548296, %v1481_v49  ;;  %v1476_v44 = vadd.f32 1.4214138, %v1474_v50 }
 0x83b   : > { %v1485_v46 = vmul.f32 %v1483_v43, %v1452_v24  ;;  %v1478_v52 = vmul.f32 %v1476_v44, %v1467_v41  ;;  %v1761_v44 = vld [vmem:[%s2516_s4 + $0x1f0] ss:$0 sm:$0xff] }
 0x83d   : > { %v1495_v53 = vmul.f32 %v1827_v51, %v1485_v46  ;;  %v1480_v56 = vadd.f32 -0.28449672, %v1478_v52 }
 0x83f   : > { %v1497_v57 = vsub.f32 1.0, %v1495_v53  ;;  %v1482_v59 = vmul.f32 %v1480_v56, %v1467_v41 }
 0x841   : > { %v1501_v60 = vsub.f32 0.0, %v1497_v57  ;;  %v1484_v63 = vadd.f32 0.2548296, %v1482_v59 }
 0x843   : > { %v1503_v1 = vsel %vm1499_vm2, %v1497_v57, %v1501_v60  ;;  %v1486_v8 = vmul.f32 %v1484_v63, %v1467_v41 }
 0x844   : > { %v1507_v2 = vadd.f32 1.0, %v1503_v1 }
 0x845   : > { %v1496_v13 = vmul.f32 %v1829_v9, %v1486_v8 }
 0x846   : > { %v1509_v10 = vmul.f32 %v1507_v2, %v1505_v7 }
 0x847   : > { %v1498_v15 = vsub.f32 1.0, %v1496_v13 }
 0x848   : > { %1732 = vmatmul.msk.f32.vlgmr.msrb.gmra.mxu3 %vm1521_vm3, %v1509_v10 }
 0x849   : > { %v1502_v16 = vsub.f32 0.0, %v1498_v15 }
 0x84b   : > { %v1504_v17 = vsel %vm1500_vm4, %v1498_v15, %v1502_v16 }
 0x84c   : > { %v1508_v18 = vadd.f32 1.0, %v1504_v17 }
 0x84e   : > { %v1510_v55 = vmul.f32 %v1508_v18, %v1506_v62 }
 0x850   : > { %1733 = vmatmul.msk.f32.gmra.mxu3 %vm1521_vm3, %v1510_v55 }
 0x8cb   : > { %v1545_v6 = vpop.f32.mrf.mxu3 }
 0x8cc   : > { %v1546_v19 = vadd.f32 %v1759_v54, %v1545_v6 }
 0x8ce   : > { %v1551_v20 = vadd.f32 %v1546_v19, %v2404_v3 }
 0x8d0   : > { %v1555_v4 = vsel %vm523_vm9, %v1551_v20, 0.0 }
 0x8d1   : > { %1556 = vadd.xlane.f32.xlu2 %v1555_v4 }
 0x8d3   : > { %v1548_v28 = vpop.f32.mrf.mxu3 }
 0x8d4   : > { %v1549_v21 = vadd.f32 %v1759_v54, %v1548_v28 }
 0x8d6   : > { %v1552_v0 = vadd.f32 %v1549_v21, %v2409_v14 }
 0x8d8   : > { %v1558_v61 = vsel %vm523_vm9, %v1552_v0, 0.0 }
 0x8d9   : > { %1559 = vadd.xlane.f32.xlu0 %v1558_v61 }
 0x944   : > { %v1557_v22 = vpop.xlane.xlu2 %1556 }
 0x945   : > { %v1561_v23 = vmul.f32 %v1557_v22, %v2183_v26 }
 0x947   : > { %v1563_v24 = vsub.f32 %v1551_v20, %v1561_v23 }
 0x949   : > { %v1565_v25 = vmul.f32 %v1563_v24, %v1563_v24 }
 0x94b   : > { %v1567_v27 = vsel %vm523_vm9, %v1565_v25, 0.0 }
 0x94c   : > { %1568 = vadd.xlane.f32.xlu1 %v1567_v27  ;;  %v1560_v12 = vpop.xlane.xlu0 %1559 }
 0x94d   : > { %v1562_v3 = vmul.f32 %v1560_v12, %v2183_v26 }
 0x94f   : > { %v1564_v11 = vsub.f32 %v1552_v0, %v1562_v3 }
 0x951   : > { %v1566_v29 = vmul.f32 %v1564_v11, %v1564_v11 }
 0x953   : > { %v1570_v30 = vsel %vm523_vm9, %v1566_v29, 0.0 }
 0x954   : > { %1571 = vadd.xlane.f32.xlu2 %v1570_v30 }
 0x9bf   : > { %v1569_v14 = vpop.xlane.xlu1 %1568 }
 0x9c0   : > { %v1573_v35 = vmul.f32 %v1569_v14, %v2183_v26 }
 0x9c2   : > { %v1575_v36 = vadd.f32 1e-05, %v1573_v35 }
 0x9c4   : > { %1830 = vrsqrt.f32 %v1575_v36  ;;  %vm1583_vm6 = vweird.f32 %v1575_v36 }
 0x9c7   : > { %v1572_v37 = vpop.xlane.xlu2 %1571 }
 0x9c8   : > { %v1574_v31 = vmul.f32 %v1572_v37, %v2183_v26  ;;  %v1760_v26 = vld [vmem:[%s2516_s4 + $0x1e8] ss:$0 sm:$0xff] }
 0x9ca   : > { %v1831_v32 = vpop.eup %1830  ;;  %v1576_v34 = vadd.f32 1e-05, %v1574_v31 }
 0x9cb   : > { %v1578_v33 = vmul.f32 %v1831_v32, %v1575_v36  ;;  %vm1584_vm5 = vweird.f32 %v1831_v32 }
 0x9cc   : > { %1832 = vrsqrt.f32 %v1576_v34  ;;  %vm1585_vm7 = vmor %vm1583_vm6, %vm1584_vm5  ;;  %vm1593_vm10 = vweird.f32 %v1576_v34 }
 0x9cd   : > { %v1579_v38 = vmul.f32 %v1831_v32, %v1578_v33 }
 0x9cf   : > { %v1580_v39 = vmul.f32 0.5, %v1579_v38 }
 0x9d1   : > { %v1581_v58 = vsub.f32 1.5, %v1580_v39 }
 0x9d2   : > { %v1833_v40 = vpop.eup %1832 }
 0x9d3   : > { %v1582_v41 = vmul.f32 %v1831_v32, %v1581_v58  ;;  %v1588_v42 = vmul.f32 %v1833_v40, %v1576_v34  ;;  %vm1594_vm8 = vweird.f32 %v1833_v40 }
 0x9d4   : > { %vm1595_vm11 = vmor %vm1593_vm10, %vm1594_vm8 }
 0x9d5   : > { %v1586_v45 = vsel %vm1585_vm7, %v1831_v32, %v1582_v41  ;;  %v1589_v48 = vmul.f32 %v1833_v40, %v1588_v42 }
 0x9d6   : > { %v1597_v5 = vmul.f32 %v1586_v45, %v1563_v24 }
 0x9d7   : > { %v1590_v49 = vmul.f32 0.5, %v1589_v48 }
 0x9d8   : > { %v1600_v46 = vmul.f32 %v1760_v26, %v1597_v5 }
 0x9d9   : > { %v1591_v50 = vsub.f32 1.5, %v1590_v49 }
 0x9da   : > { %v1603_v52 = vadd.f32 %v1761_v44, %v1600_v46 }
 0x9db   : > { %v1592_v43 = vmul.f32 %v1833_v40, %v1591_v50 }
 0x9dc   : > { %v1605_v57 = vsel %vm523_vm9, %v1603_v52, -inf }
 0x9dd   : > { %v1596_v47 = vsel %vm1595_vm11, %v1833_v40, %v1592_v43 }
 0x9de   : > { %v1598_v51 = vmul.f32 %v1596_v47, %v1564_v11 }
 0x9e0   : > { %v1601_v53 = vmul.f32 %v1760_v26, %v1598_v51 }
 0x9e2   : > { %v1604_v56 = vadd.f32 %v1761_v44, %v1601_v53 }
 0x9e4   : > { %v1606_v59 = vsel %vm523_vm9, %v1604_v56, -inf }
 0x9e5   : > { %v1607_v60 = vmax.f32 %v1605_v57, %v1606_v59 }
 0x9e7   : > { %v1608_v63 = vrot.slane %v1607_v60, 4 }
 0x9e9   : > { %v1609_v1 = vmax.f32 %v1607_v60, %v1608_v63 }
 0x9eb   : > { %v1610_v7 = vrot.slane %v1609_v1, 2 }
 0x9ed   : > { %v1611_v2 = vmax.f32 %v1609_v1, %v1610_v7 }
 0x9ef   : > { %v1612_v8 = vrot.slane %v1611_v2, 1 }
 0x9f1   : > { %v1613_v9 = vmax.f32 %v1611_v2, %v1612_v8 }
 0x9f3   : > { %1615 = vst.msk [vmem:[%s240_s10] sm:$0x1] %vm1614_vm12, %v1613_v9 }
 0x9f4 PF: > { %s15_s18 = sadd.s32 1, %s1840_s18  }
 0x9f5   : > { %p12_p4 = scmp.ge.s32.totalorder %s15_s18, 6  }
 0x9f7   :  { %14 = sbr.rel (!%p12_p4) target bundleno = 1 (0x1), region = 74 }

// kernel: fwd.5
= control target key start
LH: loop header
LB: loop body
LE: loop exit
PB: predicated region body
PF: predicated region fallthrough
CT: control target
= control target key end

     0   :  { %vm54_vm0 = vcmask 1042432   ;;  %vm25_vm1 = vcmask 19456   ;;  %v1581_v2 = vmov 4.0   ;;  %vm50_vm3 = vcmask 23552   ;;  %s2657_s4 = inlined_call_operand.vmem [shape: f32[1072,64], index: 4, kind: input, shape index: {}]   ;;  %s2658_s1 = inlined_call_operand.vmem [shape: f32[4,3], index: 1, kind: input, shape index: {}]   ;;  %s2659_s3 = inlined_call_operand.vmem [shape: f32[1280,32], index: 3, kind: input, shape index: {}]   ;;  %s2660_s2 = inlined_call_operand.vmem [shape: f32[4,1280], index: 2, kind: input, shape index: {}]   ;;  %s2661_s0 = inlined_call_operand.vmem [shape: f32[4,1,32], index: 0, kind: input, shape index: {}]   ;;  %s2662_s5 = inlined_call_operand.vmem [shape: f32[1,4,2], index: 5, kind: output, shape index: {}]  }
   0x1   :  { %v42_v0 = vld [vmem:[%s2657_s4] sm:$0x7]  ;;  %1545 = vrcp.f32 %v1581_v2  ;;  %v174_v3 = vld [vmem:[%s2659_s3 + $0x78] sm:$0xff]  ;;  %v173_v5 = vld [vmem:[%s2659_s3 + $0x70] sm:$0xff]  ;;  %vm119_vm9 = vcmask 261120   ;;  %vm621_vm10 = vcmask 519168  }
   0x2   :  { %v24_v1 = vld [vmem:[%s2658_s1] sm:$0xf]  ;;  %1490 = vmatpush.msk.msra.mxu0 %vm54_vm0, %v42_v0  ;;  %354 = vmatpush.msra.mxu2 %v174_v3  ;;  %v190_v6 = vld [vmem:[%s2659_s3 + $0xf8] sm:$0xff]  ;;  %v172_v8 = vld [vmem:[%s2659_s3 + $0x68] sm:$0xff] }
   0x3   :  { %v26_v4 = vsel %vm25_vm1, %v24_v1, 0.0  ;;  %374 = vmatpush.msra.mxu3 %v190_v6  ;;  %v189_v9 = vld [vmem:[%s2659_s3 + $0xf0] sm:$0xff]  ;;  %v171_v10 = vld [vmem:[%s2659_s3 + $0x60] sm:$0xff]  ;;  %v188_v11 = vld [vmem:[%s2659_s3 + $0xe8] sm:$0xff] }
   0x4   :  { %v27_v7 = vrot.slane %v26_v4, 4  ;;  %355 = vmatpush.msra.mxu2 %v173_v5  ;;  %v187_v13 = vld [vmem:[%s2659_s3 + $0xe0] sm:$0xff]  ;;  %v170_v16 = vld [vmem:[%s2659_s3 + $0x58] sm:$0xff]  ;;  %v169_v27 = vld [vmem:[%s2659_s3 + $0x50] sm:$0xff] }
   0x5   :  { %375 = vmatpush.msra.mxu3 %v189_v9  ;;  %v186_v28 = vld [vmem:[%s2659_s3 + $0xd8] sm:$0xff]  ;;  %v168_v29 = vld [vmem:[%s2659_s3 + $0x48] sm:$0xff]  ;;  %v185_v30 = vld [vmem:[%s2659_s3 + $0xd0] sm:$0xff] }
   0x6   :  { %v28_v12 = vadd.f32 %v27_v7, %v26_v4  ;;  %356 = vmatpush.msra.mxu2 %v172_v8  ;;  %v167_v31 = vld [vmem:[%s2659_s3 + $0x40] sm:$0xff]  ;;  %v184_v32 = vld [vmem:[%s2659_s3 + $0xc8] sm:$0xff]  ;;  %v166_v33 = vld [vmem:[%s2659_s3 + $0x38] sm:$0xff] }
   0x7   :  { %v1546_v14 = vpop.eup %1545  ;;  %376 = vmatpush.msra.mxu3 %v188_v11  ;;  %v183_v34 = vld [vmem:[%s2659_s3 + $0xc0] sm:$0xff]  ;;  %v165_v35 = vld [vmem:[%s2659_s3 + $0x30] sm:$0xff]  ;;  %v182_v36 = vld [vmem:[%s2659_s3 + $0xb8] sm:$0xff] }
   0x8   :  { %v29_v15 = vrot.slane %v28_v12, 2  ;;  %v34_v17 = vmul.f32 4.0, %v1546_v14  ;;  %357 = vmatpush.msra.mxu2 %v171_v10  ;;  %vm38_vm2 = vweird.f32 %v1546_v14  ;;  %v206_v37 = vld [vmem:[%s2659_s3 + $0x178] sm:$0xff]  ;;  %v164_v38 = vld [vmem:[%s2659_s3 + $0x28] sm:$0xff]  ;;  %v181_v39 = vld [vmem:[%s2659_s3 + $0xb0] sm:$0xff] }
   0x9   :  { %377 = vmatpush.msra.mxu3 %v187_v13  ;;  %394 = vmatpush.msrb.mxu0 %v206_v37  ;;  %v205_v40 = vld [vmem:[%s2659_s3 + $0x170] sm:$0xff]  ;;  %v163_v41 = vld [vmem:[%s2659_s3 + $0x20] sm:$0xff]  ;;  %v180_v42 = vld [vmem:[%s2659_s3 + $0xa8] sm:$0xff] }
   0xa   :  { %v30_v18 = vadd.f32 %v29_v15, %v28_v12  ;;  %v35_v19 = vsub.f32 1.0, %v34_v17  ;;  %358 = vmatpush.msra.mxu2 %v170_v16  ;;  %v204_v43 = vld [vmem:[%s2659_s3 + $0x168] sm:$0xff]  ;;  %v162_v44 = vld [vmem:[%s2659_s3 + $0x18] sm:$0xff]  ;;  %v179_v45 = vld [vmem:[%s2659_s3 + $0xa0] sm:$0xff] }
   0xb   :  { %378 = vmatpush.msra.mxu3 %v186_v28  ;;  %395 = vmatpush.msrb.mxu0 %v205_v40  ;;  %v203_v46 = vld [vmem:[%s2659_s3 + $0x160] sm:$0xff]  ;;  %v161_v47 = vld [vmem:[%s2659_s3 + $0x10] sm:$0xff]  ;;  %v178_v48 = vld [vmem:[%s2659_s3 + $0x98] sm:$0xff] }
   0xc   :  { %v31_v20 = vrot.slane %v30_v18, 1  ;;  %v36_v21 = vmul.f32 %v1546_v14, %v35_v19  ;;  %359 = vmatpush.msra.mxu2 %v169_v27  ;;  %v202_v49 = vld [vmem:[%s2659_s3 + $0x158] sm:$0xff]  ;;  %v47_v50 = vld [vmem:[%s2657_s4 + $0x28] sm:$0xff]  ;;  %v177_v52 = vld [vmem:[%s2659_s3 + $0x90] sm:$0xff] }
   0xd   :  { %379 = vmatpush.msra.mxu3 %v185_v30  ;;  %396 = vmatpush.msrb.mxu0 %v204_v43  ;;  %v160_v51 = vld [vmem:[%s2659_s3 + $0x8] sm:$0xff]  ;;  %v201_v53 = vld [vmem:[%s2659_s3 + $0x150] sm:$0xff]  ;;  %v46_v54 = vld [vmem:[%s2657_s4 + $0x20] sm:$0xff] }
   0xe   :  { %v32_v22 = vadd.f32 %v31_v20, %v30_v18  ;;  %v37_v23 = vadd.f32 %v1546_v14, %v36_v21  ;;  %360 = vmatpush.msra.mxu2 %v168_v29  ;;  %135 = vmatpush.msra.mxu1 %v47_v50  ;;  %v159_v55 = vld [vmem:[%s2659_s3] sm:$0xff]  ;;  %v176_v56 = vld [vmem:[%s2659_s3 + $0x88] sm:$0xff]  ;;  %v238_v58 = vld [vmem:[%s2659_s3 + $0x278] sm:$0xff] }
   0xf   :  { %380 = vmatpush.msra.mxu3 %v184_v32  ;;  %397 = vmatpush.msrb.mxu0 %v203_v46  ;;  %v200_v57 = vld [vmem:[%s2659_s3 + $0x148] sm:$0xff]  ;;  %v45_v59 = vld [vmem:[%s2657_s4 + $0x18] sm:$0xff]  ;;  %v175_v60 = vld [vmem:[%s2659_s3 + $0x80] sm:$0xff] }
  0x10   :  { %v39_v24 = vsel %vm38_vm2, %v1546_v14, %v37_v23  ;;  %361 = vmatpush.msra.mxu2 %v167_v31  ;;  %136 = vmatpush.msra.mxu1 %v46_v54  ;;  %v199_v61 = vld [vmem:[%s2659_s3 + $0x140] sm:$0xff]  ;;  %v237_v62 = vld [vmem:[%s2659_s3 + $0x270] sm:$0xff]  ;;  %v254_v63 = vld [vmem:[%s2659_s3 + $0x2f8] sm:$0xff]  ;;  %vm692_vm2 = vcmask 523264  }
  0x11   :  { %v40_v25 = vmul.f32 %v39_v24, %v32_v22  ;;  %381 = vmatpush.msra.mxu3 %v183_v34  ;;  %398 = vmatpush.msrb.mxu0 %v202_v49  ;;  %v44_v0 = vld [vmem:[%s2657_s4 + $0x10] sm:$0xff]  ;;  %v222_v2 = vld [vmem:[%s2659_s3 + $0x1f8] sm:$0xff]  ;;  %v236_v3 = vld [vmem:[%s2659_s3 + $0x268] sm:$0xff] }
  0x12   :  { %362 = vmatpush.msra.mxu2 %v166_v33  ;;  %137 = vmatpush.msra.mxu1 %v45_v59  ;;  %v253_v4 = vld [vmem:[%s2659_s3 + $0x2f0] sm:$0xff]  ;;  %v235_v7 = vld [vmem:[%s2659_s3 + $0x260] sm:$0xff]  ;;  %v252_v8 = vld [vmem:[%s2659_s3 + $0x2e8] sm:$0xff] }
  0x13   :  { %v41_v26 = vsub.f32 %v24_v1, %v40_v25  ;;  %382 = vmatpush.msra.mxu3 %v182_v36  ;;  %399 = vmatpush.msrb.mxu0 %v201_v53  ;;  %v198_v1 = vld [vmem:[%s2659_s3 + $0x138] sm:$0xff]  ;;  %v197_v5 = vld [vmem:[%s2659_s3 + $0x130] sm:$0xff]  ;;  %v196_v9 = vld [vmem:[%s2659_s3 + $0x128] sm:$0xff] }
  0x14   :  { %363 = vmatpush.msra.mxu2 %v165_v35  ;;  %138 = vmatpush.msra.mxu1 %v44_v0  ;;  %v221_v6 = vld [vmem:[%s2659_s3 + $0x1f0] sm:$0xff]  ;;  %v1528_v10 = vld [vmem:[%s2657_s4 + $0x8] ss:$0 sm:$0xff]  ;;  %v234_v12 = vld [vmem:[%s2659_s3 + $0x258] sm:$0xff] }
  0x15   :  { %1491 = vmatmul.msk.f32.vlgmr.msra.gmra.mxu0 %vm50_vm3, %v41_v26  ;;  %383 = vmatpush.msra.mxu3 %v181_v39  ;;  %v220_v11 = vld [vmem:[%s2659_s3 + $0x1e8] sm:$0xff]  ;;  %v251_v13 = vld [vmem:[%s2659_s3 + $0x2e0] sm:$0xff]  ;;  %v233_v16 = vld [vmem:[%s2659_s3 + $0x250] sm:$0xff]  ;;  %vm739_vm3 = vcmask 27648  }
  0x16   :  { %364 = vmatpush.msra.mxu2 %v164_v38  ;;  %400 = vmatpush.msrb.mxu0 %v200_v57  ;;  %v195_v14 = vld [vmem:[%s2659_s3 + $0x120] sm:$0xff]  ;;  %v250_v18 = vld [vmem:[%s2659_s3 + $0x2d8] sm:$0xff]  ;;  %v232_v22 = vld [vmem:[%s2659_s3 + $0x248] sm:$0xff] }
  0x17   :  { %384 = vmatpush.msra.mxu3 %v180_v42  ;;  %414 = vmatpush.msrb.mxu1 %v222_v2  ;;  %v219_v15 = vld [vmem:[%s2659_s3 + $0x1e0] sm:$0xff]  ;;  %v194_v19 = vld [vmem:[%s2659_s3 + $0x118] sm:$0xff]  ;;  %v249_v23 = vld [vmem:[%s2659_s3 + $0x2d0] sm:$0xff] }
  0x18   :  { %365 = vmatpush.msra.mxu2 %v163_v41  ;;  %401 = vmatpush.msrb.mxu0 %v199_v61  ;;  %v218_v21 = vld [vmem:[%s2659_s3 + $0x1d8] sm:$0xff]  ;;  %v193_v24 = vld [vmem:[%s2659_s3 + $0x110] sm:$0xff]  ;;  %v231_v27 = vld [vmem:[%s2659_s3 + $0x240] sm:$0xff] }
  0x19   :  { %385 = vmatpush.msra.mxu3 %v179_v45  ;;  %415 = vmatpush.msrb.mxu1 %v221_v6  ;;  %v217_v26 = vld [vmem:[%s2659_s3 + $0x1d0] sm:$0xff]  ;;  %v248_v28 = vld [vmem:[%s2659_s3 + $0x2c8] sm:$0xff]  ;;  %v230_v32 = vld [vmem:[%s2659_s3 + $0x238] sm:$0xff] }
  0x1a   :  { %366 = vmatpush.msra.mxu2 %v162_v44  ;;  %402 = vmatpush.msrb.mxu0 %v198_v1  ;;  %v192_v29 = vld [vmem:[%s2659_s3 + $0x108] sm:$0xff]  ;;  %v247_v33 = vld [vmem:[%s2659_s3 + $0x2c0] sm:$0xff]  ;;  %v229_v37 = vld [vmem:[%s2659_s3 + $0x230] sm:$0xff] }
  0x1b   :  { %386 = vmatpush.msra.mxu3 %v178_v48  ;;  %416 = vmatpush.msrb.mxu1 %v220_v11  ;;  %v216_v31 = vld [vmem:[%s2659_s3 + $0x1c8] sm:$0xff]  ;;  %v191_v34 = vld [vmem:[%s2659_s3 + $0x100] sm:$0xff]  ;;  %v246_v38 = vld [vmem:[%s2659_s3 + $0x2b8] sm:$0xff] }
  0x1c   :  { %367 = vmatpush.msra.mxu2 %v161_v47  ;;  %403 = vmatpush.msrb.mxu0 %v197_v5  ;;  %v215_v36 = vld [vmem:[%s2659_s3 + $0x1c0] sm:$0xff]  ;;  %v270_v39 = vld [vmem:[%s2659_s3 + $0x378] sm:$0xff]  ;;  %v228_v42 = vld [vmem:[%s2659_s3 + $0x228] sm:$0xff] }
  0x1d   :  { %387 = vmatpush.msra.mxu3 %v177_v52  ;;  %417 = vmatpush.msrb.mxu1 %v219_v15  ;;  %v214_v41 = vld [vmem:[%s2659_s3 + $0x1b8] sm:$0xff]  ;;  %v245_v43 = vld [vmem:[%s2659_s3 + $0x2b0] sm:$0xff]  ;;  %v227_v46 = vld [vmem:[%s2659_s3 + $0x220] sm:$0xff] }
  0x1e   :  { %368 = vmatpush.msra.mxu2 %v160_v51  ;;  %404 = vmatpush.msrb.mxu0 %v196_v9  ;;  %v269_v44 = vld [vmem:[%s2659_s3 + $0x370] sm:$0xff]  ;;  %v154_v47 = vld [vmem:[%s2660_s2] sm:$0xff]  ;;  %v244_v48 = vld [vmem:[%s2659_s3 + $0x2a8] sm:$0xff] }
  0x1f   :  { %388 = vmatpush.msra.mxu3 %v176_v56  ;;  %418 = vmatpush.msrb.mxu1 %v218_v21  ;;  %v213_v45 = vld [vmem:[%s2659_s3 + $0x1b0] sm:$0xff]  ;;  %v268_v49 = vld [vmem:[%s2659_s3 + $0x368] sm:$0xff]  ;;  %326 = vst [vmem:[#allocation1] ss:$2 sm:$0xff] %v154_v47  ;;  %v226_v51 = vld [vmem:[%s2659_s3 + $0x218] sm:$0xff] }
  0x20   :  { %369 = vmatpush.msra.mxu2 %v159_v55  ;;  %405 = vmatpush.msrb.mxu0 %v195_v14  ;;  %v212_v50 = vld [vmem:[%s2659_s3 + $0x1a8] sm:$0xff]  ;;  %v243_v52 = vld [vmem:[%s2659_s3 + $0x2a0] sm:$0xff]  ;;  %v225_v55 = vld [vmem:[%s2659_s3 + $0x210] sm:$0xff] }
  0x21   :  { %389 = vmatpush.msra.mxu3 %v175_v60  ;;  %419 = vmatpush.msrb.mxu1 %v217_v26  ;;  %v267_v53 = vld [vmem:[%s2659_s3 + $0x360] sm:$0xff]  ;;  %v242_v56 = vld [vmem:[%s2659_s3 + $0x298] sm:$0xff]  ;;  %v224_v60 = vld [vmem:[%s2659_s3 + $0x208] sm:$0xff] }
  0x22   :  { %434 = vmatpush.msrb.mxu2 %v238_v58  ;;  %406 = vmatpush.msrb.mxu0 %v194_v19  ;;  %v211_v54 = vld [vmem:[%s2659_s3 + $0x1a0] sm:$0xff]  ;;  %v266_v57 = vld [vmem:[%s2659_s3 + $0x358] sm:$0xff]  ;;  %v241_v61 = vld [vmem:[%s2659_s3 + $0x290] sm:$0xff] }
  0x23   :  { %454 = vmatpush.msrb.mxu3 %v254_v63  ;;  %420 = vmatpush.msrb.mxu1 %v216_v31  ;;  %v210_v58 = vld [vmem:[%s2659_s3 + $0x198] sm:$0xff]  ;;  %v265_v0 = vld [vmem:[%s2659_s3 + $0x350] sm:$0xff]  ;;  %v223_v2 = vld [vmem:[%s2659_s3 + $0x200] sm:$0xff] }
  0x24   :  { %435 = vmatpush.msrb.mxu2 %v237_v62  ;;  %407 = vmatpush.msrb.mxu0 %v193_v24  ;;  %v158_v62 = vld [vmem:[%s2660_s2 + $0x20] sm:$0xff]  ;;  %v209_v1 = vld [vmem:[%s2659_s3 + $0x190] sm:$0xff]  ;;  %v240_v6 = vld [vmem:[%s2659_s3 + $0x288] sm:$0xff] }
  0x25   :  { %455 = vmatpush.msrb.mxu3 %v253_v4  ;;  %421 = vmatpush.msrb.mxu1 %v215_v36  ;;  %v208_v9 = vld [vmem:[%s2659_s3 + $0x188] sm:$0xff]  ;;  %v239_v14 = vld [vmem:[%s2659_s3 + $0x280] sm:$0xff]  ;;  %v262_v24 = vld [vmem:[%s2659_s3 + $0x338] sm:$0xff] }
  0x26   :  { %436 = vmatpush.msrb.mxu2 %v236_v3  ;;  %408 = vmatpush.msrb.mxu0 %v192_v29  ;;  %v333_v3 = vld.sshfl [vmem:[#allocation1] sm:$0xff pattern:$0x75316420]  ;;  %v334_v4 = vld.sshfl [vmem:[#allocation1 + $0x8] sm:$0xff pattern:$0x75316420] }
  0x27   :  { %456 = vmatpush.msrb.mxu3 %v252_v8  ;;  %422 = vmatpush.msrb.mxu1 %v214_v41  ;;  %341 = vst [vmem:[#allocation1] ss:$2 sm:$0xff] %v158_v62  ;;  %v263_v15 = vld [vmem:[%s2659_s3 + $0x340] sm:$0xff]  ;;  %v260_v36 = vld [vmem:[%s2659_s3 + $0x328] sm:$0xff]  ;;  %v258_v47 = vld [vmem:[%s2659_s3 + $0x318] sm:$0xff] }
  0x28   :  { %437 = vmatpush.msrb.mxu2 %v235_v7  ;;  %409 = vmatpush.msrb.mxu0 %v191_v34  ;;  %v264_v7 = vld [vmem:[%s2659_s3 + $0x348] sm:$0xff]  ;;  %v299_v34 = vld [vmem:[%s2659_s3 + $0x460] sm:$0xff] }
  0x29   :  { %457 = vmatpush.msrb.mxu3 %v251_v13  ;;  %423 = vmatpush.msrb.mxu1 %v213_v45  ;;  %v302_v13 = vld [vmem:[%s2659_s3 + $0x478] sm:$0xff] }
  0x2a   :  { %438 = vmatpush.msrb.mxu2 %v234_v12  ;;  %474 = vmatpush.msra.mxu0 %v270_v39  ;;  %v298_v39 = vld [vmem:[%s2659_s3 + $0x458] sm:$0xff] }
  0x2b   :  { %458 = vmatpush.msrb.mxu3 %v250_v18  ;;  %424 = vmatpush.msrb.mxu1 %v212_v50  ;;  %v318_v18 = vld [vmem:[%s2659_s3 + $0x4f8] sm:$0xff] }
  0x2c   :  { %439 = vmatpush.msrb.mxu2 %v233_v16  ;;  %475 = vmatpush.msra.mxu0 %v269_v44  ;;  %v155_v16 = vld [vmem:[%s2660_s2 + $0x8] sm:$0xff]  ;;  %v157_v50 = vld [vmem:[%s2660_s2 + $0x18] sm:$0xff] }
  0x2d   :  { %459 = vmatpush.msrb.mxu3 %v249_v23  ;;  %425 = vmatpush.msrb.mxu1 %v211_v54  ;;  %328 = vst [vmem:[#allocation1 + $0x10] ss:$2 sm:$0xff] %v155_v16  ;;  %v207_v23 = vld [vmem:[%s2659_s3 + $0x180] sm:$0xff]  ;;  %v288_v16 = vld [vmem:[%s2659_s3 + $0x408] sm:$0xff] }
  0x2e   :  { %440 = vmatpush.msrb.mxu2 %v232_v22  ;;  %476 = vmatpush.msra.mxu0 %v268_v49  ;;  %v296_v49 = vld [vmem:[%s2659_s3 + $0x448] sm:$0xff]  ;;  %332 = vst [vmem:[#allocation1 + $0x30] ss:$2 sm:$0xff] %v157_v50  ;;  %v20_v50 = vld [vmem:[%s2661_s0] sm:$0x1] }
  0x2f   :  { %460 = vmatpush.msrb.mxu3 %v248_v28  ;;  %426 = vmatpush.msrb.mxu1 %v210_v58  ;;  %v317_v28 = vld [vmem:[%s2659_s3 + $0x4f0] sm:$0xff] }
  0x30   :  { %441 = vmatpush.msrb.mxu2 %v231_v27  ;;  %477 = vmatpush.msra.mxu0 %v267_v53  ;;  %v300_v27 = vld [vmem:[%s2659_s3 + $0x468] sm:$0xff]  ;;  %v257_v53 = vld [vmem:[%s2659_s3 + $0x310] sm:$0xff] }
  0x31   :  { %461 = vmatpush.msrb.mxu3 %v247_v33  ;;  %427 = vmatpush.msrb.mxu1 %v209_v1 }
  0x32   :  { %442 = vmatpush.msrb.mxu2 %v230_v32  ;;  %478 = vmatpush.msra.mxu0 %v266_v57  ;;  %v261_v32 = vld [vmem:[%s2659_s3 + $0x330] sm:$0xff]  ;;  %v256_v57 = vld [vmem:[%s2659_s3 + $0x308] sm:$0xff] }
  0x33   :  { %462 = vmatpush.msrb.mxu3 %v246_v38  ;;  %370 = vmatmul.f32.vlgmr.msra.gmra.mxu2 %v333_v3  ;;  %v292_v3 = vld [vmem:[%s2659_s3 + $0x428] sm:$0xff] }
  0x34   :  { %443 = vmatpush.msrb.mxu2 %v229_v37  ;;  %479 = vmatpush.msra.mxu0 %v265_v0  ;;  %v335_v45 = vld.sshfl [vmem:[#allocation1 + $0x10] sm:$0xff pattern:$0x75316420]  ;;  %v310_v0 = vld [vmem:[%s2659_s3 + $0x4b8] sm:$0xff] }
  0x35   :  { %463 = vmatpush.msrb.mxu3 %v245_v43  ;;  %428 = vmatpush.msrb.mxu1 %v208_v9 }
  0x36   :  { %444 = vmatpush.msrb.mxu2 %v228_v42  ;;  %480 = vmatpush.msra.mxu0 %v264_v7  ;;  %v259_v42 = vld [vmem:[%s2659_s3 + $0x320] sm:$0xff] }
  0x37   :  { %464 = vmatpush.msrb.mxu3 %v244_v48  ;;  %429 = vmatpush.msrb.mxu1 %v207_v23  ;;  %v304_v23 = vld [vmem:[%s2659_s3 + $0x488] sm:$0xff] }
  0x38   :  { %445 = vmatpush.msrb.mxu2 %v227_v46  ;;  %481 = vmatpush.msra.mxu0 %v263_v15  ;;  %v297_v46 = vld [vmem:[%s2659_s3 + $0x450] sm:$0xff] }
  0x39   :  { %465 = vmatpush.msrb.mxu3 %v243_v52  ;;  %410 = vmatmul.f32.vlgmr.msrb.gmra.mxu0 %v335_v45  ;;  %v313_v52 = vld [vmem:[%s2659_s3 + $0x4d0] sm:$0xff]  ;;  %v340_v45 = vld.sshfl [vmem:[#allocation1 + $0x38] sm:$0xff pattern:$0x75316420] }
  0x3a   :  { %446 = vmatpush.msrb.mxu2 %v226_v51  ;;  %390 = vmatmul.f32.vlgmr.msra.gmra.mxu3 %v334_v4  ;;  %v309_v4 = vld [vmem:[%s2659_s3 + $0x4b0] sm:$0xff] }
  0x3b   :  { %466 = vmatpush.msrb.mxu3 %v242_v56  ;;  %482 = vmatpush.msra.mxu0 %v262_v24  ;;  %v312_v56 = vld [vmem:[%s2659_s3 + $0x4c8] sm:$0xff] }
  0x3c   :  { %447 = vmatpush.msrb.mxu2 %v225_v55  ;;  %v295_v55 = vld [vmem:[%s2659_s3 + $0x440] sm:$0xff] }
  0x3d   :  { %467 = vmatpush.msrb.mxu3 %v241_v61  ;;  %483 = vmatpush.msra.mxu0 %v261_v32  ;;  %v255_v61 = vld [vmem:[%s2659_s3 + $0x300] sm:$0xff]  ;;  %v336_v32 = vld.sshfl [vmem:[#allocation1 + $0x18] sm:$0xff pattern:$0x75316420] }
  0x3e   :  { %448 = vmatpush.msrb.mxu2 %v224_v60  ;;  %v311_v60 = vld [vmem:[%s2659_s3 + $0x4c0] sm:$0xff] }
  0x3f   :  { %468 = vmatpush.msrb.mxu3 %v240_v6  ;;  %484 = vmatpush.msra.mxu0 %v260_v36  ;;  %v291_v6 = vld [vmem:[%s2659_s3 + $0x420] sm:$0xff] }
  0x40   :  { %449 = vmatpush.msrb.mxu2 %v223_v2  ;;  %v339_v2 = vld.sshfl [vmem:[#allocation1 + $0x30] sm:$0xff pattern:$0x75316420]  ;;  %v279_v36 = vld [vmem:[%s2659_s3 + $0x3c0] sm:$0xff] }
  0x41   :  { %469 = vmatpush.msrb.mxu3 %v239_v14  ;;  %485 = vmatpush.msra.mxu0 %v259_v42  ;;  %v306_v14 = vld [vmem:[%s2659_s3 + $0x498] sm:$0xff]  ;;  %v273_v42 = vld [vmem:[%s2659_s3 + $0x390] sm:$0xff] }
  0x42   :  { %514 = vmatpush.msra.mxu2 %v302_v13  ;;  %v289_v13 = vld [vmem:[%s2659_s3 + $0x410] sm:$0xff] }
  0x43   :  { %534 = vmatpush.msra.mxu3 %v318_v18  ;;  %486 = vmatpush.msra.mxu0 %v258_v47  ;;  %v555_v47 = vld [vmem:[%s2657_s4 + $0x378] sm:$0xff] }
  0x45   :  { %535 = vmatpush.msra.mxu3 %v317_v28  ;;  %487 = vmatpush.msra.mxu0 %v257_v53  ;;  %v285_v28 = vld [vmem:[%s2659_s3 + $0x3f0] sm:$0xff]  ;;  %v561_v53 = vld [vmem:[%s2657_s4 + $0x3a8] sm:$0xff] }
  0x47   :  { %488 = vmatpush.msra.mxu0 %v256_v57 }
  0x49   :  { %489 = vmatpush.msra.mxu0 %v255_v61  ;;  %v1530_v61 = vld [vmem:[%s2657_s4 + $0x38] ss:$0 sm:$0xff] }
  0x4a   :  { %490 = vmatmul.f32.vlgmr.msra.gmra.mxu0 %v339_v2 }
  0x4b   :  { %577 = vmatpush.msrb.mxu0 %v561_v53  ;;  %v1532_v53 = vld [vmem:[%s2657_s4 + $0x48] ss:$0 sm:$0xff] }
  0x92   :  { %v75_v17 = vpop.f32.mrf.mxu0 }
  0x93   :  { %v1814_v20 = vadd.f32 %v1528_v10, %v75_v17  ;;  %v156_v10 = vld [vmem:[%s2660_s2 + $0x10] sm:$0xff] }
  0x94   :  { %330 = vst [vmem:[#allocation1 + $0x20] ss:$2 sm:$0xff] %v156_v10  ;;  %v301_v17 = vld [vmem:[%s2659_s3 + $0x470] sm:$0xff]  ;;  %v290_v10 = vld [vmem:[%s2659_s3 + $0x418] sm:$0xff] }
  0x95   :  { %v1829_v25 = vmul.f32 0.70710677, %v1814_v20  ;;  %515 = vmatpush.msra.mxu2 %v301_v17  ;;  %v305_v17 = vld [vmem:[%s2659_s3 + $0x490] sm:$0xff]  ;;  %v115_v21 = vmul.f32 0.5, %v1814_v20 }
  0x96   :  { %v343_v20 = vld.sshfl [vmem:[#allocation1 + $0x8] sm:$0xff pattern:$0x75316420] }
  0x97   :  { %v1844_v30 = vand.u32 2147483647, %v1829_v25  ;;  %516 = vmatpush.msra.mxu2 %v300_v27  ;;  %vm112_vm8 = vcmp.ge.f32.partialorder %v1829_v25, 0.0  ;;  %v342_v25 = vld.sshfl [vmem:[#allocation1] sm:$0xff pattern:$0x75316420] }
  0x98   :  { %v303_v27 = vld [vmem:[%s2659_s3 + $0x480] sm:$0xff] }
  0x99   :  { %v80_v35 = vmul.f32 0.3275911, %v1844_v30  ;;  %v106_v29 = vsub.f32 0.0, %v1844_v30  ;;  %517 = vmatpush.msra.mxu2 %v299_v34  ;;  %v281_v34 = vld [vmem:[%s2659_s3 + $0x3d0] sm:$0xff] }
  0x9b   :  { %v1871_v40 = vadd.f32 1.0, %v80_v35  ;;  %v316_v35 = vld [vmem:[%s2659_s3 + $0x4e8] sm:$0xff]  ;;  %v337_v37 = vld.sshfl [vmem:[#allocation1 + $0x20] sm:$0xff pattern:$0x75316420]  ;;  %v107_v41 = vmul.f32 %v106_v29, %v1844_v30  ;;  %518 = vmatpush.msra.mxu2 %v298_v39  ;;  %v314_v30 = vld [vmem:[%s2659_s3 + $0x4d8] sm:$0xff] }
  0x9c   :  { %536 = vmatpush.msra.mxu3 %v316_v35  ;;  %v338_v43 = vld.sshfl [vmem:[#allocation1 + $0x28] sm:$0xff pattern:$0x75316420]  ;;  %450 = vmatmul.f32.vlgmr.msrb.gmra.mxu2 %v337_v37  ;;  %v278_v37 = vld [vmem:[%s2659_s3 + $0x3b8] sm:$0xff] }
  0x9d   :  { %1547 = vrcp.f32 %v1871_v40  ;;  %v93_v8 = vand.u32 2147483648, %v1871_v40  ;;  %v91_v12 = vand.u32 2147483647, %v1871_v40  ;;  %vm87_vm5 = vweird.f32 %v1871_v40  ;;  %470 = vmatmul.f32.vlgmr.msrb.gmra.mxu3 %v338_v43  ;;  %519 = vmatpush.msra.mxu2 %v297_v46  ;;  %v284_v29 = vld [vmem:[%s2659_s3 + $0x3e8] sm:$0xff] }
  0x9e   :  { %v108_v51 = vmul.f32 1.442695, %v107_v41  ;;  %v280_v35 = vld [vmem:[%s2659_s3 + $0x3c8] sm:$0xff]  ;;  %v274_v41 = vld [vmem:[%s2659_s3 + $0x398] sm:$0xff] }
  0x9f   :  { %v94_v22 = vor.u32 1.1754944e-38, %v93_v8  ;;  %vm92_vm7 = vcmp.eq.f32.partialorder %v91_v12, 8.507059e+37  ;;  %520 = vmatpush.msra.mxu2 %v296_v49  ;;  %v308_v8 = vld [vmem:[%s2659_s3 + $0x4a8] sm:$0xff]  ;;  %v1529_v49 = vld [vmem:[%s2657_s4 + $0x30] ss:$0 sm:$0xff] }
  0xa0   :  { %1549 = vpow2.f32 %v108_v51  ;;  %v276_v39 = vld [vmem:[%s2659_s3 + $0x3a8] sm:$0xff] }
  0xa1   :  { %521 = vmatpush.msra.mxu2 %v295_v55  ;;  %v272_v43 = vld [vmem:[%s2659_s3 + $0x388] sm:$0xff]  ;;  %v22_v55 = vld [vmem:[%s2661_s0 + $0x2] sm:$0x1] }
  0xa2   :  { %v557_v46 = vld [vmem:[%s2657_s4 + $0x388] sm:$0xff] }
  0xa3   :  { %v1928_v59 = vpop.eup %1547 }
  0xa4   :  { %v83_v63 = vmul.f32 %v1928_v59, %v1871_v40  ;;  %vm88_vm4 = vweird.f32 %v1928_v59  ;;  %v315_v40 = vld [vmem:[%s2659_s3 + $0x4e0] sm:$0xff] }
  0xa5   :  { %vm1988_vm6 = vmor %vm87_vm5, %vm88_vm4  ;;  %537 = vmatpush.msra.mxu3 %v315_v40  ;;  %v275_v40 = vld [vmem:[%s2659_s3 + $0x3a0] sm:$0xff]  ;;  %vm783_vm4 = vcmask 1043456   ;;  %vm779_vm5 = vcmask 31744  }
  0xa6   :  { %v84_v5 = vsub.f32 1.0, %v83_v63  ;;  %v293_v63 = vld [vmem:[%s2659_s3 + $0x430] sm:$0xff]  ;;  %v1550_v7 = vpop.eup %1549 }
  0xa7   :  { %538 = vmatpush.msra.mxu3 %v314_v30  ;;  %v556_v30 = vld [vmem:[%s2657_s4 + $0x380] sm:$0xff] }
  0xa8   :  { %v85_v11 = vmul.f32 %v1928_v59, %v84_v5 }
  0xa9   :  { %539 = vmatpush.msra.mxu3 %v313_v52 }
  0xaa   :  { %v86_v19 = vadd.f32 %v1928_v59, %v85_v11  ;;  %v307_v11 = vld [vmem:[%s2659_s3 + $0x4a0] sm:$0xff] }
  0xab   :  { %540 = vmatpush.msra.mxu3 %v312_v56  ;;  %v23_v56 = vld [vmem:[%s2661_s0 + $0x3] sm:$0x1] }
  0xac   :  { %v90_v26 = vsel %vm1988_vm6, %v1928_v59, %v86_v19  ;;  %v294_v59 = vld [vmem:[%s2659_s3 + $0x438] sm:$0xff]  ;;  %v287_v19 = vld [vmem:[%s2659_s3 + $0x400] sm:$0xff] }
  0xad   :  { %v2008_v31 = vsel %vm92_vm7, %v94_v22, %v90_v26  ;;  %522 = vmatpush.msra.mxu2 %v294_v59  ;;  %541 = vmatpush.msra.mxu3 %v311_v60  ;;  %v286_v26 = vld [vmem:[%s2659_s3 + $0x3f8] sm:$0xff] }
  0xae   :  { %v97_v33 = vmul.f32 1.0614054, %v2008_v31 }
  0xaf   :  { %523 = vmatpush.msra.mxu2 %v293_v63  ;;  %542 = vmatpush.msra.mxu3 %v310_v0 }
  0xb0   :  { %v98_v38 = vadd.f32 -1.4531521, %v97_v33  ;;  %v282_v33 = vld [vmem:[%s2659_s3 + $0x3d8] sm:$0xff] }
  0xb1   :  { %524 = vmatpush.msra.mxu2 %v292_v3  ;;  %543 = vmatpush.msra.mxu3 %v309_v4  ;;  %v559_v3 = vld [vmem:[%s2657_s4 + $0x398] sm:$0xff]  ;;  %v558_v4 = vld [vmem:[%s2657_s4 + $0x390] sm:$0xff] }
  0xb2   :  { %v99_v44 = vmul.f32 %v98_v38, %v2008_v31  ;;  %v277_v38 = vld [vmem:[%s2659_s3 + $0x3b0] sm:$0xff] }
  0xb3   :  { %525 = vmatpush.msra.mxu2 %v291_v6  ;;  %544 = vmatpush.msra.mxu3 %v308_v8 }
  0xb4   :  { %v100_v48 = vadd.f32 1.4214138, %v99_v44  ;;  %v271_v44 = vld [vmem:[%s2659_s3 + $0x380] sm:$0xff] }
  0xb5   :  { %526 = vmatpush.msra.mxu2 %v290_v10  ;;  %545 = vmatpush.msra.mxu3 %v307_v11 }
  0xb6   :  { %v101_v54 = vmul.f32 %v100_v48, %v2008_v31  ;;  %v554_v48 = vld [vmem:[%s2657_s4 + $0x370] sm:$0xff]  ;;  %v371_v63 = vpop.f32.mrf.mxu2  ;;  %v411_v8 = vpop.f32.mrf.mxu0 }
  0xb7   :  { %527 = vmatpush.msra.mxu2 %v289_v13  ;;  %546 = vmatpush.msra.mxu3 %v306_v14 }
  0xb8   :  { %v102_v58 = vadd.f32 -0.28449672, %v101_v54  ;;  %v21_v54 = vld [vmem:[%s2661_s0 + $0x1] sm:$0x1] }
  0xb9   :  { %528 = vmatpush.msra.mxu2 %v288_v16  ;;  %547 = vmatpush.msra.mxu3 %v305_v17 }
  0xba   :  { %v103_v62 = vmul.f32 %v102_v58, %v2008_v31 }
  0xbb   :  { %529 = vmatpush.msra.mxu2 %v287_v19  ;;  %548 = vmatpush.msra.mxu3 %v304_v23 }
  0xbc   :  { %v104_v1 = vadd.f32 0.2548296, %v103_v62  ;;  %530 = vmatmul.f32.vlgmr.msra.gmra.mxu2 %v342_v25  ;;  %v560_v62 = vld [vmem:[%s2657_s4 + $0x3a0] sm:$0xff] }
  0xbd   :  { %549 = vmatpush.msra.mxu3 %v303_v27  ;;  %578 = vmatpush.msrb.mxu0 %v560_v62  ;;  %v391_v6 = vpop.f32.mrf.mxu3  ;;  %v816_v62 = vld [vmem:[%s2657_s4 + $0x118] sm:$0xff] }
  0xbe   :  { %v105_v5 = vmul.f32 %v104_v1, %v2008_v31  ;;  %550 = vmatmul.f32.vlgmr.msra.gmra.mxu3 %v343_v20  ;;  %v283_v31 = vld [vmem:[%s2659_s3 + $0x3e0] sm:$0xff]  ;;  %825 = vmatpush.msrb.mxu2 %v816_v62  ;;  %v878_v62 = vld [vmem:[%s2657_s4 + $0x158] sm:$0xff] }
  0xbf   :  { %579 = vmatpush.msrb.mxu0 %v559_v3  ;;  %v812_v3 = vld [vmem:[%s2657_s4 + $0xf8] sm:$0xff] }
  0xc0   :  { %v110_v9 = vmul.f32 %v1550_v7, %v105_v5  ;;  %v372_v5 = vadd.f32 %v1530_v61, %v371_v63  ;;  %v815_v63 = vld [vmem:[%s2657_s4 + $0x110] sm:$0xff] }
  0xc1   :  { %580 = vmatpush.msrb.mxu0 %v558_v4  ;;  %826 = vmatpush.msrb.mxu2 %v815_v63  ;;  %v690_v4 = vld [vmem:[%s2657_s4 + $0x90] sm:$0xff] }
  0xc2   :  { %v111_v12 = vsub.f32 1.0, %v110_v9  ;;  %v392_v7 = vadd.f32 %v391_v6, %v372_v5  ;;  %v811_v5 = vld [vmem:[%s2657_s4 + $0xf0] sm:$0xff]  ;;  %v689_v6 = vld [vmem:[%s2657_s4 + $0x88] sm:$0xff] }
  0xc3   :  { %v877_v63 = vld [vmem:[%s2657_s4 + $0x150] sm:$0xff] }
  0xc4   :  { %v113_v15 = vsub.f32 0.0, %v111_v12  ;;  %v412_v9 = vadd.f32 %v411_v8, %v392_v7  ;;  %v810_v7 = vld [vmem:[%s2657_s4 + $0xe8] sm:$0xff]  ;;  %v688_v8 = vld [vmem:[%s2657_s4 + $0x80] sm:$0xff] }
  0xc6   :  { %v114_v18 = vsel %vm112_vm8, %v111_v12, %v113_v15 }
  0xc7   :  { %v116_v22 = vadd.f32 1.0, %v114_v18  ;;  %v491_v17 = vpop.f32.mrf.mxu0 }
  0xc9   :  { %v117_v24 = vmul.f32 %v116_v22, %v115_v21 }
  0xcb   :  { %1492 = vmatmul.msk.f32.vlgmr.msra.gmra.mxu1 %vm119_vm9, %v117_v24 }
  0xcc   :  { %494 = vmatpush.msra.mxu1 %v286_v26 }
  0xce   :  { %495 = vmatpush.msra.mxu1 %v285_v28 }
  0xd0   :  { %496 = vmatpush.msra.mxu1 %v284_v29  ;;  %v1582_v29 = vmov 64.0  }
  0xd1   :  { %1551 = vrcp.f32 %v1582_v29 }
  0xd2   :  { %497 = vmatpush.msra.mxu1 %v283_v31 }
  0xd3   :  { %430 = vmatmul.f32.vlgmr.msrb.gmra.mxu1 %v336_v32 }
  0xd4   :  { %498 = vmatpush.msra.mxu1 %v282_v33 }
  0xd6   :  { %499 = vmatpush.msra.mxu1 %v281_v34 }
  0xd7   :  { %v1552_v31 = vpop.eup %1551 }
  0xd8   :  { %500 = vmatpush.msra.mxu1 %v280_v35  ;;  %v626_v32 = vmul.f32 64.0, %v1552_v31  ;;  %vm630_vm11 = vweird.f32 %v1552_v31 }
  0xda   :  { %501 = vmatpush.msra.mxu1 %v279_v36  ;;  %v627_v33 = vsub.f32 1.0, %v626_v32  ;;  %v1533_v32 = vld [vmem:[%s2657_s4 + $0x50] ss:$0 sm:$0xff] }
  0xdc   :  { %502 = vmatpush.msra.mxu1 %v278_v37  ;;  %v628_v34 = vmul.f32 %v1552_v31, %v627_v33 }
  0xde   :  { %503 = vmatpush.msra.mxu1 %v277_v38  ;;  %v629_v35 = vadd.f32 %v1552_v31, %v628_v34  ;;  %v1534_v34 = vld [vmem:[%s2657_s4 + $0x58] ss:$0 sm:$0xff] }
  0xe0   :  { %504 = vmatpush.msra.mxu1 %v276_v39  ;;  %v2217_v36 = vsel %vm630_vm11, %v1552_v31, %v629_v35 }
  0xe2   :  { %505 = vmatpush.msra.mxu1 %v275_v40 }
  0xe4   :  { %506 = vmatpush.msra.mxu1 %v274_v41 }
  0xe6   :  { %507 = vmatpush.msra.mxu1 %v273_v42 }
  0xe8   :  { %508 = vmatpush.msra.mxu1 %v272_v43 }
  0xea   :  { %509 = vmatpush.msra.mxu1 %v271_v44 }
  0xeb   :  { %510 = vmatmul.f32.vlgmr.msra.gmra.mxu1 %v340_v45 }
  0xec   :  { %611 = vmatpush.msrb.mxu1 %v557_v46 }
  0xee   :  { %612 = vmatpush.msrb.mxu1 %v556_v30 }
  0xf0   :  { %613 = vmatpush.msrb.mxu1 %v555_v47 }
  0xf2   :  { %614 = vmatpush.msrb.mxu1 %v554_v48 }
 0x11f   :  { %v451_v13 = vpop.f32.mrf.mxu2 }
 0x120   :  { %v471_v15 = vpop.f32.mrf.mxu3 }
 0x13f   :  { %v531_v21 = vpop.f32.mrf.mxu2 }
 0x141   :  { %v551_v23 = vpop.f32.mrf.mxu3 }
 0x148   :  { %v140_v51 = vpop.f32.mrf.mxu1 }
 0x149   :  { %v141_v52 = vadd.f32 %v1529_v49, %v140_v51 }
 0x14b   :  { %v144_v57 = vrot.slane %v141_v52, 1  ;;  %v145_v58 = vrot.slane %v141_v52, 2  ;;  %v146_v59 = vrot.slane %v141_v52, 3  ;;  %v150_v60 = vadd.f32 %v141_v52, %v20_v50  ;;  %v1531_v50 = vld [vmem:[%s2657_s4 + $0x40] ss:$0 sm:$0xff] }
 0x14d   :  { %v151_v0 = vadd.f32 %v144_v57, %v21_v54  ;;  %v152_v1 = vadd.f32 %v145_v58, %v22_v55  ;;  %v153_v2 = vadd.f32 %v146_v59, %v23_v56  ;;  %589 = vst [vmem:[#allocation1] ss:$9 sm:$0xff] %v150_v60 }
 0x14f   :  { %591 = vst [vmem:[#allocation1 + $0x1] ss:$9 sm:$0xff] %v151_v0 }
 0x150   :  { %593 = vst [vmem:[#allocation1 + $0x2] ss:$9 sm:$0xff] %v152_v1  ;;  %v431_v10 = vpop.f32.mrf.mxu1 }
 0x151   :  { %595 = vst [vmem:[#allocation1 + $0x3] ss:$9 sm:$0xff] %v153_v2  ;;  %v432_v12 = vadd.f32 %v431_v10, %v412_v9  ;;  %v809_v9 = vld [vmem:[%s2657_s4 + $0xe0] sm:$0xff]  ;;  %v687_v10 = vld [vmem:[%s2657_s4 + $0x78] sm:$0xff] }
 0x153   :  { %v452_v14 = vadd.f32 %v451_v13, %v432_v12  ;;  %v686_v12 = vld [vmem:[%s2657_s4 + $0x70] sm:$0xff] }
 0x154   :  { %v994_v13 = vld [vmem:[%s2657_s4 + $0x1d0] sm:$0xff] }
 0x155   :  { %v472_v16 = vadd.f32 %v471_v15, %v452_v14  ;;  %v685_v14 = vld [vmem:[%s2657_s4 + $0x68] sm:$0xff] }
 0x156   :  { %v993_v15 = vld [vmem:[%s2657_s4 + $0x1c8] sm:$0xff] }
 0x157   :  { %v492_v18 = vadd.f32 %v491_v17, %v472_v16  ;;  %v684_v16 = vld [vmem:[%s2657_s4 + $0x60] sm:$0xff] }
 0x158   :  { %v596_v11 = vld [vmem:[#allocation1] sm:$0xff] }
 0x159   :  { %1494 = vmatmul.msk.f32.vlgmr.msrb.gmra.mxu1 %vm119_vm9, %v596_v11  ;;  %1384 = vst [vmem:[#allocation1] ss:$9 sm:$0xff] %v150_v60  ;;  %v995_v11 = vld [vmem:[%s2657_s4 + $0x1d8] sm:$0xff]  ;;  %v992_v17 = vld [vmem:[%s2657_s4 + $0x1c0] sm:$0xff] }
 0x15a   :  { %1386 = vst [vmem:[#allocation1 + $0x1] ss:$9 sm:$0xff] %v151_v0  ;;  %v814_v0 = vld [vmem:[%s2657_s4 + $0x108] sm:$0xff] }
 0x15b   :  { %1388 = vst [vmem:[#allocation1 + $0x2] ss:$9 sm:$0xff] %v152_v1  ;;  %827 = vmatpush.msrb.mxu2 %v814_v0  ;;  %v813_v1 = vld [vmem:[%s2657_s4 + $0x100] sm:$0xff]  ;;  %v876_v0 = vld [vmem:[%s2657_s4 + $0x148] sm:$0xff] }
 0x15c   :  { %1390 = vst [vmem:[#allocation1 + $0x3] ss:$9 sm:$0xff] %v153_v2  ;;  %v691_v2 = vld [vmem:[%s2657_s4 + $0x98] sm:$0xff] }
 0x15d   :  { %828 = vmatpush.msrb.mxu2 %v813_v1  ;;  %704 = vmatpush.msra.mxu0 %v691_v2 }
 0x15f   :  { %829 = vmatpush.msrb.mxu2 %v812_v3  ;;  %705 = vmatpush.msra.mxu0 %v690_v4 }
 0x161   :  { %830 = vmatpush.msrb.mxu2 %v811_v5  ;;  %706 = vmatpush.msra.mxu0 %v689_v6 }
 0x163   :  { %831 = vmatpush.msrb.mxu2 %v810_v7  ;;  %707 = vmatpush.msra.mxu0 %v688_v8 }
 0x165   :  { %832 = vmatpush.msrb.mxu2 %v809_v9  ;;  %708 = vmatpush.msra.mxu0 %v687_v10 }
 0x167   :  { %1004 = vmatpush.msra.mxu2 %v995_v11  ;;  %709 = vmatpush.msra.mxu0 %v686_v12  ;;  %v875_v11 = vld [vmem:[%s2657_s4 + $0x140] sm:$0xff]  ;;  %v874_v12 = vld [vmem:[%s2657_s4 + $0x138] sm:$0xff] }
 0x168   :  { %v511_v19 = vpop.f32.mrf.mxu1 }
 0x169   :  { %v512_v22 = vadd.f32 %v511_v19, %v492_v18  ;;  %1005 = vmatpush.msra.mxu2 %v994_v13  ;;  %710 = vmatpush.msra.mxu0 %v685_v14  ;;  %v991_v18 = vld [vmem:[%s2657_s4 + $0x1b8] sm:$0xff]  ;;  %v873_v13 = vld [vmem:[%s2657_s4 + $0x130] sm:$0xff]  ;;  %v872_v14 = vld [vmem:[%s2657_s4 + $0x128] sm:$0xff] }
 0x16b   :  { %v532_v25 = vadd.f32 %v531_v21, %v512_v22  ;;  %1006 = vmatpush.msra.mxu2 %v993_v15  ;;  %711 = vmatpush.msra.mxu0 %v684_v16  ;;  %v990_v22 = vld [vmem:[%s2657_s4 + $0x1b0] sm:$0xff]  ;;  %v871_v15 = vld [vmem:[%s2657_s4 + $0x120] sm:$0xff] }
 0x16d   :  { %v552_v24 = vadd.f32 %v551_v23, %v532_v25  ;;  %1007 = vmatpush.msra.mxu2 %v992_v17  ;;  %v989_v25 = vld [vmem:[%s2657_s4 + $0x1a8] sm:$0xff] }
 0x16f   :  { %1493 = vmatmul.msk.f32.vlgmr.msrb.gmra.mxu0 %vm119_vm9, %v552_v24  ;;  %1008 = vmatpush.msra.mxu2 %v991_v18  ;;  %v988_v24 = vld [vmem:[%s2657_s4 + $0x1a0] sm:$0xff] }
 0x171   :  { %1009 = vmatpush.msra.mxu2 %v990_v22 }
 0x173   :  { %1010 = vmatpush.msra.mxu2 %v989_v25 }
 0x175   :  { %1011 = vmatpush.msra.mxu2 %v988_v24 }
 0x1d6   :  { %v616_v26 = vpop.f32.mrf.mxu1 }
 0x1ec   :  { %v582_v27 = vpop.f32.mrf.mxu0 }
 0x1ed   :  { %v617_v20 = vadd.f32 %v616_v26, %v582_v27 }
 0x1ef   :  { %v622_v28 = vsel %vm621_vm10, %v617_v20, 0.0 }
 0x1f0   :  { %623 = vadd.xlane.f32.xlu0 %v622_v28 }
 0x263   :  { %v624_v37 = vpop.xlane.xlu0 %623 }
 0x264   :  { %v632_v38 = vmul.f32 %v2217_v36, %v624_v37 }
 0x266   :  { %v633_v39 = vsub.f32 %v617_v20, %v632_v38 }
 0x268   :  { %v634_v40 = vmul.f32 %v633_v39, %v633_v39 }
 0x26a   :  { %v635_v41 = vsel %vm621_vm10, %v634_v40, 0.0  ;;  %v758_v40 = vld [vmem:[%s2657_s4 + $0xd8] sm:$0xff] }
 0x26b   :  { %636 = vadd.xlane.f32.xlu0 %v635_v41  ;;  %v932_v41 = vld [vmem:[%s2657_s4 + $0x190] sm:$0xff] }
 0x2de   :  { %v637_v42 = vpop.xlane.xlu0 %636 }
 0x2df   :  { %v638_v43 = vmul.f32 %v637_v42, %v2217_v36  ;;  %v757_v42 = vld [vmem:[%s2657_s4 + $0xd0] sm:$0xff] }
 0x2e1   :  { %v639_v44 = vadd.f32 1e-05, %v638_v43  ;;  %v931_v43 = vld [vmem:[%s2657_s4 + $0x188] sm:$0xff] }
 0x2e3   :  { %1553 = vrsqrt.f32 %v639_v44  ;;  %vm646_vm13 = vweird.f32 %v639_v44 }
 0x2e9   :  { %v1554_v45 = vpop.eup %1553 }
 0x2ea   :  { %v641_v46 = vmul.f32 %v1554_v45, %v639_v44  ;;  %vm647_vm12 = vweird.f32 %v1554_v45  ;;  %v756_v44 = vld [vmem:[%s2657_s4 + $0xc8] sm:$0xff] }
 0x2eb   :  { %vm648_vm14 = vmor %vm646_vm13, %vm647_vm12 }
 0x2ec   :  { %v642_v30 = vmul.f32 %v1554_v45, %v641_v46  ;;  %v755_v46 = vld [vmem:[%s2657_s4 + $0xc0] sm:$0xff] }
 0x2ee   :  { %v643_v47 = vmul.f32 0.5, %v642_v30  ;;  %v929_v30 = vld [vmem:[%s2657_s4 + $0x178] sm:$0xff] }
 0x2f0   :  { %v644_v48 = vsub.f32 1.5, %v643_v47  ;;  %v754_v47 = vld [vmem:[%s2657_s4 + $0xb8] sm:$0xff] }
 0x2f2   :  { %v645_v49 = vmul.f32 %v1554_v45, %v644_v48  ;;  %v928_v48 = vld [vmem:[%s2657_s4 + $0x170] sm:$0xff] }
 0x2f4   :  { %v649_v51 = vsel %vm648_vm14, %v1554_v45, %v645_v49  ;;  %v930_v45 = vld [vmem:[%s2657_s4 + $0x180] sm:$0xff]  ;;  %v753_v49 = vld [vmem:[%s2657_s4 + $0xb0] sm:$0xff] }
 0x2f5   :  { %v650_v52 = vmul.f32 %v649_v51, %v633_v39  ;;  %v933_v39 = vld [vmem:[%s2657_s4 + $0x198] sm:$0xff]  ;;  %v752_v51 = vld [vmem:[%s2657_s4 + $0xa8] sm:$0xff] }
 0x2f7   :  { %v652_v54 = vmul.f32 %v1531_v50, %v650_v52  ;;  %v927_v50 = vld [vmem:[%s2657_s4 + $0x168] sm:$0xff]  ;;  %v926_v52 = vld [vmem:[%s2657_s4 + $0x160] sm:$0xff] }
 0x2f9   :  { %v2228_v55 = vadd.f32 %v1532_v53, %v652_v54  ;;  %v751_v53 = vld [vmem:[%s2657_s4 + $0xa0] sm:$0xff] }
 0x2fb   :  { %v657_v56 = vsel %vm621_vm10, %v2228_v55, 0.0 }
 0x2fc   :  { %658 = vadd.xlane.f32.xlu1 %v657_v56 }
 0x36f   :  { %v659_v57 = vpop.xlane.xlu1 %658 }
 0x370   :  { %v660_v58 = vmul.f32 %v659_v57, %v2217_v36 }
 0x372   :  { %v2234_v59 = vsub.f32 %v2228_v55, %v660_v58 }
 0x374   :  { %v662_v60 = vmul.f32 %v2234_v59, %v2234_v59 }
 0x376   :  { %v663_v61 = vsel %vm621_vm10, %v662_v60, 0.0 }
 0x377   :  { %664 = vadd.xlane.f32.xlu1 %v663_v61 }
 0x3ea   :  { %v665_v19 = vpop.xlane.xlu1 %664 }
 0x3eb   :  { %v666_v21 = vmul.f32 %v665_v19, %v2217_v36 }
 0x3ed   :  { %v667_v23 = vadd.f32 1e-05, %v666_v21 }
 0x3ef   :  { %1555 = vrsqrt.f32 %v667_v23  ;;  %vm674_vm0 = vweird.f32 %v667_v23 }
 0x3f5   :  { %v1556_v26 = vpop.eup %1555 }
 0x3f6   :  { %v669_v27 = vmul.f32 %v1556_v26, %v667_v23  ;;  %vm675_vm15 = vweird.f32 %v1556_v26 }
 0x3f7   :  { %vm676_vm1 = vmor %vm674_vm0, %vm675_vm15 }
 0x3f8   :  { %v670_v20 = vmul.f32 %v1556_v26, %v669_v27  ;;  %v1049_v27 = vld [vmem:[%s2657_s4 + $0x210] sm:$0xff] }
 0x3fa   :  { %v671_v28 = vmul.f32 0.5, %v670_v20  ;;  %v1048_v20 = vld [vmem:[%s2657_s4 + $0x208] sm:$0xff] }
 0x3fc   :  { %v672_v29 = vsub.f32 1.5, %v671_v28  ;;  %v1047_v28 = vld [vmem:[%s2657_s4 + $0x200] sm:$0xff] }
 0x3fe   :  { %v673_v31 = vmul.f32 %v1556_v26, %v672_v29  ;;  %v1046_v29 = vld [vmem:[%s2657_s4 + $0x1f8] sm:$0xff] }
 0x400   :  { %v677_v33 = vsel %vm676_vm1, %v1556_v26, %v673_v31  ;;  %v1050_v26 = vld [vmem:[%s2657_s4 + $0x218] sm:$0xff] }
 0x401   :  { %v678_v35 = vmul.f32 %v677_v33, %v2234_v59  ;;  %v1044_v33 = vld [vmem:[%s2657_s4 + $0x1e8] sm:$0xff] }
 0x403   :  { %v680_v37 = vmul.f32 %v1533_v32, %v678_v35  ;;  %v1045_v32 = vld [vmem:[%s2657_s4 + $0x1f0] sm:$0xff]  ;;  %v1535_v35 = vld [vmem:[%s2657_s4 + $0x260] ss:$0 sm:$0xff] }
 0x405   :  { %v2319_v38 = vadd.f32 %v1534_v34, %v680_v37  ;;  %v1043_v34 = vld [vmem:[%s2657_s4 + $0x1e0] sm:$0xff] }
 0x407   :  { %1495 = vmatmul.msk.f32.vlgmr.msra.gmra.mxu0 %vm692_vm2, %v2319_v38  ;;  %1496 = vmatpush.xpose.msk.msra.mxu1 %vm692_vm2, %v2319_v38 }
 0x408   :  { %1501 = vmatmul.msk.f32.vlgmr.msrb.gmra.mxu2 %vm692_vm2, %v2319_v38  ;;  %1502 = vmatpush.xpose.msk.msrb.mxu3 %vm692_vm2, %v2319_v38 }
 0x40b   :  { %767 = vmatpush.msrb.mxu1 %v758_v40 }
 0x40c   :  { %942 = vmatpush.msra.mxu3 %v933_v39 }
 0x40d   :  { %768 = vmatpush.msrb.mxu1 %v757_v42 }
 0x40e   :  { %943 = vmatpush.msra.mxu3 %v932_v41 }
 0x40f   :  { %769 = vmatpush.msrb.mxu1 %v756_v44 }
 0x410   :  { %944 = vmatpush.msra.mxu3 %v931_v43  ;;  %1510 = vmatmul.msk.f32.vlgmr.msra.gmra.mxu2 %vm692_vm2, %v2319_v38 }
 0x411   :  { %770 = vmatpush.msrb.mxu1 %v755_v46 }
 0x412   :  { %945 = vmatpush.msra.mxu3 %v930_v45 }
 0x413   :  { %771 = vmatpush.msrb.mxu1 %v754_v47 }
 0x414   :  { %946 = vmatpush.msra.mxu3 %v929_v30 }
 0x415   :  { %772 = vmatpush.msrb.mxu1 %v753_v49 }
 0x416   :  { %947 = vmatpush.msra.mxu3 %v928_v48 }
 0x417   :  { %773 = vmatpush.msrb.mxu1 %v752_v51  ;;  %v1111_v51 = vld [vmem:[%s2657_s4 + $0x250] sm:$0xff] }
 0x418   :  { %948 = vmatpush.msra.mxu3 %v927_v50  ;;  %v1112_v50 = vld [vmem:[%s2657_s4 + $0x258] sm:$0xff] }
 0x419   :  { %774 = vmatpush.msrb.mxu1 %v751_v53  ;;  %v1109_v53 = vld [vmem:[%s2657_s4 + $0x240] sm:$0xff] }
 0x41a   :  { %949 = vmatpush.msra.mxu3 %v926_v52  ;;  %v1110_v52 = vld [vmem:[%s2657_s4 + $0x248] sm:$0xff] }
 0x484   :  { %v713_v54 = vpop.f32.mrf.mxu0 }
 0x485   :  { %1497 = vmatmul.msk.f32.vlgmr.msra.gmra.mxu1 %vm692_vm2, %v713_v54  ;;  %v1108_v54 = vld [vmem:[%s2657_s4 + $0x238] sm:$0xff] }
 0x48b   :  { %v834_v56 = vpop.f32.mrf.mxu2 }
 0x48c   :  { %1503 = vmatmul.msk.f32.vlgmr.msrb.gmra.mxu3 %vm692_vm2, %v834_v56  ;;  %v1107_v56 = vld [vmem:[%s2657_s4 + $0x230] sm:$0xff] }
 0x48d   :  { %1514 = vmatpush.xpose.msk.msrb.mxu3 %vm692_vm2, %v2319_v38  ;;  %1498 = vmatmul.msk.f32.vlgmr.msrb.gmra.mxu1 %vm692_vm2, %v2319_v38 }
 0x493   :  { %v1013_v19 = vpop.f32.mrf.mxu2 }
 0x494   :  { %1507 = vmatmul.msk.f32.vlgmr.msra.gmra.mxu3 %vm692_vm2, %v2319_v38 }
 0x502   :  { %v736_v57 = vpop.f32.mrf.mxu1 }
 0x503   :  { %v740_v58 = vsel %vm739_vm3, %v736_v57, -inf }
 0x504   :  { %741 = vmax.xlane.f32.xlu2 %v740_v58  ;;  %v1105_v58 = vld [vmem:[%s2657_s4 + $0x220] sm:$0xff] }
 0x50a   :  { %v776_v59 = vpop.f32.mrf.mxu1 }
 0x50b   :  { %1499 = vmatpush.msk.msrb.mxu0 %vm783_vm4, %v776_v59 }
 0x50d   :  { %887 = vmatpush.msra.mxu0 %v878_v62 }
 0x50f   :  { %v857_v60 = vpop.f32.mrf.mxu3  ;;  %888 = vmatpush.msra.mxu0 %v877_v63 }
 0x510   :  { %v860_v61 = vsel %vm739_vm3, %v857_v60, -inf }
 0x511   :  { %861 = vmax.xlane.f32.xlu0 %v860_v61  ;;  %889 = vmatpush.msra.mxu0 %v876_v0 }
 0x513   :  { %890 = vmatpush.msra.mxu0 %v875_v11 }
 0x515   :  { %891 = vmatpush.msra.mxu0 %v874_v12 }
 0x517   :  { %892 = vmatpush.msra.mxu0 %v873_v13  ;;  %v951_v31 = vpop.f32.mrf.mxu3 }
 0x519   :  { %893 = vmatpush.msra.mxu0 %v872_v14 }
 0x51b   :  { %894 = vmatpush.msra.mxu0 %v871_v15 }
 0x577   :  { %v742_v1 = vpop.xlane.xlu2 %741 }
 0x578   :  { %v743_v2 = vsub.f32 %v736_v57, %v742_v1  ;;  %v1106_v57 = vld [vmem:[%s2657_s4 + $0x228] sm:$0xff] }
 0x57a   :  { %v744_v3 = vmul.f32 1.442695, %v743_v2 }
 0x57c   :  { %1557 = vpow2.f32 %v744_v3 }
 0x582   :  { %v1558_v4 = vpop.eup %1557 }
 0x583   :  { %v746_v5 = vsel %vm739_vm3, %v1558_v4, 0.0 }
 0x584   :  { %v862_v6 = vpop.xlane.xlu0 %861  ;;  %747 = vadd.xlane.f32.xlu2 %v746_v5 }
 0x585   :  { %v863_v7 = vsub.f32 %v857_v60, %v862_v6 }
 0x587   :  { %v864_v8 = vmul.f32 1.442695, %v863_v7 }
 0x589   :  { %1559 = vpow2.f32 %v864_v8 }
 0x58f   :  { %v1560_v9 = vpop.eup %1559 }
 0x590   :  { %v866_v10 = vsel %vm739_vm3, %v1560_v9, 0.0 }
 0x591   :  { %867 = vadd.xlane.f32.xlu1 %v866_v10 }
 0x5f7   :  { %v748_v16 = vpop.xlane.xlu2 %747 }
 0x5f8   :  { %1561 = vrcp.f32 %v748_v16 }
 0x5fe   :  { %v1562_v17 = vpop.eup %1561 }
 0x5ff   :  { %v750_v18 = vmul.f32 %v1562_v17, %v1558_v4  ;;  %v1196_v17 = vld [vmem:[%s2657_s4 + $0x2b0] sm:$0xff] }
 0x600   :  { %1210 = vmatpush.msra.mxu3 %v1196_v17 }
 0x601   :  { %1500 = vmatmul.msk.f32.vlgmr.msrb.gmra.mxu0 %vm779_vm5, %v750_v18  ;;  %v1194_v18 = vld [vmem:[%s2657_s4 + $0x2a0] sm:$0xff] }
 0x602   :  { %1511 = vmatpush.msk.msrb.mxu0 %vm783_vm4, %v1013_v19  ;;  %v1193_v19 = vld [vmem:[%s2657_s4 + $0x298] sm:$0xff] }
 0x604   :  { %v868_v21 = vpop.xlane.xlu1 %867 }
 0x605   :  { %1563 = vrcp.f32 %v868_v21  ;;  %v1192_v21 = vld [vmem:[%s2657_s4 + $0x290] sm:$0xff] }
 0x609   :  { %1504 = vmatmul.msk.f32.vlgmr.msra.gmra.mxu0 %vm692_vm2, %v2319_v38 }
 0x60a   :  { %1121 = vmatpush.msra.mxu0 %v1112_v50  ;;  %v1267_v50 = vld [vmem:[%s2657_s4 + $0x2e8] sm:$0xff] }
 0x60b   :  { %v1564_v23 = vpop.eup %1563 }
 0x60c   :  { %v870_v25 = vmul.f32 %v1564_v23, %v1560_v9  ;;  %1122 = vmatpush.msra.mxu0 %v1111_v51  ;;  %v1190_v23 = vld [vmem:[%s2657_s4 + $0x280] sm:$0xff] }
 0x60e   :  { %1123 = vmatpush.msra.mxu0 %v1110_v52 }
 0x610   :  { %1124 = vmatpush.msra.mxu0 %v1109_v53  ;;  %v1266_v53 = vld [vmem:[%s2657_s4 + $0x2e0] sm:$0xff] }
 0x612   :  { %1125 = vmatpush.msra.mxu0 %v1108_v54 }
 0x614   :  { %1126 = vmatpush.msra.mxu0 %v1107_v56  ;;  %v1265_v56 = vld [vmem:[%s2657_s4 + $0x2d8] sm:$0xff] }
 0x616   :  { %1127 = vmatpush.msra.mxu0 %v1106_v57 }
 0x618   :  { %1128 = vmatpush.msra.mxu0 %v1105_v58 }
 0x67e   :  { %v804_v22 = vpop.f32.mrf.mxu0 }
 0x67f   :  { %v808_v37 = vadd.f32 %v1535_v35, %v804_v22  ;;  %v1191_v22 = vld [vmem:[%s2657_s4 + $0x288] sm:$0xff] }
 0x686   :  { %v896_v24 = vpop.f32.mrf.mxu0 }
 0x687   :  { %1505 = vmatpush.msk.msra.mxu1 %vm783_vm4, %v896_v24 }
 0x688   :  { %1506 = vmatmul.msk.f32.vlgmr.msra.gmra.mxu1 %vm779_vm5, %v870_v25  ;;  %v1189_v25 = vld [vmem:[%s2657_s4 + $0x278] sm:$0xff] }
 0x689   :  { %1508 = vmatpush.xpose.msk.msrb.mxu1 %vm692_vm2, %v2319_v38 }
 0x68d   :  { %1059 = vmatpush.msra.mxu1 %v1050_v26 }
 0x68f   :  { %1060 = vmatpush.msra.mxu1 %v1049_v27 }
 0x690   :  { %1509 = vmatmul.msk.f32.vlgmr.msrb.gmra.mxu1 %vm692_vm2, %v951_v31 }
 0x691   :  { %1061 = vmatpush.msra.mxu1 %v1048_v20 }
 0x693   :  { %1062 = vmatpush.msra.mxu1 %v1047_v28 }
 0x695   :  { %1063 = vmatpush.msra.mxu1 %v1046_v29 }
 0x697   :  { %1064 = vmatpush.msra.mxu1 %v1045_v32 }
 0x699   :  { %1065 = vmatpush.msra.mxu1 %v1044_v33 }
 0x69b   :  { %1066 = vmatpush.msra.mxu1 %v1043_v34  ;;  %v1536_v34 = vld [vmem:[%s2657_s4 + $0x268] ss:$0 sm:$0xff] }
 0x69c   :  { %1513 = vmatmul.msk.f32.vlgmr.msra.gmra.mxu1 %vm692_vm2, %v2319_v38 }
 0x705   :  { %v922_v39 = vpop.f32.mrf.mxu1 }
 0x706   :  { %v925_v40 = vadd.f32 %v922_v39, %v808_v37  ;;  %v1537_v39 = vld [vmem:[%s2657_s4 + $0x270] ss:$0 sm:$0xff] }
 0x70d   :  { %v974_v41 = vpop.f32.mrf.mxu1 }
 0x70e   :  { %v977_v42 = vsel %vm739_vm3, %v974_v41, -inf }
 0x70f   :  { %978 = vmax.xlane.f32.xlu2 %v977_v42  ;;  %v1538_v42 = vld [vmem:[%s2657_s4 + $0x2b8] ss:$0 sm:$0xff] }
 0x719   :  { %v1068_v43 = vpop.f32.mrf.mxu1 }
 0x71a   :  { %1515 = vmatmul.msk.f32.vlgmr.msrb.gmra.mxu3 %vm692_vm2, %v1068_v43 }
 0x782   :  { %v979_v44 = vpop.xlane.xlu2 %978 }
 0x783   :  { %v980_v45 = vsub.f32 %v974_v41, %v979_v44 }
 0x785   :  { %v981_v46 = vmul.f32 1.442695, %v980_v45 }
 0x787   :  { %1565 = vpow2.f32 %v981_v46 }
 0x78d   :  { %v1566_v30 = vpop.eup %1565 }
 0x78e   :  { %v983_v47 = vsel %vm739_vm3, %v1566_v30, 0.0 }
 0x78f   :  { %984 = vadd.xlane.f32.xlu0 %v983_v47 }
 0x79d   :  { %v1091_v48 = vpop.f32.mrf.mxu3 }
 0x79e   :  { %v1094_v49 = vsel %vm739_vm3, %v1091_v48, -inf }
 0x79f   :  { %1095 = vmax.xlane.f32.xlu1 %v1094_v49  ;;  %v1268_v49 = vld [vmem:[%s2657_s4 + $0x2f0] sm:$0xff] }
 0x802   :  { %v985_v59 = vpop.xlane.xlu0 %984 }
 0x803   :  { %1567 = vrcp.f32 %v985_v59 }
 0x809   :  { %v1568_v60 = vpop.eup %1567 }
 0x80a   :  { %v987_v61 = vmul.f32 %v1568_v60, %v1566_v30  ;;  %v1264_v60 = vld [vmem:[%s2657_s4 + $0x2d0] sm:$0xff] }
 0x80c   :  { %1512 = vmatmul.msk.f32.vlgmr.msrb.gmra.mxu0 %vm779_vm5, %v987_v61  ;;  %v1263_v61 = vld [vmem:[%s2657_s4 + $0x2c8] sm:$0xff] }
 0x812   :  { %v1096_v62 = vpop.xlane.xlu1 %1095 }
 0x813   :  { %v1097_v63 = vsub.f32 %v1091_v48, %v1096_v62  ;;  %v1269_v48 = vld [vmem:[%s2657_s4 + $0x2f8] sm:$0xff] }
 0x814   :  { %1516 = vmatmul.msk.f32.vlgmr.msra.gmra.mxu0 %vm692_vm2, %v2319_v38  ;;  %1283 = vmatpush.msrb.mxu1 %v1269_v48  ;;  %v1355_v48 = vld [vmem:[%s2657_s4 + $0x3f0] sm:$0xff] }
 0x815   :  { %v1098_v0 = vmul.f32 1.442695, %v1097_v63  ;;  %v1262_v63 = vld [vmem:[%s2657_s4 + $0x2c0] sm:$0xff] }
 0x816   :  { %1284 = vmatpush.msrb.mxu1 %v1268_v49 }
 0x817   :  { %1569 = vpow2.f32 %v1098_v0 }
 0x818   :  { %1285 = vmatpush.msrb.mxu1 %v1267_v50 }
 0x81a   :  { %1286 = vmatpush.msrb.mxu1 %v1266_v53 }
 0x81c   :  { %1287 = vmatpush.msrb.mxu1 %v1265_v56 }
 0x81d   :  { %v1570_v1 = vpop.eup %1569 }
 0x81e   :  { %v1100_v2 = vsel %vm739_vm3, %v1570_v1, 0.0  ;;  %1288 = vmatpush.msrb.mxu1 %v1264_v60  ;;  %vm1430_vm3 = vcmask 130048  }
 0x81f   :  { %1101 = vadd.xlane.f32.xlu2 %v1100_v2 }
 0x820   :  { %1289 = vmatpush.msrb.mxu1 %v1263_v61 }
 0x822   :  { %1290 = vmatpush.msrb.mxu1 %v1262_v63 }
 0x889   :  { %v1039_v3 = vpop.f32.mrf.mxu0 }
 0x88a   :  { %v1042_v4 = vadd.f32 %v1039_v3, %v925_v40 }
 0x891   :  { %v1130_v6 = vpop.f32.mrf.mxu0 }
 0x892   :  { %v1102_v5 = vpop.xlane.xlu2 %1101  ;;  %1517 = vmatpush.msk.msrb.mxu2 %vm783_vm4, %v1130_v6  ;;  %vm1484_vm4 = vcmask 11264  }
 0x893   :  { %1571 = vrcp.f32 %v1102_v5 }
 0x899   :  { %v1572_v7 = vpop.eup %1571 }
 0x89a   :  { %v1104_v8 = vmul.f32 %v1572_v7, %v1570_v1 }
 0x89c   :  { %1518 = vmatmul.msk.f32.vlgmr.msrb.gmra.mxu2 %vm779_vm5, %v1104_v8 }
 0x91f   :  { %v1156_v9 = vpop.f32.mrf.mxu2 }
 0x920   :  { %v1159_v10 = vadd.f32 %v1156_v9, %v1042_v4 }
 0x922   :  { %v2489_v11 = vadd.f32 %v1159_v10, %v2228_v55  ;;  %v1195_v55 = vld [vmem:[%s2657_s4 + $0x2a8] sm:$0xff] }
 0x923   :  { %1211 = vmatpush.msra.mxu3 %v1195_v55 }
 0x924   :  { %v1163_v38 = vsel %vm621_vm10, %v2489_v11, 0.0 }
 0x925   :  { %1164 = vadd.xlane.f32.xlu0 %v1163_v38  ;;  %1212 = vmatpush.msra.mxu3 %v1194_v18 }
 0x927   :  { %1213 = vmatpush.msra.mxu3 %v1193_v19 }
 0x929   :  { %1214 = vmatpush.msra.mxu3 %v1192_v21 }
 0x92b   :  { %1215 = vmatpush.msra.mxu3 %v1191_v22 }
 0x92d   :  { %1216 = vmatpush.msra.mxu3 %v1190_v23  ;;  %v1539_v23 = vld [vmem:[%s2657_s4 + $0x300] ss:$0 sm:$0xff] }
 0x92f   :  { %1217 = vmatpush.msra.mxu3 %v1189_v25 }
 0x998   :  { %v1165_v12 = vpop.xlane.xlu0 %1164 }
 0x999   :  { %v1166_v13 = vmul.f32 %v1165_v12, %v2217_v36 }
 0x99b   :  { %v1167_v14 = vsub.f32 %v2489_v11, %v1166_v13 }
 0x99d   :  { %v1168_v15 = vmul.f32 %v1167_v14, %v1167_v14 }
 0x99f   :  { %v1169_v16 = vsel %vm621_vm10, %v1168_v15, 0.0 }
 0x9a0   :  { %1170 = vadd.xlane.f32.xlu1 %v1169_v16 }
 0xa13   :  { %v1171_v24 = vpop.xlane.xlu1 %1170 }
 0xa14   :  { %v1172_v26 = vmul.f32 %v1171_v24, %v2217_v36 }
 0xa16   :  { %v1173_v27 = vadd.f32 1e-05, %v1172_v26 }
 0xa18   :  { %1573 = vrsqrt.f32 %v1173_v27  ;;  %vm1180_vm7 = vweird.f32 %v1173_v27 }
 0xa1e   :  { %v1574_v20 = vpop.eup %1573 }
 0xa1f   :  { %v1175_v28 = vmul.f32 %v1574_v20, %v1173_v27  ;;  %vm1181_vm6 = vweird.f32 %v1574_v20 }
 0xa20   :  { %vm1182_vm8 = vmor %vm1180_vm7, %vm1181_vm6 }
 0xa21   :  { %v1176_v29 = vmul.f32 %v1574_v20, %v1175_v28 }
 0xa23   :  { %v1177_v31 = vmul.f32 0.5, %v1176_v29 }
 0xa25   :  { %v1178_v32 = vsub.f32 1.5, %v1177_v31 }
 0xa27   :  { %v1179_v33 = vmul.f32 %v1574_v20, %v1178_v32 }
 0xa29   :  { %v1183_v35 = vsel %vm1182_vm8, %v1574_v20, %v1179_v33  ;;  %v1331_v33 = vld [vmem:[%s2657_s4 + $0x3e8] sm:$0xff] }
 0xa2a   :  { %v1184_v37 = vmul.f32 %v1183_v35, %v1167_v14  ;;  %1343 = vmatpush.msra.mxu2 %v1331_v33  ;;  %v1361_v35 = vld [vmem:[%s2657_s4 + $0x420] sm:$0xff] }
 0xa2c   :  { %v1186_v40 = vmul.f32 %v1536_v34, %v1184_v37  ;;  %v1362_v34 = vld [vmem:[%s2657_s4 + $0x428] sm:$0xff]  ;;  %v1329_v37 = vld [vmem:[%s2657_s4 + $0x3d8] sm:$0xff] }
 0xa2d   :  { %1371 = vmatpush.msrb.mxu0 %v1362_v34 }
 0xa2e   :  { %v1188_v41 = vadd.f32 %v1537_v39, %v1186_v40  ;;  %v1360_v39 = vld [vmem:[%s2657_s4 + $0x418] sm:$0xff]  ;;  %v1328_v40 = vld [vmem:[%s2657_s4 + $0x3d0] sm:$0xff] }
 0xa2f   :  { %1372 = vmatpush.msrb.mxu0 %v1361_v35 }
 0xa30   :  { %1519 = vmatmul.msk.f32.vlgmr.msra.gmra.mxu3 %vm692_vm2, %v1188_v41  ;;  %v1359_v41 = vld [vmem:[%s2657_s4 + $0x410] sm:$0xff] }
 0xa31   :  { %1373 = vmatpush.msrb.mxu0 %v1360_v39 }
 0xa33   :  { %1374 = vmatpush.msrb.mxu0 %v1359_v41 }
 0xab3   :  { %v1219_v43 = vpop.f32.mrf.mxu3 }
 0xab4   :  { %v1220_v44 = vadd.f32 %v1538_v42, %v1219_v43  ;;  %v1327_v42 = vld [vmem:[%s2657_s4 + $0x3c8] sm:$0xff] }
 0xab5   :  { %v1358_v43 = vld [vmem:[%s2657_s4 + $0x408] sm:$0xff] }
 0xab6   :  { %v1222_v45 = vmul.f32 0.70710677, %v1220_v44  ;;  %v1259_v19 = vmul.f32 0.5, %v1220_v44  ;;  %1375 = vmatpush.msrb.mxu0 %v1358_v43  ;;  %v1326_v44 = vld [vmem:[%s2657_s4 + $0x3c0] sm:$0xff] }
 0xab8   :  { %v1223_v46 = vand.u32 2147483647, %v1222_v45  ;;  %vm1256_vm15 = vcmp.ge.f32.partialorder %v1222_v45, 0.0  ;;  %v1357_v45 = vld [vmem:[%s2657_s4 + $0x400] sm:$0xff] }
 0xab9   :  { %1376 = vmatpush.msrb.mxu0 %v1357_v45 }
 0xaba   :  { %v1224_v30 = vmul.f32 0.3275911, %v1223_v46  ;;  %v1250_v3 = vsub.f32 0.0, %v1223_v46 }
 0xabc   :  { %v1225_v47 = vadd.f32 1.0, %v1224_v30  ;;  %v1251_v6 = vmul.f32 %v1250_v3, %v1223_v46  ;;  %v1325_v46 = vld [vmem:[%s2657_s4 + $0x3b8] sm:$0xff] }
 0xabd   :  { %v1356_v30 = vld [vmem:[%s2657_s4 + $0x3f8] sm:$0xff] }
 0xabe   :  { %1575 = vrcp.f32 %v1225_v47  ;;  %v1237_v57 = vand.u32 2147483648, %v1225_v47  ;;  %v1235_v59 = vand.u32 2147483647, %v1225_v47  ;;  %vm1231_vm12 = vweird.f32 %v1225_v47  ;;  %1377 = vmatpush.msrb.mxu0 %v1356_v30  ;;  %v1394_v3 = vld [vmem:[%s2657_s4 + $0x318] sm:$0xff] }
 0xabf   :  { %v1252_v9 = vmul.f32 1.442695, %v1251_v6 }
 0xac0   :  { %v1238_v0 = vor.u32 1.1754944e-38, %v1237_v57  ;;  %vm1236_vm14 = vcmp.eq.f32.partialorder %v1235_v59, 8.507059e+37  ;;  %1378 = vmatpush.msrb.mxu0 %v1355_v48  ;;  %v1540_v59 = vld [vmem:[%s2657_s4 + $0x308] ss:$0 sm:$0xff] }
 0xac1   :  { %1577 = vpow2.f32 %v1252_v9  ;;  %v1427_v9 = vld [vmem:[%s2657_s4 + $0x348] sm:$0xff] }
 0xac2   :  { %1448 = vmatpush.msra.mxu1 %v1427_v9 }
 0xac4   :  { %v1576_v51 = vpop.eup %1575 }
 0xac5   :  { %v1227_v52 = vmul.f32 %v1576_v51, %v1225_v47  ;;  %vm1232_vm11 = vweird.f32 %v1576_v51  ;;  %v1324_v47 = vld [vmem:[%s2657_s4 + $0x3b0] sm:$0xff] }
 0xac6   :  { %vm1233_vm13 = vmor %vm1231_vm12, %vm1232_vm11 }
 0xac7   :  { %v1228_v54 = vsub.f32 1.0, %v1227_v52  ;;  %v1578_v15 = vpop.eup %1577 }
 0xac9   :  { %v1229_v58 = vmul.f32 %v1576_v51, %v1228_v54 }
 0xacb   :  { %v1230_v62 = vadd.f32 %v1576_v51, %v1229_v58 }
 0xacd   :  { %v1234_v1 = vsel %vm1233_vm13, %v1576_v51, %v1230_v62 }
 0xace   :  { %v1239_v2 = vsel %vm1236_vm14, %v1238_v0, %v1234_v1  ;;  %v1397_v0 = vld [vmem:[%s2657_s4 + $0x330] sm:$0xff]  ;;  %v1396_v1 = vld [vmem:[%s2657_s4 + $0x328] sm:$0xff] }
 0xacf   :  { %v1241_v4 = vmul.f32 1.0614054, %v1239_v2  ;;  %1415 = vmatpush.msrb.mxu3 %v1397_v0 }
 0xad1   :  { %v1242_v5 = vadd.f32 -1.4531521, %v1241_v4  ;;  %1416 = vmatpush.msrb.mxu3 %v1396_v1 }
 0xad3   :  { %v1243_v7 = vmul.f32 %v1242_v5, %v1239_v2 }
 0xad5   :  { %v1244_v8 = vadd.f32 1.4214138, %v1243_v7  ;;  %v1391_v7 = vld [vmem:[#allocation1] sm:$0xff] }
 0xad7   :  { %v1245_v10 = vmul.f32 %v1244_v8, %v1239_v2 }
 0xad9   :  { %v1246_v38 = vadd.f32 -0.28449672, %v1245_v10  ;;  %v1426_v10 = vld [vmem:[%s2657_s4 + $0x340] sm:$0xff] }
 0xada   :  { %1449 = vmatpush.msra.mxu1 %v1426_v10 }
 0xadb   :  { %v1247_v12 = vmul.f32 %v1246_v38, %v1239_v2  ;;  %v1542_v38 = vld [vmem:[%s2657_s4 + $0x338] ss:$0 sm:$0xff] }
 0xadd   :  { %v1248_v13 = vadd.f32 0.2548296, %v1247_v12 }
 0xadf   :  { %v1249_v14 = vmul.f32 %v1248_v13, %v1239_v2  ;;  %v1395_v2 = vld [vmem:[%s2657_s4 + $0x320] sm:$0xff] }
 0xae0   :  { %1417 = vmatpush.msrb.mxu3 %v1395_v2 }
 0xae1   :  { %v1254_v16 = vmul.f32 %v1578_v15, %v1249_v14 }
 0xae2   :  { %1418 = vmatpush.msrb.mxu3 %v1394_v3 }
 0xae3   :  { %v1255_v17 = vsub.f32 1.0, %v1254_v16  ;;  %v1458_v16 = vld [vmem:[%s2657_s4 + $0x360] sm:$0xff] }
 0xae5   :  { %v1257_v55 = vsub.f32 0.0, %v1255_v17 }
 0xae7   :  { %v1258_v18 = vsel %vm1256_vm15, %v1255_v17, %v1257_v55  ;;  %v1457_v17 = vld [vmem:[%s2657_s4 + $0x358] sm:$0xff]  ;;  %v1543_v55 = vld [vmem:[%s2657_s4 + $0x350] ss:$0 sm:$0xff] }
 0xae8   :  { %v1260_v21 = vadd.f32 1.0, %v1258_v18 }
 0xaea   :  { %v1261_v22 = vmul.f32 %v1260_v21, %v1259_v19 }
 0xaec   :  { %1520 = vmatmul.msk.f32.vlgmr.msrb.gmra.mxu1 %vm692_vm2, %v1261_v22 }
 0xb69   :  { %v1292_v25 = vpop.f32.mrf.mxu1 }
 0xb6a   :  { %v1293_v24 = vadd.f32 %v1539_v23, %v1292_v25  ;;  %v1544_v23 = vld [vmem:[%s2657_s4 + $0x368] ss:$0 sm:$0xff] }
 0xb6c   :  { %v1295_v26 = vadd.f32 %v1293_v24, %v2489_v11  ;;  %v1330_v11 = vld [vmem:[%s2657_s4 + $0x3e0] sm:$0xff] }
 0xb6d   :  { %1344 = vmatpush.msra.mxu2 %v1330_v11 }
 0xb6e   :  { %v1298_v27 = vsel %vm621_vm10, %v1295_v26, 0.0 }
 0xb6f   :  { %1299 = vadd.xlane.f32.xlu2 %v1298_v27  ;;  %1345 = vmatpush.msra.mxu2 %v1329_v37 }
 0xb71   :  { %1346 = vmatpush.msra.mxu2 %v1328_v40 }
 0xb73   :  { %1347 = vmatpush.msra.mxu2 %v1327_v42 }
 0xb75   :  { %1348 = vmatpush.msra.mxu2 %v1326_v44 }
 0xb77   :  { %1349 = vmatpush.msra.mxu2 %v1325_v46 }
 0xb79   :  { %1350 = vmatpush.msra.mxu2 %v1324_v47 }
 0xb7b   :  { %1478 = vmatpush.msrb.mxu2 %v1458_v16 }
 0xb7d   :  { %1479 = vmatpush.msrb.mxu2 %v1457_v17 }
 0xbe2   :  { %v1300_v20 = vpop.xlane.xlu2 %1299 }
 0xbe3   :  { %v1301_v28 = vmul.f32 %v1300_v20, %v2217_v36 }
 0xbe5   :  { %v1302_v29 = vsub.f32 %v1295_v26, %v1301_v28 }
 0xbe7   :  { %v1303_v31 = vmul.f32 %v1302_v29, %v1302_v29 }
 0xbe9   :  { %v1304_v32 = vsel %vm621_vm10, %v1303_v31, 0.0 }
 0xbea   :  { %1305 = vadd.xlane.f32.xlu0 %v1304_v32 }
 0xc5d   :  { %v1306_v49 = vpop.xlane.xlu0 %1305 }
 0xc5e   :  { %v1307_v50 = vmul.f32 %v1306_v49, %v2217_v36  ;;  %v1541_v36 = vld [vmem:[%s2657_s4 + $0x310] ss:$0 sm:$0xff] }
 0xc60   :  { %v1308_v51 = vadd.f32 1e-05, %v1307_v50 }
 0xc62   :  { %1579 = vrsqrt.f32 %v1308_v51  ;;  %vm1315_vm0 = vweird.f32 %v1308_v51 }
 0xc68   :  { %v1580_v52 = vpop.eup %1579 }
 0xc69   :  { %v1310_v53 = vmul.f32 %v1580_v52, %v1308_v51  ;;  %vm1316_vm10 = vweird.f32 %v1580_v52 }
 0xc6a   :  { %vm1317_vm1 = vmor %vm1315_vm0, %vm1316_vm10 }
 0xc6b   :  { %v1311_v54 = vmul.f32 %v1580_v52, %v1310_v53 }
 0xc6d   :  { %v1312_v56 = vmul.f32 0.5, %v1311_v54 }
 0xc6f   :  { %v1313_v57 = vsub.f32 1.5, %v1312_v56 }
 0xc71   :  { %v1314_v58 = vmul.f32 %v1580_v52, %v1313_v57 }
 0xc73   :  { %v1318_v60 = vsel %vm1317_vm1, %v1580_v52, %v1314_v58 }
 0xc74   :  { %v1319_v61 = vmul.f32 %v1318_v60, %v1302_v29 }
 0xc76   :  { %v1321_v62 = vmul.f32 %v1540_v59, %v1319_v61 }
 0xc78   :  { %v1323_v63 = vadd.f32 %v1541_v36, %v1321_v62 }
 0xc7a   :  { %1521 = vmatmul.msk.f32.vlgmr.msra.gmra.mxu2 %vm692_vm2, %v1323_v63  ;;  %1522 = vmatmul.msk.f32.vlgmr.msrb.gmra.mxu0 %vm692_vm2, %v1323_v63 }
 0xcf7   :  { %v1380_v4 = vpop.f32.mrf.mxu0 }
 0xcfd   :  { %v1352_v5 = vpop.f32.mrf.mxu2 }
 0xcfe   :  { %v1383_v6 = vmax.f32 %v1352_v5, %v1380_v4 }
 0xd00   :  { %v1393_v8 = vadd.f32 %v1391_v7, %v1383_v6 }
 0xd02   :  { %1523 = vmatmul.msk.f32.vlgmr.msrb.gmra.mxu3 %vm119_vm9, %v1393_v8 }
 0xd85   :  { %v1420_v12 = vpop.f32.mrf.mxu3 }
 0xd86   :  { %v1421_v13 = vadd.f32 %v1542_v38, %v1420_v12 }
 0xd88   :  { %vm1423_vm2 = vcmp.ge.f32.partialorder %v1421_v13, 0.0  ;;  %v1424_v14 = vmul.f32 0.2, %v1421_v13 }
 0xd8a   :  { %v1425_v15 = vsel %vm1423_vm2, %v1421_v13, %v1424_v14 }
 0xd8b   :  { %1524 = vmatmul.msk.f32.vlgmr.msra.gmra.mxu1 %vm1430_vm3, %v1425_v15 }
 0xe08   :  { %v1451_v18 = vpop.f32.mrf.mxu1 }
 0xe09   :  { %v1452_v19 = vadd.f32 %v1543_v55, %v1451_v18 }
 0xe0b   :  { %vm1454_vm9 = vcmp.ge.f32.partialorder %v1452_v19, 0.0  ;;  %v1455_v21 = vmul.f32 0.2, %v1452_v19 }
 0xe0d   :  { %v1456_v22 = vsel %vm1454_vm9, %v1452_v19, %v1455_v21 }
 0xe0e   :  { %1525 = vmatmul.msk.f32.vlgmr.msrb.gmra.mxu2 %vm1430_vm3, %v1456_v22 }
 0xe91   :  { %v1481_v25 = vpop.f32.mrf.mxu2 }
 0xe92   :  { %v1482_v24 = vadd.f32 %v1544_v23, %v1481_v25 }
 0xe94   :  { %1485 = vst.msk [vmem:[%s2662_s5] sm:$0xf] %vm1484_vm4, %v1482_v24 }

</bundles_post_ra>
